<compile_context>
chip_gen: v7x
topology: tpu7x:2x2x1
jax: 0.10.0
libtpu: 0.0.40
codegen_flags: <defaults>
</compile_context>

<pallas_src>
import functools

import jax
import jax.numpy as jnp
from jax.experimental import pallas as pl
from jax.experimental.pallas import tpu as pltpu

IMG_SIZE = 32            # module uses 256; reduced for the small self-test
NUM_LABELS = 14
BN_EPS = 1e-5
DEFAULT_TILE_M = 1024    # rows per grid step (multiple of 8), per review 512-1024
_VMEM_LIMIT = 48 * 1024 * 1024   # below v7x's 64 MiB physical, above 32 MiB default


def _round_up(x, m):
    return (x + m - 1) // m * m


# ----------------------------------------------------------------------------
# Kernel 1: fused  (A @ W) [+ bias] [+ LeakyReLU] [+ per-tile BN partial stats]
# A, W are bf16; accumulation and epilogue are f32.
# ----------------------------------------------------------------------------
def _matmul_kernel(*refs, with_bias, with_stats, slope):
    if with_bias:
        a_ref, w_ref, b_ref = refs[:3]
        rest = refs[3:]
    else:
        a_ref, w_ref = refs[:2]
        b_ref = None
        rest = refs[2:]
    if with_stats:
        o_ref, stats_ref = rest
    else:
        (o_ref,) = rest

    y = jnp.dot(a_ref[...], w_ref[...], preferred_element_type=jnp.float32)
    if b_ref is not None:
        y = y + b_ref[...]

    if with_stats:
        # Per-tile partial sums for BatchNorm batch statistics.  Zero-padded
        # rows contribute 0; the host-side reduction divides by the true M.
        s = jnp.sum(y, axis=0, keepdims=True)
        sq = jnp.sum(y * y, axis=0, keepdims=True)
        stats_ref[...] = jnp.concatenate([s, sq], axis=0)[None]

    if slope is not None:                     # LeakyReLU
        y = jnp.where(y >= 0.0, y, slope * y)

    o_ref[...] = y.astype(o_ref.dtype)


def fused_matmul(a, w, bias=None, *, slope=None, collect_stats=False,
                 out_dtype=jnp.float32, tile_m=DEFAULT_TILE_M):
    """(M,K)@(K,N) [+bias] [+LeakyReLU], M-tiled & pipelined.

    Returns the zero-padded (Mp, Np) result (and, if collect_stats, the
    per-tile (num_tiles, 2, Np) [sum, sumsq] partial statistics).  The caller
    slices back to (M, N).
    """
    M, K = a.shape
    Kw, N = w.shape
    assert K == Kw
    Np = _round_up(N, 128)                                # lane-dense output
    tm = min(_round_up(tile_m, 8), _round_up(M, 8))       # sublane-aligned tile
    Mp = _round_up(M, tm)
    num_tiles = Mp // tm

    a_p = jnp.pad(a.astype(jnp.bfloat16), ((0, Mp - M), (0, 0)))
    w_p = jnp.pad(w.astype(jnp.bfloat16), ((0, 0), (0, Np - N)))
    inputs = [a_p, w_p]
    in_specs = [
        pl.BlockSpec((tm, K), lambda i: (i, 0)),    # A: streamed M tiles
        pl.BlockSpec((K, Np), lambda i: (0, 0)),    # W: resident across grid
    ]
    with_bias = bias is not None
    if with_bias:
        b_p = jnp.pad(bias.astype(jnp.float32).reshape(1, N),
                      ((0, 0), (0, Np - N)))
        inputs.append(b_p)
        in_specs.append(pl.BlockSpec((1, Np), lambda i: (0, 0)))

    out_shapes = [jax.ShapeDtypeStruct((Mp, Np), out_dtype)]
    out_specs = [pl.BlockSpec((tm, Np), lambda i: (i, 0))]
    if collect_stats:
        out_shapes.append(jax.ShapeDtypeStruct((num_tiles, 2, Np), jnp.float32))
        out_specs.append(pl.BlockSpec((1, 2, Np), lambda i: (i, 0, 0)))

    bytes_in = a_p.size * 2 + w_p.size * 2 + (Np * 4 if with_bias else 0)
    bytes_out = Mp * Np * jnp.dtype(out_dtype).itemsize
    if collect_stats:
        bytes_out += num_tiles * 2 * Np * 4
    cost = pl.CostEstimate(flops=2 * Mp * K * Np, transcendentals=0,
                           bytes_accessed=int(bytes_in + bytes_out))

    kernel = functools.partial(_matmul_kernel, with_bias=with_bias,
                               with_stats=collect_stats, slope=slope)
    return pl.pallas_call(
        kernel,
        out_shape=tuple(out_shapes) if collect_stats else out_shapes[0],
        grid=(num_tiles,),
        in_specs=in_specs,
        out_specs=tuple(out_specs) if collect_stats else out_specs[0],
        compiler_params=pltpu.CompilerParams(
            dimension_semantics=("parallel",),
            vmem_limit_bytes=_VMEM_LIMIT),
        cost_estimate=cost,
    )(*inputs)


# ----------------------------------------------------------------------------
# Kernel 2: per-channel affine (BN scale/shift) + LeakyReLU, M-tiled
# ----------------------------------------------------------------------------
def _affine_act_kernel(y_ref, scale_ref, shift_ref, o_ref, *, slope):
    y = y_ref[...] * scale_ref[...] + shift_ref[...]
    if slope is not None:
        y = jnp.where(y >= 0.0, y, slope * y)
    o_ref[...] = y.astype(o_ref.dtype)


def affine_act(y_pad, scale, shift, *, slope, out_dtype=jnp.bfloat16,
               tile_m=DEFAULT_TILE_M):
    Mp, Np = y_pad.shape
    tm = min(_round_up(tile_m, 8), Mp)
    assert Mp % tm == 0     # Mp was padded upstream with the same tile size
    num_tiles = Mp // tm
    cost = pl.CostEstimate(
        flops=3 * Mp * Np, transcendentals=0,
        bytes_accessed=int(Mp * Np * (4 + jnp.dtype(out_dtype).itemsize) + 2 * Np * 4))
    return pl.pallas_call(
        functools.partial(_affine_act_kernel, slope=slope),
        out_shape=jax.ShapeDtypeStruct((Mp, Np), out_dtype),
        grid=(num_tiles,),
        in_specs=[pl.BlockSpec((tm, Np), lambda i: (i, 0)),
                  pl.BlockSpec((1, Np), lambda i: (0, 0)),
                  pl.BlockSpec((1, Np), lambda i: (0, 0))],
        out_specs=pl.BlockSpec((tm, Np), lambda i: (i, 0)),
        compiler_params=pltpu.CompilerParams(
            dimension_semantics=("parallel",),
            vmem_limit_bytes=_VMEM_LIMIT),
        cost_estimate=cost,
    )(y_pad, scale.reshape(1, Np), shift.reshape(1, Np))


# ----------------------------------------------------------------------------
# Glue: im2col for Conv2d(kernel=4, stride=2, padding=1), NHWC, bf16
# ----------------------------------------------------------------------------
def im2col(x, k=4, s=2, p=1):
    # TODO(synk): fusing the patch extraction into the matmul kernel (to kill
    # the HBM-materialised patch tensor) needs halo-overlapped input blocks
    # (pl.Element offsets / manual DMA); kept as XLA glue, in bf16, for now.
    B, H, W, C = x.shape
    xp = jnp.pad(x, ((0, 0), (p, p), (p, p), (0, 0)))
    Ho = (H + 2 * p - k) // s + 1
    Wo = (W + 2 * p - k) // s + 1
    cols = []
    for kh in range(k):
        for kw in range(k):
            cols.append(xp[:, kh:kh + s * (Ho - 1) + 1:s,
                           kw:kw + s * (Wo - 1) + 1:s, :])
    patches = jnp.concatenate(cols, axis=-1)              # (B, Ho, Wo, k*k*C)
    return patches.reshape(B * Ho * Wo, k * k * C), Ho, Wo


def conv_layer(x, w_torch, bias=None, gamma=None, beta=None, *, slope=None,
               out_dtype=jnp.bfloat16, tile_m=DEFAULT_TILE_M):
    """x: NHWC bf16. w_torch: PyTorch layout (Cout, Cin, kh, kw)."""
    B = x.shape[0]
    cout, cin, k, _ = w_torch.shape
    patches, Ho, Wo = im2col(x, k=k, s=2, p=1)
    M = B * Ho * Wo
    # (Cout, Cin, kh, kw) -> (kh, kw, Cin, Cout) -> (k*k*Cin, Cout) [im2col order]
    w2 = jnp.transpose(w_torch, (2, 3, 1, 0)).reshape(k * k * cin, cout)

    if gamma is None:
        y_pad = fused_matmul(patches, w2, bias, slope=slope,
                             out_dtype=out_dtype, tile_m=tile_m)
        y = y_pad[:M, :cout]
    else:
        # BN layer: conv bias skipped (cancelled exactly by the mean subtraction).
        y_pad, stats = fused_matmul(patches, w2, None, slope=None,
                                    collect_stats=True,
                                    out_dtype=jnp.float32, tile_m=tile_m)
        Np = y_pad.shape[1]
        s = jnp.sum(stats[:, 0, :cout], axis=0)
        sq = jnp.sum(stats[:, 1, :cout], axis=0)
        mean = s / M
        var = jnp.maximum(sq / M - mean * mean, 0.0)      # biased var (training BN)
        scale = gamma * jax.lax.rsqrt(var + BN_EPS)
        shift = beta - mean * scale
        scale = jnp.pad(scale, (0, Np - cout))
        shift = jnp.pad(shift, (0, Np - cout))
        # TODO(synk): BatchNorm running-stat (momentum) buffer updates are not
        # modeled; they do not affect the training-mode forward output.
        y = affine_act(y_pad, scale, shift, slope=slope,
                       out_dtype=out_dtype, tile_m=tile_m)[:M, :cout]
    return y.reshape(B, Ho, Wo, cout)


# ----------------------------------------------------------------------------
# Discriminator forward
# ----------------------------------------------------------------------------
def discriminator_forward(img, labels, p, tile_m=DEFAULT_TILE_M):
    """img: (B, 1, S, S) NCHW float32; labels: (B, NUM_LABELS) float32."""
    B = img.shape[0]
    S = IMG_SIZE

    # label_embedding: Linear(label_dim, S*S); torch weight is (out, in).
    # Tiny (M=B) matmul: M is padded to 8 sublanes inside fused_matmul.
    lab_pad = fused_matmul(labels, p["lin_w"].T, p["lin_b"],
                           out_dtype=jnp.bfloat16, tile_m=tile_m)
    label_map = lab_pad[:B, :S * S].reshape(B, S, S, 1)

    x = jnp.transpose(img, (0, 2, 3, 1)).astype(jnp.bfloat16)   # NCHW -> NHWC
    x = jnp.concatenate([x, label_map], axis=-1)                # (B, S, S, 2)

    x = conv_layer(x, p["c1_w"], p["c1_b"], slope=0.2, tile_m=tile_m)
    x = conv_layer(x, p["c2_w"], None, p["bn2_g"], p["bn2_b"], slope=0.2,
                   tile_m=tile_m)
    x = conv_layer(x, p["c3_w"], None, p["bn3_g"], p["bn3_b"], slope=0.2,
                   tile_m=tile_m)
    x = conv_layer(x, p["c4_w"], p["c4_b"], slope=None,
                   out_dtype=jnp.float32, tile_m=tile_m)         # no BN / act

    # torch .view(-1) flattens NCHW; our x is (B, Ho, Wo, 1) -> match ordering.
    return jnp.transpose(x, (0, 3, 1, 2)).reshape(-1)


# ----------------------------------------------------------------------------
# Pure-JAX (XLA) reference with the same dtype policy, for validation
# ----------------------------------------------------------------------------
def reference_forward(img, labels, p):
    def mm(a, w, b=None):
        y = jnp.dot(a.astype(jnp.bfloat16), w.astype(jnp.bfloat16),
                    preferred_element_type=jnp.float32)
        return y if b is None else y + b.astype(jnp.float32)

    def leaky(y):
        return jnp.where(y >= 0.0, y, 0.2 * y)

    B, S = img.shape[0], IMG_SIZE
    lab = mm(labels, p["lin_w"].T, p["lin_b"]).astype(jnp.bfloat16)
    x = jnp.concatenate([jnp.transpose(img, (0, 2, 3, 1)).astype(jnp.bfloat16),
                         lab.reshape(B, S, S, 1)], axis=-1)

    def conv(x, w_t, b=None, gamma=None, beta=None, act=True, final=False):
        cout, cin, k, _ = w_t.shape
        patches, Ho, Wo = im2col(x, k=k, s=2, p=1)
        w2 = jnp.transpose(w_t, (2, 3, 1, 0)).reshape(k * k * cin, cout)
        y = mm(patches, w2, b)
        if gamma is not None:
            mean = jnp.mean(y, axis=0)
            var = jnp.maximum(jnp.mean(y * y, axis=0) - mean * mean, 0.0)
            y = (y - mean) * jax.lax.rsqrt(var + BN_EPS) * gamma + beta
        if act:
            y = leaky(y)
        if not final:
            y = y.astype(jnp.bfloat16)
        return y.reshape(B, Ho, Wo, cout)

    x = conv(x, p["c1_w"], p["c1_b"])
    x = conv(x, p["c2_w"], None, p["bn2_g"], p["bn2_b"])
    x = conv(x, p["c3_w"], None, p["bn3_g"], p["bn3_b"])
    x = conv(x, p["c4_w"], p["c4_b"], act=False, final=True)
    return jnp.transpose(x, (0, 3, 1, 2)).reshape(-1)


def init_params(key):
    ks = jax.random.split(key, 12)
    n = lambda k, shp, s=0.05: (s * jax.random.normal(k, shp)).astype(jnp.float32)
    S2 = IMG_SIZE * IMG_SIZE
    return {
        "lin_w": n(ks[0], (S2, NUM_LABELS)),
        "lin_b": n(ks[1], (S2,)),
        "c1_w": n(ks[2], (64, 2, 4, 4)),   "c1_b": n(ks[3], (64,)),
        # c2_b / c3_b exist in the torch module but cancel under BatchNorm.
        "c2_w": n(ks[4], (128, 64, 4, 4)), "c2_b": n(ks[5], (128,)),
        "bn2_g": jnp.ones((128,), jnp.float32) + n(ks[6], (128,)),
        "bn2_b": n(ks[7], (128,)),
        "c3_w": n(ks[8], (256, 128, 4, 4)), "c3_b": n(ks[9], (256,)),
        "bn3_g": jnp.ones((256,), jnp.float32) + n(ks[10], (256,)),
        "bn3_b": n(ks[11], (256,)),
        "c4_w": n(ks[0], (1, 256, 4, 4)),  "c4_b": jnp.zeros((1,), jnp.float32),
    }


if __name__ == "__main__":
    key = jax.random.PRNGKey(0)
    k_img, k_lab, k_par = jax.random.split(key, 3)

    B = 2
    img = jax.random.normal(k_img, (B, 1, IMG_SIZE, IMG_SIZE), jnp.float32)
    labels = (jax.random.uniform(k_lab, (B, NUM_LABELS)) > 0.5).astype(jnp.float32)
    params = init_params(k_par)

    fwd = jax.jit(discriminator_forward, static_argnames="tile_m")
    out = jax.block_until_ready(fwd(img, labels, params))
    # Small tile size to also exercise multi-tile grids, M padding and the
    # cross-tile BatchNorm-statistics path at these small test shapes.
    out_small = jax.block_until_ready(fwd(img, labels, params, tile_m=48))

    expected_len = B * (IMG_SIZE // 16) * (IMG_SIZE // 16)   # 4 stride-2 convs
    assert out.shape == (expected_len,), out.shape
    assert jnp.all(jnp.isfinite(out)) and jnp.all(jnp.isfinite(out_small))

    ref = jax.block_until_ready(jax.jit(reference_forward)(img, labels, params))
    tol = 5e-2 * (1.0 + float(jnp.max(jnp.abs(ref))))
    assert float(jnp.max(jnp.abs(out - ref))) < tol
    assert float(jnp.max(jnp.abs(out_small - ref))) < tol
    print("KERNEL_OK")
</pallas_src>

<mosaic_0001>
module attributes {stable_mosaic.version = 11 : i64} {
  func.func @_matmul_kernel(%arg0: i32, %arg1: memref<8x14xbf16, #tpu.memory_space<vmem>>, %arg2: memref<14x1024xbf16, #tpu.memory_space<vmem>>, %arg3: memref<1x1024xf32, #tpu.memory_space<vmem>>, %arg4: memref<8x1024xbf16, #tpu.memory_space<vmem>>) attributes {dimension_semantics = [#tpu.dimension_semantics<parallel>], iteration_bounds = array<i64: 1>, scalar_prefetch = 0 : i64, scratch_operands = 0 : i64, tpu.core_type = #tpu.core_type<tc>, window_params = [{transform_indices = @transform_0, window_bounds = array<i64: 8, 14>}, {pipeline_mode = #tpu.pipeline_mode<synchronous>, transform_indices = @transform_1, window_bounds = array<i64: 14, 1024>}, {pipeline_mode = #tpu.pipeline_mode<synchronous>, transform_indices = @transform_2, window_bounds = array<i64: 1, 1024>}, {transform_indices = @transform_3, window_bounds = array<i64: 8, 1024>}]} {
    %c0 = arith.constant 0 : index
    %c0_0 = arith.constant 0 : index
    %0 = vector.load %arg1[%c0, %c0_0] : memref<8x14xbf16, #tpu.memory_space<vmem>>, vector<8x14xbf16>
    %c0_1 = arith.constant 0 : index
    %c0_2 = arith.constant 0 : index
    %1 = vector.load %arg2[%c0_1, %c0_2] : memref<14x1024xbf16, #tpu.memory_space<vmem>>, vector<14x1024xbf16>
    %cst = arith.constant dense<0.000000e+00> : vector<8x1024xf32>
    %2 = tpu.matmul %0, %1, %cst {dimension_numbers = #tpu.dot_dimension_numbers<[1], [0], [0], [1], [0, 0, 1, 1], [], []>} : vector<8x14xbf16>, vector<14x1024xbf16>, vector<8x1024xf32> -> vector<8x1024xf32>
    %c0_3 = arith.constant 0 : index
    %c0_4 = arith.constant 0 : index
    %3 = vector.load %arg3[%c0_3, %c0_4] : memref<1x1024xf32, #tpu.memory_space<vmem>>, vector<1x1024xf32>
    %4 = vector.broadcast %3 : vector<1x1024xf32> to vector<8x1024xf32>
    %5 = arith.addf %2, %4 : vector<8x1024xf32>
    %6 = arith.truncf %5 : vector<8x1024xf32> to vector<8x1024xbf16>
    %c0_5 = arith.constant 0 : index
    %c0_6 = arith.constant 0 : index
    %7 = vector.load %arg4[%c0_5, %c0_6] : memref<8x1024xbf16, #tpu.memory_space<vmem>>, vector<8x1024xbf16>
    tpu.vector_store %arg4[%c0_5, %c0_6], %6 {strides = array<i32>} : memref<8x1024xbf16, #tpu.memory_space<vmem>>, vector<8x1024xbf16>,
    return
  }
  func.func @transform_0(%arg0: i32) -> (i32, i32) {
    %c0_i32 = arith.constant 0 : i32
    %c0_i32_0 = arith.constant 0 : i32
    return %arg0, %c0_i32 : i32, i32
  }
  func.func @transform_1(%arg0: i32) -> (i32, i32) {
    %c0_i32 = arith.constant 0 : i32
    %c0_i32_0 = arith.constant 0 : i32
    %c0_i32_1 = arith.constant 0 : i32
    return %c0_i32, %c0_i32_0 : i32, i32
  }
  func.func @transform_2(%arg0: i32) -> (i32, i32) {
    %c0_i32 = arith.constant 0 : i32
    %c0_i32_0 = arith.constant 0 : i32
    %c0_i32_1 = arith.constant 0 : i32
    return %c0_i32, %c0_i32_0 : i32, i32
  }
  func.func @transform_3(%arg0: i32) -> (i32, i32) {
    %c0_i32 = arith.constant 0 : i32
    %c0_i32_0 = arith.constant 0 : i32
    return %arg0, %c0_i32 : i32, i32
  }
}

module attributes {stable_mosaic.version = 11 : i64} {
  func.func @_matmul_kernel(%arg0: i32, %arg1: memref<512x32xbf16, #tpu.memory_space<vmem>>, %arg2: memref<32x128xbf16, #tpu.memory_space<vmem>>, %arg3: memref<1x128xf32, #tpu.memory_space<vmem>>, %arg4: memref<512x128xbf16, #tpu.memory_space<vmem>>) attributes {dimension_semantics = [#tpu.dimension_semantics<parallel>], iteration_bounds = array<i64: 1>, scalar_prefetch = 0 : i64, scratch_operands = 0 : i64, tpu.core_type = #tpu.core_type<tc>, window_params = [{transform_indices = @transform_0, window_bounds = array<i64: 512, 32>}, {pipeline_mode = #tpu.pipeline_mode<synchronous>, transform_indices = @transform_1, window_bounds = array<i64: 32, 128>}, {pipeline_mode = #tpu.pipeline_mode<synchronous>, transform_indices = @transform_2, window_bounds = array<i64: 1, 128>}, {transform_indices = @transform_3, window_bounds = array<i64: 512, 128>}]} {
    %c0 = arith.constant 0 : index
    %c0_0 = arith.constant 0 : index
    %0 = vector.load %arg1[%c0, %c0_0] : memref<512x32xbf16, #tpu.memory_space<vmem>>, vector<512x32xbf16>
    %c0_1 = arith.constant 0 : index
    %c0_2 = arith.constant 0 : index
    %1 = vector.load %arg2[%c0_1, %c0_2] : memref<32x128xbf16, #tpu.memory_space<vmem>>, vector<32x128xbf16>
    %cst = arith.constant dense<0.000000e+00> : vector<512x128xf32>
    %2 = tpu.matmul %0, %1, %cst {dimension_numbers = #tpu.dot_dimension_numbers<[1], [0], [0], [1], [0, 0, 1, 1], [], []>} : vector<512x32xbf16>, vector<32x128xbf16>, vector<512x128xf32> -> vector<512x128xf32>
    %c0_3 = arith.constant 0 : index
    %c0_4 = arith.constant 0 : index
    %3 = vector.load %arg3[%c0_3, %c0_4] : memref<1x128xf32, #tpu.memory_space<vmem>>, vector<1x128xf32>
    %4 = vector.broadcast %3 : vector<1x128xf32> to vector<512x128xf32>
    %5 = arith.addf %2, %4 : vector<512x128xf32>
    %cst_5 = arith.constant 0.000000e+00 : f32
    %6 = vector.broadcast %cst_5 : f32 to vector<512x128xf32>
    %7 = arith.cmpf oge, %5, %6 : vector<512x128xf32>
    %cst_6 = arith.constant 2.000000e-01 : f32
    %8 = vector.broadcast %cst_6 : f32 to vector<512x128xf32>
    %9 = arith.mulf %8, %5 : vector<512x128xf32>
    %10 = arith.select %7, %5, %9 : vector<512x128xi1>, vector<512x128xf32>
    %11 = arith.truncf %10 : vector<512x128xf32> to vector<512x128xbf16>
    %c0_7 = arith.constant 0 : index
    %c0_8 = arith.constant 0 : index
    %12 = vector.load %arg4[%c0_7, %c0_8] : memref<512x128xbf16, #tpu.memory_space<vmem>>, vector<512x128xbf16>
    tpu.vector_store %arg4[%c0_7, %c0_8], %11 {strides = array<i32>} : memref<512x128xbf16, #tpu.memory_space<vmem>>, vector<512x128xbf16>,
    return
  }
  func.func @transform_0(%arg0: i32) -> (i32, i32) {
    %c0_i32 = arith.constant 0 : i32
    %c0_i32_0 = arith.constant 0 : i32
    return %arg0, %c0_i32 : i32, i32
  }
  func.func @transform_1(%arg0: i32) -> (i32, i32) {
    %c0_i32 = arith.constant 0 : i32
    %c0_i32_0 = arith.constant 0 : i32
    %c0_i32_1 = arith.constant 0 : i32
    return %c0_i32, %c0_i32_0 : i32, i32
  }
  func.func @transform_2(%arg0: i32) -> (i32, i32) {
    %c0_i32 = arith.constant 0 : i32
    %c0_i32_0 = arith.constant 0 : i32
    %c0_i32_1 = arith.constant 0 : i32
    return %c0_i32, %c0_i32_0 : i32, i32
  }
  func.func @transform_3(%arg0: i32) -> (i32, i32) {
    %c0_i32 = arith.constant 0 : i32
    %c0_i32_0 = arith.constant 0 : i32
    return %arg0, %c0_i32 : i32, i32
  }
}

module attributes {stable_mosaic.version = 11 : i64} {
  func.func @_matmul_kernel(%arg0: i32, %arg1: memref<128x1024xbf16, #tpu.memory_space<vmem>>, %arg2: memref<1024x128xbf16, #tpu.memory_space<vmem>>, %arg3: memref<128x128xf32, #tpu.memory_space<vmem>>, %arg4: memref<1x2x128xf32, #tpu.memory_space<vmem>>) attributes {dimension_semantics = [#tpu.dimension_semantics<parallel>], iteration_bounds = array<i64: 1>, scalar_prefetch = 0 : i64, scratch_operands = 0 : i64, tpu.core_type = #tpu.core_type<tc>, window_params = [{transform_indices = @transform_0, window_bounds = array<i64: 128, 1024>}, {pipeline_mode = #tpu.pipeline_mode<synchronous>, transform_indices = @transform_1, window_bounds = array<i64: 1024, 128>}, {transform_indices = @transform_2, window_bounds = array<i64: 128, 128>}, {transform_indices = @transform_3, window_bounds = array<i64: 1, 2, 128>}]} {
    %c0 = arith.constant 0 : index
    %c0_0 = arith.constant 0 : index
    %0 = vector.load %arg1[%c0, %c0_0] : memref<128x1024xbf16, #tpu.memory_space<vmem>>, vector<128x1024xbf16>
    %c0_1 = arith.constant 0 : index
    %c0_2 = arith.constant 0 : index
    %1 = vector.load %arg2[%c0_1, %c0_2] : memref<1024x128xbf16, #tpu.memory_space<vmem>>, vector<1024x128xbf16>
    %cst = arith.constant dense<0.000000e+00> : vector<128x128xf32>
    %2 = tpu.matmul %0, %1, %cst {dimension_numbers = #tpu.dot_dimension_numbers<[1], [0], [0], [1], [0, 0, 1, 1], [], []>} : vector<128x1024xbf16>, vector<1024x128xbf16>, vector<128x128xf32> -> vector<128x128xf32>
    %cst_3 = arith.constant dense<0.000000e+00> : vector<128xf32>
    %3 = vector.multi_reduction <add>, %2, %cst_3 [0] : vector<128x128xf32> to vector<128xf32>
    %4 = vector.shape_cast %3 : vector<128xf32> to vector<1x128xf32>
    %5 = arith.mulf %2, %2 : vector<128x128xf32>
    %cst_4 = arith.constant dense<0.000000e+00> : vector<128xf32>
    %6 = vector.multi_reduction <add>, %5, %cst_4 [0] : vector<128x128xf32> to vector<128xf32>
    %7 = vector.shape_cast %6 : vector<128xf32> to vector<1x128xf32>
    %8 = tpu.concatenate %4, %7 in 0 : vector<1x128xf32>, vector<1x128xf32> -> vector<2x128xf32>
    %9 = vector.shape_cast %8 : vector<2x128xf32> to vector<1x2x128xf32>
    %c0_5 = arith.constant 0 : index
    %c0_6 = arith.constant 0 : index
    %c0_7 = arith.constant 0 : index
    %10 = vector.load %arg4[%c0_5, %c0_6, %c0_7] : memref<1x2x128xf32, #tpu.memory_space<vmem>>, vector<1x2x128xf32>
    tpu.vector_store %arg4[%c0_5, %c0_6, %c0_7], %9 {strides = array<i32>} : memref<1x2x128xf32, #tpu.memory_space<vmem>>, vector<1x2x128xf32>,
    %c0_8 = arith.constant 0 : index
    %c0_9 = arith.constant 0 : index
    %11 = vector.load %arg3[%c0_8, %c0_9] : memref<128x128xf32, #tpu.memory_space<vmem>>, vector<128x128xf32>
    tpu.vector_store %arg3[%c0_8, %c0_9], %2 {strides = array<i32>} : memref<128x128xf32, #tpu.memory_space<vmem>>, vector<128x128xf32>,
    return
  }
  func.func @transform_0(%arg0: i32) -> (i32, i32) {
    %c0_i32 = arith.constant 0 : i32
    %c0_i32_0 = arith.constant 0 : i32
    return %arg0, %c0_i32 : i32, i32
  }
  func.func @transform_1(%arg0: i32) -> (i32, i32) {
    %c0_i32 = arith.constant 0 : i32
    %c0_i32_0 = arith.constant 0 : i32
    %c0_i32_1 = arith.constant 0 : i32
    return %c0_i32, %c0_i32_0 : i32, i32
  }
  func.func @transform_2(%arg0: i32) -> (i32, i32) {
    %c0_i32 = arith.constant 0 : i32
    %c0_i32_0 = arith.constant 0 : i32
    return %arg0, %c0_i32 : i32, i32
  }
  func.func @transform_3(%arg0: i32) -> (i32, i32, i32) {
    %c0_i32 = arith.constant 0 : i32
    %c0_i32_0 = arith.constant 0 : i32
    %c0_i32_1 = arith.constant 0 : i32
    return %arg0, %c0_i32, %c0_i32_0 : i32, i32, i32
  }
}

module attributes {stable_mosaic.version = 11 : i64} {
  func.func @_affine_act_kernel(%arg0: i32, %arg1: memref<128x128xf32, #tpu.memory_space<vmem>>, %arg2: memref<1x128xf32, #tpu.memory_space<vmem>>, %arg3: memref<1x128xf32, #tpu.memory_space<vmem>>, %arg4: memref<128x128xbf16, #tpu.memory_space<vmem>>) attributes {dimension_semantics = [#tpu.dimension_semantics<parallel>], iteration_bounds = array<i64: 1>, scalar_prefetch = 0 : i64, scratch_operands = 0 : i64, tpu.core_type = #tpu.core_type<tc>, window_params = [{transform_indices = @transform_0, window_bounds = array<i64: 128, 128>}, {pipeline_mode = #tpu.pipeline_mode<synchronous>, transform_indices = @transform_1, window_bounds = array<i64: 1, 128>}, {pipeline_mode = #tpu.pipeline_mode<synchronous>, transform_indices = @transform_2, window_bounds = array<i64: 1, 128>}, {transform_indices = @transform_3, window_bounds = array<i64: 128, 128>}]} {
    %c0 = arith.constant 0 : index
    %c0_0 = arith.constant 0 : index
    %0 = vector.load %arg1[%c0, %c0_0] : memref<128x128xf32, #tpu.memory_space<vmem>>, vector<128x128xf32>
    %c0_1 = arith.constant 0 : index
    %c0_2 = arith.constant 0 : index
    %1 = vector.load %arg2[%c0_1, %c0_2] : memref<1x128xf32, #tpu.memory_space<vmem>>, vector<1x128xf32>
    %2 = vector.broadcast %1 : vector<1x128xf32> to vector<128x128xf32>
    %3 = arith.mulf %0, %2 : vector<128x128xf32>
    %c0_3 = arith.constant 0 : index
    %c0_4 = arith.constant 0 : index
    %4 = vector.load %arg3[%c0_3, %c0_4] : memref<1x128xf32, #tpu.memory_space<vmem>>, vector<1x128xf32>
    %5 = vector.broadcast %4 : vector<1x128xf32> to vector<128x128xf32>
    %6 = arith.addf %3, %5 : vector<128x128xf32>
    %cst = arith.constant 0.000000e+00 : f32
    %7 = vector.broadcast %cst : f32 to vector<128x128xf32>
    %8 = arith.cmpf oge, %6, %7 : vector<128x128xf32>
    %cst_5 = arith.constant 2.000000e-01 : f32
    %9 = vector.broadcast %cst_5 : f32 to vector<128x128xf32>
    %10 = arith.mulf %9, %6 : vector<128x128xf32>
    %11 = arith.select %8, %6, %10 : vector<128x128xi1>, vector<128x128xf32>
    %12 = arith.truncf %11 : vector<128x128xf32> to vector<128x128xbf16>
    %c0_6 = arith.constant 0 : index
    %c0_7 = arith.constant 0 : index
    %13 = vector.load %arg4[%c0_6, %c0_7] : memref<128x128xbf16, #tpu.memory_space<vmem>>, vector<128x128xbf16>
    tpu.vector_store %arg4[%c0_6, %c0_7], %12 {strides = array<i32>} : memref<128x128xbf16, #tpu.memory_space<vmem>>, vector<128x128xbf16>,
    return
  }
  func.func @transform_0(%arg0: i32) -> (i32, i32) {
    %c0_i32 = arith.constant 0 : i32
    %c0_i32_0 = arith.constant 0 : i32
    return %arg0, %c0_i32 : i32, i32
  }
  func.func @transform_1(%arg0: i32) -> (i32, i32) {
    %c0_i32 = arith.constant 0 : i32
    %c0_i32_0 = arith.constant 0 : i32
    %c0_i32_1 = arith.constant 0 : i32
    return %c0_i32, %c0_i32_0 : i32, i32
  }
  func.func @transform_2(%arg0: i32) -> (i32, i32) {
    %c0_i32 = arith.constant 0 : i32
    %c0_i32_0 = arith.constant 0 : i32
    %c0_i32_1 = arith.constant 0 : i32
    return %c0_i32, %c0_i32_0 : i32, i32
  }
  func.func @transform_3(%arg0: i32) -> (i32, i32) {
    %c0_i32 = arith.constant 0 : i32
    %c0_i32_0 = arith.constant 0 : i32
    return %arg0, %c0_i32 : i32, i32
  }
}

module attributes {stable_mosaic.version = 11 : i64} {
  func.func @_matmul_kernel(%arg0: i32, %arg1: memref<32x2048xbf16, #tpu.memory_space<vmem>>, %arg2: memref<2048x256xbf16, #tpu.memory_space<vmem>>, %arg3: memref<32x256xf32, #tpu.memory_space<vmem>>, %arg4: memref<1x2x256xf32, #tpu.memory_space<vmem>>) attributes {dimension_semantics = [#tpu.dimension_semantics<parallel>], iteration_bounds = array<i64: 1>, scalar_prefetch = 0 : i64, scratch_operands = 0 : i64, tpu.core_type = #tpu.core_type<tc>, window_params = [{transform_indices = @transform_0, window_bounds = array<i64: 32, 2048>}, {pipeline_mode = #tpu.pipeline_mode<synchronous>, transform_indices = @transform_1, window_bounds = array<i64: 2048, 256>}, {transform_indices = @transform_2, window_bounds = array<i64: 32, 256>}, {transform_indices = @transform_3, window_bounds = array<i64: 1, 2, 256>}]} {
    %c0 = arith.constant 0 : index
    %c0_0 = arith.constant 0 : index
    %0 = vector.load %arg1[%c0, %c0_0] : memref<32x2048xbf16, #tpu.memory_space<vmem>>, vector<32x2048xbf16>
    %c0_1 = arith.constant 0 : index
    %c0_2 = arith.constant 0 : index
    %1 = vector.load %arg2[%c0_1, %c0_2] : memref<2048x256xbf16, #tpu.memory_space<vmem>>, vector<2048x256xbf16>
    %cst = arith.constant dense<0.000000e+00> : vector<32x256xf32>
    %2 = tpu.matmul %0, %1, %cst {dimension_numbers = #tpu.dot_dimension_numbers<[1], [0], [0], [1], [0, 0, 1, 1], [], []>} : vector<32x2048xbf16>, vector<2048x256xbf16>, vector<32x256xf32> -> vector<32x256xf32>
    %cst_3 = arith.constant dense<0.000000e+00> : vector<256xf32>
    %3 = vector.multi_reduction <add>, %2, %cst_3 [0] : vector<32x256xf32> to vector<256xf32>
    %4 = vector.shape_cast %3 : vector<256xf32> to vector<1x256xf32>
    %5 = arith.mulf %2, %2 : vector<32x256xf32>
    %cst_4 = arith.constant dense<0.000000e+00> : vector<256xf32>
    %6 = vector.multi_reduction <add>, %5, %cst_4 [0] : vector<32x256xf32> to vector<256xf32>
    %7 = vector.shape_cast %6 : vector<256xf32> to vector<1x256xf32>
    %8 = tpu.concatenate %4, %7 in 0 : vector<1x256xf32>, vector<1x256xf32> -> vector<2x256xf32>
    %9 = vector.shape_cast %8 : vector<2x256xf32> to vector<1x2x256xf32>
    %c0_5 = arith.constant 0 : index
    %c0_6 = arith.constant 0 : index
    %c0_7 = arith.constant 0 : index
    %10 = vector.load %arg4[%c0_5, %c0_6, %c0_7] : memref<1x2x256xf32, #tpu.memory_space<vmem>>, vector<1x2x256xf32>
    tpu.vector_store %arg4[%c0_5, %c0_6, %c0_7], %9 {strides = array<i32>} : memref<1x2x256xf32, #tpu.memory_space<vmem>>, vector<1x2x256xf32>,
    %c0_8 = arith.constant 0 : index
    %c0_9 = arith.constant 0 : index
    %11 = vector.load %arg3[%c0_8, %c0_9] : memref<32x256xf32, #tpu.memory_space<vmem>>, vector<32x256xf32>
    tpu.vector_store %arg3[%c0_8, %c0_9], %2 {strides = array<i32>} : memref<32x256xf32, #tpu.memory_space<vmem>>, vector<32x256xf32>,
    return
  }
  func.func @transform_0(%arg0: i32) -> (i32, i32) {
    %c0_i32 = arith.constant 0 : i32
    %c0_i32_0 = arith.constant 0 : i32
    return %arg0, %c0_i32 : i32, i32
  }
  func.func @transform_1(%arg0: i32) -> (i32, i32) {
    %c0_i32 = arith.constant 0 : i32
    %c0_i32_0 = arith.constant 0 : i32
    %c0_i32_1 = arith.constant 0 : i32
    return %c0_i32, %c0_i32_0 : i32, i32
  }
  func.func @transform_2(%arg0: i32) -> (i32, i32) {
    %c0_i32 = arith.constant 0 : i32
    %c0_i32_0 = arith.constant 0 : i32
    return %arg0, %c0_i32 : i32, i32
  }
  func.func @transform_3(%arg0: i32) -> (i32, i32, i32) {
    %c0_i32 = arith.constant 0 : i32
    %c0_i32_0 = arith.constant 0 : i32
    %c0_i32_1 = arith.constant 0 : i32
    return %arg0, %c0_i32, %c0_i32_0 : i32, i32, i32
  }
}

module attributes {stable_mosaic.version = 11 : i64} {
  func.func @_affine_act_kernel(%arg0: i32, %arg1: memref<32x256xf32, #tpu.memory_space<vmem>>, %arg2: memref<1x256xf32, #tpu.memory_space<vmem>>, %arg3: memref<1x256xf32, #tpu.memory_space<vmem>>, %arg4: memref<32x256xbf16, #tpu.memory_space<vmem>>) attributes {dimension_semantics = [#tpu.dimension_semantics<parallel>], iteration_bounds = array<i64: 1>, scalar_prefetch = 0 : i64, scratch_operands = 0 : i64, tpu.core_type = #tpu.core_type<tc>, window_params = [{transform_indices = @transform_0, window_bounds = array<i64: 32, 256>}, {pipeline_mode = #tpu.pipeline_mode<synchronous>, transform_indices = @transform_1, window_bounds = array<i64: 1, 256>}, {pipeline_mode = #tpu.pipeline_mode<synchronous>, transform_indices = @transform_2, window_bounds = array<i64: 1, 256>}, {transform_indices = @transform_3, window_bounds = array<i64: 32, 256>}]} {
    %c0 = arith.constant 0 : index
    %c0_0 = arith.constant 0 : index
    %0 = vector.load %arg1[%c0, %c0_0] : memref<32x256xf32, #tpu.memory_space<vmem>>, vector<32x256xf32>
    %c0_1 = arith.constant 0 : index
    %c0_2 = arith.constant 0 : index
    %1 = vector.load %arg2[%c0_1, %c0_2] : memref<1x256xf32, #tpu.memory_space<vmem>>, vector<1x256xf32>
    %2 = vector.broadcast %1 : vector<1x256xf32> to vector<32x256xf32>
    %3 = arith.mulf %0, %2 : vector<32x256xf32>
    %c0_3 = arith.constant 0 : index
    %c0_4 = arith.constant 0 : index
    %4 = vector.load %arg3[%c0_3, %c0_4] : memref<1x256xf32, #tpu.memory_space<vmem>>, vector<1x256xf32>
    %5 = vector.broadcast %4 : vector<1x256xf32> to vector<32x256xf32>
    %6 = arith.addf %3, %5 : vector<32x256xf32>
    %cst = arith.constant 0.000000e+00 : f32
    %7 = vector.broadcast %cst : f32 to vector<32x256xf32>
    %8 = arith.cmpf oge, %6, %7 : vector<32x256xf32>
    %cst_5 = arith.constant 2.000000e-01 : f32
    %9 = vector.broadcast %cst_5 : f32 to vector<32x256xf32>
    %10 = arith.mulf %9, %6 : vector<32x256xf32>
    %11 = arith.select %8, %6, %10 : vector<32x256xi1>, vector<32x256xf32>
    %12 = arith.truncf %11 : vector<32x256xf32> to vector<32x256xbf16>
    %c0_6 = arith.constant 0 : index
    %c0_7 = arith.constant 0 : index
    %13 = vector.load %arg4[%c0_6, %c0_7] : memref<32x256xbf16, #tpu.memory_space<vmem>>, vector<32x256xbf16>
    tpu.vector_store %arg4[%c0_6, %c0_7], %12 {strides = array<i32>} : memref<32x256xbf16, #tpu.memory_space<vmem>>, vector<32x256xbf16>,
    return
  }
  func.func @transform_0(%arg0: i32) -> (i32, i32) {
    %c0_i32 = arith.constant 0 : i32
    %c0_i32_0 = arith.constant 0 : i32
    return %arg0, %c0_i32 : i32, i32
  }
  func.func @transform_1(%arg0: i32) -> (i32, i32) {
    %c0_i32 = arith.constant 0 : i32
    %c0_i32_0 = arith.constant 0 : i32
    %c0_i32_1 = arith.constant 0 : i32
    return %c0_i32, %c0_i32_0 : i32, i32
  }
  func.func @transform_2(%arg0: i32) -> (i32, i32) {
    %c0_i32 = arith.constant 0 : i32
    %c0_i32_0 = arith.constant 0 : i32
    %c0_i32_1 = arith.constant 0 : i32
    return %c0_i32, %c0_i32_0 : i32, i32
  }
  func.func @transform_3(%arg0: i32) -> (i32, i32) {
    %c0_i32 = arith.constant 0 : i32
    %c0_i32_0 = arith.constant 0 : i32
    return %arg0, %c0_i32 : i32, i32
  }
}

module attributes {stable_mosaic.version = 11 : i64} {
  func.func @_matmul_kernel(%arg0: i32, %arg1: memref<8x4096xbf16, #tpu.memory_space<vmem>>, %arg2: memref<4096x128xbf16, #tpu.memory_space<vmem>>, %arg3: memref<1x128xf32, #tpu.memory_space<vmem>>, %arg4: memref<8x128xf32, #tpu.memory_space<vmem>>) attributes {dimension_semantics = [#tpu.dimension_semantics<parallel>], iteration_bounds = array<i64: 1>, scalar_prefetch = 0 : i64, scratch_operands = 0 : i64, tpu.core_type = #tpu.core_type<tc>, window_params = [{transform_indices = @transform_0, window_bounds = array<i64: 8, 4096>}, {pipeline_mode = #tpu.pipeline_mode<synchronous>, transform_indices = @transform_1, window_bounds = array<i64: 4096, 128>}, {pipeline_mode = #tpu.pipeline_mode<synchronous>, transform_indices = @transform_2, window_bounds = array<i64: 1, 128>}, {transform_indices = @transform_3, window_bounds = array<i64: 8, 128>}]} {
    %c0 = arith.constant 0 : index
    %c0_0 = arith.constant 0 : index
    %0 = vector.load %arg1[%c0, %c0_0] : memref<8x4096xbf16, #tpu.memory_space<vmem>>, vector<8x4096xbf16>
    %c0_1 = arith.constant 0 : index
    %c0_2 = arith.constant 0 : index
    %1 = vector.load %arg2[%c0_1, %c0_2] : memref<4096x128xbf16, #tpu.memory_space<vmem>>, vector<4096x128xbf16>
    %cst = arith.constant dense<0.000000e+00> : vector<8x128xf32>
    %2 = tpu.matmul %0, %1, %cst {dimension_numbers = #tpu.dot_dimension_numbers<[1], [0], [0], [1], [0, 0, 1, 1], [], []>} : vector<8x4096xbf16>, vector<4096x128xbf16>, vector<8x128xf32> -> vector<8x128xf32>
    %c0_3 = arith.constant 0 : index
    %c0_4 = arith.constant 0 : index
    %3 = vector.load %arg3[%c0_3, %c0_4] : memref<1x128xf32, #tpu.memory_space<vmem>>, vector<1x128xf32>
    %4 = vector.broadcast %3 : vector<1x128xf32> to vector<8x128xf32>
    %5 = arith.addf %2, %4 : vector<8x128xf32>
    %c0_5 = arith.constant 0 : index
    %c0_6 = arith.constant 0 : index
    %6 = vector.load %arg4[%c0_5, %c0_6] : memref<8x128xf32, #tpu.memory_space<vmem>>, vector<8x128xf32>
    tpu.vector_store %arg4[%c0_5, %c0_6], %5 {strides = array<i32>} : memref<8x128xf32, #tpu.memory_space<vmem>>, vector<8x128xf32>,
    return
  }
  func.func @transform_0(%arg0: i32) -> (i32, i32) {
    %c0_i32 = arith.constant 0 : i32
    %c0_i32_0 = arith.constant 0 : i32
    return %arg0, %c0_i32 : i32, i32
  }
  func.func @transform_1(%arg0: i32) -> (i32, i32) {
    %c0_i32 = arith.constant 0 : i32
    %c0_i32_0 = arith.constant 0 : i32
    %c0_i32_1 = arith.constant 0 : i32
    return %c0_i32, %c0_i32_0 : i32, i32
  }
  func.func @transform_2(%arg0: i32) -> (i32, i32) {
    %c0_i32 = arith.constant 0 : i32
    %c0_i32_0 = arith.constant 0 : i32
    %c0_i32_1 = arith.constant 0 : i32
    return %c0_i32, %c0_i32_0 : i32, i32
  }
  func.func @transform_3(%arg0: i32) -> (i32, i32) {
    %c0_i32 = arith.constant 0 : i32
    %c0_i32_0 = arith.constant 0 : i32
    return %arg0, %c0_i32 : i32, i32
  }
}

</mosaic_0001>

<bundles_post_ra>
// kernel: discriminator_forward.7
= control target key start
LH: loop header
LB: loop body
LE: loop exit
PB: predicated region body
PF: predicated region fallthrough
CT: control target
= control target key end

     0   :  { %8 = vsyncpa [#allocation3], 0  ;;  %s394_s12 = smov [#allocation2]   ;;  %s475_s0 = inlined_call_operand.vmem [shape: bf16[8,14], index: 0, kind: input, shape index: {}]   ;;  %s476_s1 = inlined_call_operand.vmem [shape: bf16[14,1024], index: 1, kind: input, shape index: {}]   ;;  %s477_s2 = inlined_call_operand.hbm [shape: f32[1,1024], index: 2, kind: input, shape index: {}]   ;;  %s478_s3 = inlined_call_operand.vmem [shape: bf16[8,1024], index: 3, kind: output, shape index: {}]  }
   0x1   :  { %s19_s13 = sshll.u32 %s394_s12, 4  ;;  %s370_s16 = scalar_lea.hbm %s477_s2, 128  ;;  %s20_s13 = int_to_ptr.vmem [resolvable:$true] %s19_s13 }
   0x2   :  { %p371_p0 = scmp.ne.s32.totalorder %s477_s2, %s370_s16  ;;  %p374_p1 = scmp.lt.u32.totalorder %s370_s16, %s477_s2 }
   0x4   :  { %p376_p2 = pnand %p374_p1, %p371_p0 }
   0x6   :  { %379 = shalt.err (!%p376_p2)
}
   0x7   :  { %s380_s21 = scalar_lea.vmem %s20_s13, 128  ;;  %p385_p4 = scmp.lt.s32.totalorder %s20_s13, %s20_s13 }
   0x8   :  { %p381_p3 = scmp.ne.s32.totalorder %s20_s13, %s380_s21  ;;  %p386_p5 = scmp.lt.s32.totalorder %s380_s21, %s380_s21 }
   0xa   :  { %p387_p6 = por %p386_p5, %p385_p4 }
   0xc   :  { %p388_p7 = pnand %p387_p6, %p381_p3 }
   0xe   :  { %391 = shalt.err (!%p388_p7)
}
   0xf   :  { %22 = dma.hbm_to_vmem [thread:$0]  %s477_s2, 128, %s20_s13, [#allocation3]  }
  0x10   :  { %392 = dma.done.wait [#allocation3], 128  }
  0x11   :  { %393 = vsyncadd [#allocation3], 4294967168  ;;  %v395_v0 = vmov 0   ;;  %v28_v1 = vld [vmem:[%s476_s1] sm:$0xff]  ;;  %vm114_vm0 = vcmask 1046528   ;;  %v29_v3 = vld [vmem:[%s476_s1 + $0x8] sm:$0xff]  ;;  %v38_v22 = vlaneseq }
  0x12   :  { %171 = vmatprep.mubr.bf16.mxu0 %v395_v0  ;;  %212 = vmatprep.mubr.bf16.mxu1 %v395_v0  ;;  %v32_v2 = vld [vmem:[%s476_s1 + $0x20] sm:$0x77]  ;;  %v33_v5 = vld [vmem:[%s476_s1 + $0x28] sm:$0x77]  ;;  %v30_v7 = vld [vmem:[%s476_s1 + $0x10] sm:$0xff]  ;;  %vm110_vm1 = vcmask 113664  }
  0x13   :  { %v345_v4 = vcombine.high %v28_v1, %v32_v2  ;;  %v344_v6 = vcombine.low %v28_v1, %v32_v2  ;;  %v347_v8 = vcombine.high %v29_v3, %v33_v5  ;;  %v346_v9 = vcombine.low %v29_v3, %v33_v5  ;;  %v34_v10 = vld [vmem:[%s476_s1 + $0x30] sm:$0x77]  ;;  %v31_v11 = vld [vmem:[%s476_s1 + $0x18] sm:$0xff]  ;;  %v27_v18 = vld [vmem:[%s475_s0] sm:$0xf] }
  0x14   :  { %v35_v12 = vld [vmem:[%s476_s1 + $0x38] sm:$0x77]  ;;  %v349_v14 = vcombine.high %v30_v7, %v34_v10  ;;  %v348_v16 = vcombine.low %v30_v7, %v34_v10  ;;  %v39_v23 = vshrl.u32 %v38_v22, 7  ;;  %v36_v25 = vld [vmem:[#allocation2] sm:$0xff] }
  0x15   :  { %352 = vmatprep.subr.msk.bf16.mxu0 %vm114_vm0, %v345_v4  ;;  %v116_v13 = vsel %vm114_vm0, %v344_v6, 0  ;;  %v351_v15 = vcombine.high %v31_v11, %v35_v12  ;;  %354 = vmatprep.subr.msk.bf16.mxu1 %vm114_vm0, %v347_v8  ;;  %v122_v17 = vsel %vm114_vm0, %v346_v9, 0  ;;  %v350_v19 = vcombine.low %v31_v11, %v35_v12 }
  0x16   :  { %140 = vmatpush1.bf16.msra.mxu0 %v116_v13  ;;  %181 = vmatpush1.bf16.msra.mxu1 %v122_v17  ;;  %v128_v20 = vsel %vm114_vm0, %v348_v16, 0  ;;  %v40_v24 = vsub.s32 0, %v39_v23  ;;  %v48_v26 = vsub.s32 2, %v39_v23  ;;  %v44_v27 = vsub.s32 1, %v39_v23 }
  0x17   :  { %356 = vmatprep.subr.msk.bf16.mxu0 %vm114_vm0, %v349_v14  ;;  %358 = vmatprep.subr.msk.bf16.mxu1 %vm114_vm0, %v351_v15  ;;  %v134_v21 = vsel %vm114_vm0, %v350_v19, 0  ;;  %v52_v28 = vsub.s32 3, %v39_v23  ;;  %v56_v37 = vsub.s32 4, %v39_v23  ;;  %v64_v42 = vsub.s32 6, %v39_v23 }
  0x18   :  { %v41_v29 = vrot.slane %v36_v25, %v40_v24  ;;  %v49_v30 = vrot.slane %v36_v25, %v48_v26  ;;  %v45_v31 = vrot.slane %v36_v25, %v44_v27  ;;  %v60_v43 = vsub.s32 5, %v39_v23 }
  0x19   :  { %353 = vmatmul.mubr.msk.bf16.vlgmr.msra.gmra.mrb[0].mxu0 %vm110_vm1, %v27_v18  ;;  %355 = vmatmul.mubr.msk.bf16.vlgmr.msra.gmra.mrb[0].mxu1 %vm110_vm1, %v27_v18  ;;  %v53_v32 = vrot.slane %v36_v25, %v52_v28  ;;  %v68_v47 = vsub.s32 7, %v39_v23  ;;  %v57_v51 = vrot.slane %v36_v25, %v56_v37  ;;  %v65_v52 = vrot.slane %v36_v25, %v64_v42 }
  0x1a   :  { %222 = vmatpush1.bf16.msra.mxu0 %v128_v20  ;;  %263 = vmatpush1.bf16.msra.mxu1 %v134_v21  ;;  %v61_v53 = vrot.slane %v36_v25, %v60_v43 }
  0x1b   :  { %253 = vmatprep.mubr.bf16.mxu0 %v395_v0  ;;  %294 = vmatprep.mubr.bf16.mxu1 %v395_v0  ;;  %v69_v54 = vrot.slane %v36_v25, %v68_v47 }
  0x21   :  { %357 = vmatmul.mubr.msk.bf16.vlgmr.msra.gmra.mrb[4].mxu0 %vm110_vm1, %v27_v18  ;;  %359 = vmatmul.mubr.msk.bf16.vlgmr.msra.gmra.mrb[4].mxu1 %vm110_vm1, %v27_v18 }
  0xec   :  { %v173_v33 = vpop.f32.mrb[0].mxu0  ;;  %v214_v35 = vpop.f32.mrb[0].mxu1 }
  0xed   :  { %v174_v34 = vadd.f32 %v173_v33, %v41_v29  ;;  %v175_v36 = vpop.f32.mrb[1].mxu0  ;;  %v215_v38 = vadd.f32 %v214_v35, %v49_v30  ;;  %v216_v40 = vpop.f32.mrb[1].mxu1 }
  0xee   :  { %v176_v39 = vadd.f32 %v175_v36, %v45_v31  ;;  %v177_v41 = vpop.f32.mrb[2].mxu0  ;;  %v217_v44 = vadd.f32 %v216_v40, %v53_v32  ;;  %v218_v45 = vpop.f32.mrb[2].mxu1 }
  0xef   :  { %v178_v46 = vpop.f32.mrb[3].mxu0  ;;  %v219_v49 = vpop.f32.mrb[3].mxu1 }
  0xf0   :  { %v364_v48 = vpack.c.bf16 %v176_v39, %v174_v34  ;;  %v365_v50 = vpack.c.bf16 %v217_v44, %v215_v38 }
  0xf2   :  { %335 = vst [vmem:[%s478_s3] sm:$0xff] %v364_v48  ;;  %336 = vst [vmem:[%s478_s3 + $0x8] sm:$0xff] %v365_v50 }
  0xf4   :  { %v255_v55 = vpop.f32.mrb[4].mxu0  ;;  %v296_v57 = vpop.f32.mrb[4].mxu1 }
  0xf5   :  { %v256_v56 = vadd.f32 %v255_v55, %v57_v51  ;;  %v257_v58 = vpop.f32.mrb[5].mxu0  ;;  %v297_v59 = vadd.f32 %v296_v57, %v65_v52  ;;  %v298_v61 = vpop.f32.mrb[5].mxu1 }
  0xf6   :  { %v258_v60 = vadd.f32 %v257_v58, %v61_v53  ;;  %v259_v62 = vpop.f32.mrb[6].mxu0  ;;  %v299_v63 = vadd.f32 %v298_v61, %v69_v54  ;;  %v300_v0 = vpop.f32.mrb[6].mxu1 }
  0xf7   :  { %v260_v1 = vpop.f32.mrb[7].mxu0  ;;  %v301_v3 = vpop.f32.mrb[7].mxu1 }
  0xf8   :  { %v366_v2 = vpack.c.bf16 %v258_v60, %v256_v56  ;;  %v367_v4 = vpack.c.bf16 %v299_v63, %v297_v59 }
  0xfa   :  { %337 = vst [vmem:[%s478_s3 + $0x10] sm:$0xff] %v366_v2  ;;  %338 = vst [vmem:[%s478_s3 + $0x18] sm:$0xff] %v367_v4 }
  0xfb   :  { %343 = vsyncpa [#allocation3], 1 }

// kernel: discriminator_forward.8
= control target key start
LH: loop header
LB: loop body
LE: loop exit
PB: predicated region body
PF: predicated region fallthrough
CT: control target
= control target key end

     0   :  { %vm262_vm0 = vcmask 261120   ;;  %s2018_s1 = inlined_call_operand.vmem [shape: bf16[32,128], index: 1, kind: input, shape index: {}]   ;;  %s2019_s0 = inlined_call_operand.vmem [shape: bf16[512,32], index: 0, kind: input, shape index: {}]   ;;  %s2020_s2 = inlined_call_operand.vmem [shape: f32[1,128], index: 2, kind: input, shape index: {}]   ;;  %s2021_s3 = inlined_call_operand.vmem [shape: bf16[512,128], index: 3, kind: output, shape index: {}]  }
   0x1   :  { %v1656_v0 = vld [vmem:[%s2018_s1] sm:$0xff]   ;;  %v1657_v1 = vld [vmem:[%s2018_s1 + $0x8] sm:$0xff]   ;;  %v1662_v6 = vld [vmem:[%s2019_s0 + $0x10] sm:$0xff]  }
   0x2   :  { %1584 = vmatprep.subr.bf16.mxu0 %v1656_v0  ;;  %1652 = vmatprep.subr.bf16.mxu1 %v1656_v0  ;;  %v1658_v2 = vld [vmem:[%s2019_s0] sm:$0xff]   ;;  %v1660_v4 = vld [vmem:[%s2019_s0 + $0x8] sm:$0xff]   ;;  %v1663_v7 = vld [vmem:[%s2019_s0 + $0x90] sm:$0xff]  }
   0x3   :  { %1585 = vmatpush3.bf16.msra.mxu0 %v1656_v0  ;;  %1654 = vmatpush3.bf16.msra.mxu1 %v1656_v0  ;;  %v1659_v3 = vld [vmem:[%s2019_s0 + $0x80] sm:$0xff]   ;;  %v1661_v5 = vld [vmem:[%s2019_s0 + $0x88] sm:$0xff]   ;;  %v1664_v8 = vld [vmem:[%s2019_s0 + $0x18] sm:$0xff]  }
   0x4   :  { %1586 = vmatprep.subr.bf16.mxu0 %v1657_v1  ;;  %1653 = vmatprep.subr.bf16.mxu1 %v1657_v1  ;;  %v1665_v9 = vld [vmem:[%s2019_s0 + $0x98] sm:$0xff]   ;;  %v1666_v10 = vld [vmem:[%s2019_s0 + $0x20] sm:$0xff]   ;;  %v1668_v12 = vld [vmem:[%s2019_s0 + $0x28] sm:$0xff]  }
   0x5   :  { %1588 = vmatprep.mubr.msk.bf16.mxu0 %vm262_vm0, %v1658_v2  ;;  %1620 = vmatprep.mubr.msk.bf16.mxu1 %vm262_vm0, %v1659_v3  ;;  %v1667_v11 = vld [vmem:[%s2019_s0 + $0xa0] sm:$0xff]   ;;  %v1669_v13 = vld [vmem:[%s2019_s0 + $0xa8] sm:$0xff]   ;;  %v1670_v14 = vld [vmem:[%s2019_s0 + $0x30] sm:$0xff]  }
   0x6   :  { %v1671_v15 = vld [vmem:[%s2019_s0 + $0xb0] sm:$0xff]   ;;  %v1672_v16 = vld [vmem:[%s2019_s0 + $0x38] sm:$0xff]   ;;  %v1674_v18 = vld [vmem:[%s2019_s0 + $0x40] sm:$0xff]  }
   0x7   :  { %1587 = vmatpush3.bf16.msra.mxu0 %v1657_v1  ;;  %1655 = vmatpush3.bf16.msra.mxu1 %v1657_v1  ;;  %v1673_v17 = vld [vmem:[%s2019_s0 + $0xb8] sm:$0xff]   ;;  %v1675_v19 = vld [vmem:[%s2019_s0 + $0xc0] sm:$0xff]   ;;  %v1676_v20 = vld [vmem:[%s2019_s0 + $0x48] sm:$0xff]  }
   0x8   :  { %v1677_v21 = vld [vmem:[%s2019_s0 + $0xc8] sm:$0xff]   ;;  %v1678_v22 = vld [vmem:[%s2019_s0 + $0x50] sm:$0xff]   ;;  %v1680_v24 = vld [vmem:[%s2019_s0 + $0x58] sm:$0xff]  }
   0x9   :  { %v1679_v23 = vld [vmem:[%s2019_s0 + $0xd0] sm:$0xff]   ;;  %v1681_v25 = vld [vmem:[%s2019_s0 + $0xd8] sm:$0xff]   ;;  %v1682_v26 = vld [vmem:[%s2019_s0 + $0x60] sm:$0xff]  }
   0xa   :  { %1589 = vmatmul.mubr.msk.bf16.vlgmr.msra.gmra.mrb[0].mxu0 %vm262_vm0, %v1660_v4  ;;  %1621 = vmatmul.mubr.msk.bf16.vlgmr.msra.gmra.mrb[0].mxu1 %vm262_vm0, %v1661_v5  ;;  %v1683_v27 = vld [vmem:[%s2019_s0 + $0xe0] sm:$0xff]   ;;  %v1684_v28 = vld [vmem:[%s2019_s0 + $0x68] sm:$0xff]   ;;  %v1686_v30 = vld [vmem:[%s2019_s0 + $0x70] sm:$0xff]  }
   0xb   :  { %1592 = vmatprep.mubr.msk.bf16.mxu0 %vm262_vm0, %v1662_v6  ;;  %1624 = vmatprep.mubr.msk.bf16.mxu1 %vm262_vm0, %v1663_v7  ;;  %v1685_v29 = vld [vmem:[%s2019_s0 + $0xe8] sm:$0xff]   ;;  %v1687_v31 = vld [vmem:[%s2019_s0 + $0xf0] sm:$0xff]   ;;  %v1688_v32 = vld [vmem:[%s2019_s0 + $0x78] sm:$0xff]  }
   0xc   :  { %v1689_v33 = vld [vmem:[%s2019_s0 + $0xf8] sm:$0xff]   ;;  %v1847_v34 = vld [vmem:[%s2020_s2] ss:$0 sm:$0xff] }
  0x12   :  { %1593 = vmatmul.mubr.msk.bf16.gmra.mrb[4].mxu0 %vm262_vm0, %v1664_v8  ;;  %1625 = vmatmul.mubr.msk.bf16.gmra.mrb[4].mxu1 %vm262_vm0, %v1665_v9 }
  0x13   :  { %1596 = vmatprep.mubr.msk.bf16.mxu0 %vm262_vm0, %v1666_v10  ;;  %1628 = vmatprep.mubr.msk.bf16.mxu1 %vm262_vm0, %v1667_v11 }
  0x1a   :  { %1597 = vmatmul.mubr.msk.bf16.gmra.mrb[8].mxu0 %vm262_vm0, %v1668_v12  ;;  %1629 = vmatmul.mubr.msk.bf16.gmra.mrb[8].mxu1 %vm262_vm0, %v1669_v13 }
  0x1b   :  { %1600 = vmatprep.mubr.msk.bf16.mxu0 %vm262_vm0, %v1670_v14  ;;  %1632 = vmatprep.mubr.msk.bf16.mxu1 %vm262_vm0, %v1671_v15 }
  0x22   :  { %1601 = vmatmul.mubr.msk.bf16.gmra.mrb[12].mxu0 %vm262_vm0, %v1672_v16  ;;  %1633 = vmatmul.mubr.msk.bf16.gmra.mrb[12].mxu1 %vm262_vm0, %v1673_v17 }
  0x23   :  { %1604 = vmatprep.mubr.msk.bf16.mxu0 %vm262_vm0, %v1674_v18  ;;  %1636 = vmatprep.mubr.msk.bf16.mxu1 %vm262_vm0, %v1675_v19 }
  0x2a   :  { %1605 = vmatmul.mubr.msk.bf16.gmra.mrb[16].mxu0 %vm262_vm0, %v1676_v20  ;;  %1637 = vmatmul.mubr.msk.bf16.gmra.mrb[16].mxu1 %vm262_vm0, %v1677_v21 }
  0x2b   :  { %1608 = vmatprep.mubr.msk.bf16.mxu0 %vm262_vm0, %v1678_v22  ;;  %1640 = vmatprep.mubr.msk.bf16.mxu1 %vm262_vm0, %v1679_v23 }
  0x32   :  { %1609 = vmatmul.mubr.msk.bf16.gmra.mrb[20].mxu0 %vm262_vm0, %v1680_v24  ;;  %1641 = vmatmul.mubr.msk.bf16.gmra.mrb[20].mxu1 %vm262_vm0, %v1681_v25 }
  0x33   :  { %1612 = vmatprep.mubr.msk.bf16.mxu0 %vm262_vm0, %v1682_v26  ;;  %1644 = vmatprep.mubr.msk.bf16.mxu1 %vm262_vm0, %v1683_v27 }
  0x3a   :  { %1613 = vmatmul.mubr.msk.bf16.gmra.mrb[24].mxu0 %vm262_vm0, %v1684_v28  ;;  %1645 = vmatmul.mubr.msk.bf16.gmra.mrb[24].mxu1 %vm262_vm0, %v1685_v29 }
  0x3b   :  { %1616 = vmatprep.mubr.msk.bf16.mxu0 %vm262_vm0, %v1686_v30  ;;  %1648 = vmatprep.mubr.msk.bf16.mxu1 %vm262_vm0, %v1687_v31 }
  0x42   :  { %1617 = vmatmul.mubr.msk.bf16.gmra.mrb[28].mxu0 %vm262_vm0, %v1688_v32  ;;  %1649 = vmatmul.mubr.msk.bf16.gmra.mrb[28].mxu1 %vm262_vm0, %v1689_v33 }
  0xdd   :  { %v1590_v35 = vpop.f32.mrb[0].mxu0  ;;  %v1622_v36 = vpop.f32.mrb[0].mxu1 }
  0xde   :  { %v402_v37 = vadd.f32 %v1590_v35, %v1847_v34  ;;  %v530_v38 = vadd.f32 %v1622_v36, %v1847_v34  ;;  %v393_v39 = vpop.f32.mrb[1].mxu0  ;;  %v521_v40 = vpop.f32.mrb[1].mxu1 }
  0xdf   :  { %v394_v41 = vadd.f32 %v1847_v34, %v393_v39  ;;  %v522_v42 = vadd.f32 %v1847_v34, %v521_v40  ;;  %v1591_v43 = vpop.f32.mrb[2].mxu0  ;;  %v1623_v44 = vpop.f32.mrb[2].mxu1 }
  0xe0   :  { %vm650_vm1 = vcmp.ge.f32.partialorder %v402_v37, 0.0  ;;  %v714_v45 = vmul.f32 0.2, %v402_v37  ;;  %vm682_vm2 = vcmp.ge.f32.partialorder %v530_v38, 0.0  ;;  %v746_v46 = vmul.f32 0.2, %v530_v38 }
  0xe1   :  { %vm648_vm3 = vcmp.ge.f32.partialorder %v394_v41, 0.0  ;;  %v712_v47 = vmul.f32 0.2, %v394_v41  ;;  %vm680_vm4 = vcmp.ge.f32.partialorder %v522_v42, 0.0  ;;  %v744_v48 = vmul.f32 0.2, %v522_v42 }
  0xe2   :  { %v405_v49 = vadd.f32 %v1591_v43, %v1847_v34  ;;  %v533_v50 = vadd.f32 %v1623_v44, %v1847_v34  ;;  %v396_v51 = vpop.f32.mrb[3].mxu0  ;;  %v524_v52 = vpop.f32.mrb[3].mxu1  ;;  %v778_v53 = vsel %vm650_vm1, %v402_v37, %v714_v45  ;;  %v810_v54 = vsel %vm682_vm2, %v530_v38, %v746_v46 }
  0xe3   :  { %v397_v55 = vadd.f32 %v1847_v34, %v396_v51  ;;  %v525_v56 = vadd.f32 %v1847_v34, %v524_v52  ;;  %v776_v61 = vsel %vm648_vm3, %v394_v41, %v712_v47  ;;  %v808_v62 = vsel %vm680_vm4, %v522_v42, %v744_v48 }
  0xe4   :  { %vm651_vm5 = vcmp.ge.f32.partialorder %v405_v49, 0.0  ;;  %v715_v57 = vmul.f32 0.2, %v405_v49  ;;  %vm683_vm6 = vcmp.ge.f32.partialorder %v533_v50, 0.0  ;;  %v747_v58 = vmul.f32 0.2, %v533_v50 }
  0xe5   :  { %vm649_vm7 = vcmp.ge.f32.partialorder %v397_v55, 0.0  ;;  %v713_v59 = vmul.f32 0.2, %v397_v55  ;;  %vm681_vm8 = vcmp.ge.f32.partialorder %v525_v56, 0.0  ;;  %v745_v60 = vmul.f32 0.2, %v525_v56 }
  0xe6   :  { %v779_v63 = vsel %vm651_vm5, %v405_v49, %v715_v57  ;;  %v811_v0 = vsel %vm683_vm6, %v533_v50, %v747_v58  ;;  %v1594_v1 = vpop.f32.mrb[4].mxu0  ;;  %v1626_v2 = vpop.f32.mrb[4].mxu1 }
  0xe7   :  { %v1367_v3 = vpack.c.bf16 %v779_v63, %v778_v53  ;;  %v1447_v4 = vpack.c.bf16 %v811_v0, %v810_v54  ;;  %v777_v5 = vsel %vm649_vm7, %v397_v55, %v713_v59  ;;  %v809_v6 = vsel %vm681_vm8, %v525_v56, %v745_v60  ;;  %v409_v7 = vpop.f32.mrb[5].mxu0  ;;  %v537_v8 = vpop.f32.mrb[5].mxu1 }
  0xe8   :  { %v1362_v9 = vpack.c.bf16 %v777_v5, %v776_v61  ;;  %v1442_v10 = vpack.c.bf16 %v809_v6, %v808_v62  ;;  %v418_v11 = vadd.f32 %v1594_v1, %v1847_v34  ;;  %v546_v12 = vadd.f32 %v1626_v2, %v1847_v34  ;;  %v1595_v13 = vpop.f32.mrb[6].mxu0  ;;  %v1627_v14 = vpop.f32.mrb[6].mxu1 }
  0xe9   :  { %1519 = vst [vmem:[%s2021_s3 + $0x8] sm:$0xff] %v1367_v3   ;;  %1535 = vst [vmem:[%s2021_s3 + $0x88] sm:$0xff] %v1447_v4   ;;  %v410_v15 = vadd.f32 %v1847_v34, %v409_v7  ;;  %v538_v16 = vadd.f32 %v1847_v34, %v537_v8  ;;  %v421_v17 = vadd.f32 %v1595_v13, %v1847_v34  ;;  %v412_v19 = vpop.f32.mrb[7].mxu0  ;;  %v540_v20 = vpop.f32.mrb[7].mxu1 }
  0xea   :  { %v549_v18 = vadd.f32 %v1627_v14, %v1847_v34  ;;  %1363 = vst [vmem:[%s2021_s3] sm:$0xff] %v1362_v9   ;;  %1534 = vst [vmem:[%s2021_s3 + $0x80] sm:$0xff] %v1442_v10   ;;  %vm654_vm9 = vcmp.ge.f32.partialorder %v418_v11, 0.0  ;;  %v718_v21 = vmul.f32 0.2, %v418_v11  ;;  %vm686_vm10 = vcmp.ge.f32.partialorder %v546_v12, 0.0 }
  0xeb   :  { %v750_v22 = vmul.f32 0.2, %v546_v12  ;;  %vm652_vm11 = vcmp.ge.f32.partialorder %v410_v15, 0.0  ;;  %v716_v23 = vmul.f32 0.2, %v410_v15  ;;  %vm684_vm12 = vcmp.ge.f32.partialorder %v538_v16, 0.0 }
  0xec   :  { %v748_v24 = vmul.f32 0.2, %v538_v16  ;;  %v782_v25 = vsel %vm654_vm9, %v418_v11, %v718_v21  ;;  %vm655_vm13 = vcmp.ge.f32.partialorder %v421_v17, 0.0  ;;  %v719_v27 = vmul.f32 0.2, %v421_v17 }
  0xed   :  { %v814_v26 = vsel %vm686_vm10, %v546_v12, %v750_v22  ;;  %v780_v28 = vsel %vm652_vm11, %v410_v15, %v716_v23  ;;  %vm687_vm14 = vcmp.ge.f32.partialorder %v549_v18, 0.0  ;;  %v751_v30 = vmul.f32 0.2, %v549_v18  ;;  %v1598_v31 = vpop.f32.mrb[8].mxu0  ;;  %v1630_v32 = vpop.f32.mrb[8].mxu1 }
  0xee   :  { %v812_v29 = vsel %vm684_vm12, %v538_v16, %v748_v24  ;;  %v783_v33 = vsel %vm655_vm13, %v421_v17, %v719_v27  ;;  %v413_v35 = vadd.f32 %v1847_v34, %v412_v19  ;;  %v541_v36 = vadd.f32 %v1847_v34, %v540_v20  ;;  %v425_v38 = vpop.f32.mrb[9].mxu0  ;;  %v553_v39 = vpop.f32.mrb[9].mxu1 }
  0xef   :  { %v434_v37 = vadd.f32 %v1598_v31, %v1847_v34  ;;  %v1377_v40 = vpack.c.bf16 %v783_v33, %v782_v25  ;;  %v815_v41 = vsel %vm687_vm14, %v549_v18, %v751_v30  ;;  %v562_v42 = vadd.f32 %v1630_v32, %v1847_v34  ;;  %v1599_v44 = vpop.f32.mrb[10].mxu0  ;;  %v1631_v45 = vpop.f32.mrb[10].mxu1 }
  0xf0   :  { %v426_v43 = vadd.f32 %v1847_v34, %v425_v38  ;;  %v1457_v46 = vpack.c.bf16 %v815_v41, %v814_v26  ;;  %vm653_vm15 = vcmp.ge.f32.partialorder %v413_v35, 0.0  ;;  %v717_v47 = vmul.f32 0.2, %v413_v35  ;;  %v428_v48 = vpop.f32.mrb[11].mxu0  ;;  %v556_v49 = vpop.f32.mrb[11].mxu1 }
  0xf1   :  { %vm685_vm0 = vcmp.ge.f32.partialorder %v541_v36, 0.0  ;;  %1521 = vst [vmem:[%s2021_s3 + $0x18] sm:$0xff] %v1377_v40   ;;  %v749_v50 = vmul.f32 0.2, %v541_v36  ;;  %vm658_vm1 = vcmp.ge.f32.partialorder %v434_v37, 0.0  ;;  %vm690_vm2 = vcmp.ge.f32.partialorder %v562_v42, 0.0 }
  0xf2   :  { %v722_v51 = vmul.f32 0.2, %v434_v37  ;;  %1537 = vst [vmem:[%s2021_s3 + $0x98] sm:$0xff] %v1457_v46   ;;  %v781_v52 = vsel %vm653_vm15, %v413_v35, %v717_v47  ;;  %v754_v53 = vmul.f32 0.2, %v562_v42  ;;  %vm656_vm3 = vcmp.ge.f32.partialorder %v426_v43, 0.0 }
  0xf3   :  { %v720_v54 = vmul.f32 0.2, %v426_v43  ;;  %v1372_v55 = vpack.c.bf16 %v781_v52, %v780_v28  ;;  %v813_v56 = vsel %vm685_vm0, %v541_v36, %v749_v50  ;;  %v554_v58 = vadd.f32 %v1847_v34, %v553_v39 }
  0xf4   :  { %v786_v57 = vsel %vm658_vm1, %v434_v37, %v722_v51  ;;  %v1452_v59 = vpack.c.bf16 %v813_v56, %v812_v29  ;;  %v818_v60 = vsel %vm690_vm2, %v562_v42, %v754_v53  ;;  %v437_v62 = vadd.f32 %v1599_v44, %v1847_v34 }
  0xf5   :  { %v784_v61 = vsel %vm656_vm3, %v426_v43, %v720_v54  ;;  %1520 = vst [vmem:[%s2021_s3 + $0x10] sm:$0xff] %v1372_v55   ;;  %vm688_vm4 = vcmp.ge.f32.partialorder %v554_v58, 0.0  ;;  %v752_v63 = vmul.f32 0.2, %v554_v58  ;;  %v565_v0 = vadd.f32 %v1631_v45, %v1847_v34  ;;  %v1602_v2 = vpop.f32.mrb[12].mxu0  ;;  %v1634_v3 = vpop.f32.mrb[12].mxu1 }
  0xf6   :  { %v429_v1 = vadd.f32 %v1847_v34, %v428_v48  ;;  %1536 = vst [vmem:[%s2021_s3 + $0x90] sm:$0xff] %v1452_v59   ;;  %vm659_vm5 = vcmp.ge.f32.partialorder %v437_v62, 0.0  ;;  %v723_v4 = vmul.f32 0.2, %v437_v62  ;;  %v557_v5 = vadd.f32 %v1847_v34, %v556_v49  ;;  %v441_v7 = vpop.f32.mrb[13].mxu0  ;;  %v569_v8 = vpop.f32.mrb[13].mxu1 }
  0xf7   :  { %v450_v6 = vadd.f32 %v1602_v2, %v1847_v34  ;;  %v816_v9 = vsel %vm688_vm4, %v554_v58, %v752_v63  ;;  %vm691_vm6 = vcmp.ge.f32.partialorder %v565_v0, 0.0  ;;  %v755_v10 = vmul.f32 0.2, %v565_v0  ;;  %v1603_v11 = vpop.f32.mrb[14].mxu0  ;;  %v1635_v12 = vpop.f32.mrb[14].mxu1 }
  0xf8   :  { %vm657_vm7 = vcmp.ge.f32.partialorder %v429_v1, 0.0  ;;  %v787_v13 = vsel %vm659_vm5, %v437_v62, %v723_v4  ;;  %v721_v14 = vmul.f32 0.2, %v429_v1  ;;  %vm689_vm8 = vcmp.ge.f32.partialorder %v557_v5, 0.0  ;;  %v444_v16 = vpop.f32.mrb[15].mxu0  ;;  %v572_v20 = vpop.f32.mrb[15].mxu1 }
  0xf9   :  { %v753_v15 = vmul.f32 0.2, %v557_v5  ;;  %v1387_v17 = vpack.c.bf16 %v787_v13, %v786_v57  ;;  %v819_v18 = vsel %vm691_vm6, %v565_v0, %v755_v10  ;;  %vm662_vm9 = vcmp.ge.f32.partialorder %v450_v6, 0.0 }
  0xfa   :  { %v726_v19 = vmul.f32 0.2, %v450_v6  ;;  %v1467_v21 = vpack.c.bf16 %v819_v18, %v818_v60  ;;  %v785_v22 = vsel %vm657_vm7, %v429_v1, %v721_v14  ;;  %v578_v24 = vadd.f32 %v1634_v3, %v1847_v34 }
  0xfb   :  { %v817_v23 = vsel %vm689_vm8, %v557_v5, %v753_v15  ;;  %1523 = vst [vmem:[%s2021_s3 + $0x28] sm:$0xff] %v1387_v17   ;;  %v1382_v25 = vpack.c.bf16 %v785_v22, %v784_v61  ;;  %v442_v28 = vadd.f32 %v1847_v34, %v441_v7  ;;  %v570_v30 = vadd.f32 %v1847_v34, %v569_v8 }
  0xfc   :  { %v1462_v26 = vpack.c.bf16 %v817_v23, %v816_v9  ;;  %v790_v27 = vsel %vm662_vm9, %v450_v6, %v726_v19  ;;  %1539 = vst [vmem:[%s2021_s3 + $0xa8] sm:$0xff] %v1467_v21   ;;  %vm694_vm10 = vcmp.ge.f32.partialorder %v578_v24, 0.0  ;;  %v758_v29 = vmul.f32 0.2, %v578_v24 }
  0xfd   :  { %v453_v31 = vadd.f32 %v1603_v11, %v1847_v34  ;;  %1522 = vst [vmem:[%s2021_s3 + $0x20] sm:$0xff] %v1382_v25   ;;  %vm660_vm11 = vcmp.ge.f32.partialorder %v442_v28, 0.0  ;;  %v724_v32 = vmul.f32 0.2, %v442_v28  ;;  %v581_v33 = vadd.f32 %v1635_v12, %v1847_v34  ;;  %v1606_v36 = vpop.f32.mrb[16].mxu0  ;;  %v1638_v37 = vpop.f32.mrb[16].mxu1 }
  0xfe   :  { %1538 = vst [vmem:[%s2021_s3 + $0xa0] sm:$0xff] %v1462_v26   ;;  %v445_v35 = vadd.f32 %v1847_v34, %v444_v16  ;;  %v822_v38 = vsel %vm694_vm10, %v578_v24, %v758_v29  ;;  %vm692_vm12 = vcmp.ge.f32.partialorder %v570_v30, 0.0  ;;  %v756_v39 = vmul.f32 0.2, %v570_v30  ;;  %v457_v40 = vpop.f32.mrb[17].mxu0  ;;  %v585_v41 = vpop.f32.mrb[17].mxu1 }
  0xff   :  { %vm663_vm13 = vcmp.ge.f32.partialorder %v453_v31, 0.0  ;;  %v788_v42 = vsel %vm660_vm11, %v442_v28, %v724_v32  ;;  %v727_v43 = vmul.f32 0.2, %v453_v31  ;;  %vm695_vm14 = vcmp.ge.f32.partialorder %v581_v33, 0.0  ;;  %v1607_v45 = vpop.f32.mrb[18].mxu0  ;;  %v1639_v49 = vpop.f32.mrb[18].mxu1 }
 0x100   :  { %v759_v44 = vmul.f32 0.2, %v581_v33  ;;  %v820_v46 = vsel %vm692_vm12, %v570_v30, %v756_v39  ;;  %vm661_vm15 = vcmp.ge.f32.partialorder %v445_v35, 0.0  ;;  %v725_v47 = vmul.f32 0.2, %v445_v35  ;;  %v460_v50 = vpop.f32.mrb[19].mxu0 }
 0x101   :  { %v573_v48 = vadd.f32 %v1847_v34, %v572_v20  ;;  %v791_v51 = vsel %vm663_vm13, %v453_v31, %v727_v43  ;;  %v466_v53 = vadd.f32 %v1606_v36, %v1847_v34  ;;  %v594_v54 = vadd.f32 %v1638_v37, %v1847_v34  ;;  %v588_v55 = vpop.f32.mrb[19].mxu1 }
 0x102   :  { %v823_v52 = vsel %vm695_vm14, %v581_v33, %v759_v44  ;;  %v1397_v56 = vpack.c.bf16 %v791_v51, %v790_v27  ;;  %v789_v58 = vsel %vm661_vm15, %v445_v35, %v725_v47  ;;  %v458_v63 = vadd.f32 %v1847_v34, %v457_v40 }
 0x103   :  { %v1477_v57 = vpack.c.bf16 %v823_v52, %v822_v38  ;;  %vm693_vm0 = vcmp.ge.f32.partialorder %v573_v48, 0.0  ;;  %v1392_v59 = vpack.c.bf16 %v789_v58, %v788_v42  ;;  %v757_v60 = vmul.f32 0.2, %v573_v48 }
 0x104   :  { %vm666_vm1 = vcmp.ge.f32.partialorder %v466_v53, 0.0  ;;  %v730_v61 = vmul.f32 0.2, %v466_v53  ;;  %1525 = vst [vmem:[%s2021_s3 + $0x38] sm:$0xff] %v1397_v56   ;;  %vm698_vm2 = vcmp.ge.f32.partialorder %v594_v54, 0.0  ;;  %v586_v0 = vadd.f32 %v1847_v34, %v585_v41 }
 0x105   :  { %1541 = vst [vmem:[%s2021_s3 + $0xb8] sm:$0xff] %v1477_v57   ;;  %v762_v62 = vmul.f32 0.2, %v594_v54  ;;  %1524 = vst [vmem:[%s2021_s3 + $0x30] sm:$0xff] %v1392_v59   ;;  %v821_v1 = vsel %vm693_vm0, %v573_v48, %v757_v60  ;;  %v469_v3 = vadd.f32 %v1607_v45, %v1847_v34  ;;  %v597_v4 = vadd.f32 %v1639_v49, %v1847_v34  ;;  %v1610_v5 = vpop.f32.mrb[20].mxu0  ;;  %v1642_v6 = vpop.f32.mrb[20].mxu1 }
 0x106   :  { %v794_v2 = vsel %vm666_vm1, %v466_v53, %v730_v61  ;;  %v1472_v7 = vpack.c.bf16 %v821_v1, %v820_v46  ;;  %vm664_vm3 = vcmp.ge.f32.partialorder %v458_v63, 0.0  ;;  %v728_v9 = vmul.f32 0.2, %v458_v63  ;;  %v473_v10 = vpop.f32.mrb[21].mxu0  ;;  %v601_v11 = vpop.f32.mrb[21].mxu1 }
 0x107   :  { %v826_v8 = vsel %vm698_vm2, %v594_v54, %v762_v62  ;;  %vm696_vm4 = vcmp.ge.f32.partialorder %v586_v0, 0.0  ;;  %v760_v12 = vmul.f32 0.2, %v586_v0  ;;  %vm667_vm5 = vcmp.ge.f32.partialorder %v469_v3, 0.0  ;;  %v1611_v17 = vpop.f32.mrb[22].mxu0  ;;  %v1643_v18 = vpop.f32.mrb[22].mxu1 }
 0x108   :  { %v731_v13 = vmul.f32 0.2, %v469_v3  ;;  %1540 = vst [vmem:[%s2021_s3 + $0xb0] sm:$0xff] %v1472_v7   ;;  %v792_v14 = vsel %vm664_vm3, %v458_v63, %v728_v9  ;;  %vm699_vm6 = vcmp.ge.f32.partialorder %v597_v4, 0.0  ;;  %v763_v15 = vmul.f32 0.2, %v597_v4 }
 0x109   :  { %v461_v16 = vadd.f32 %v1847_v34, %v460_v50  ;;  %v824_v19 = vsel %vm696_vm4, %v586_v0, %v760_v12  ;;  %v589_v21 = vadd.f32 %v1847_v34, %v588_v55  ;;  %v482_v22 = vadd.f32 %v1610_v5, %v1847_v34  ;;  %v476_v23 = vpop.f32.mrb[23].mxu0  ;;  %v604_v24 = vpop.f32.mrb[23].mxu1 }
 0x10a   :  { %v795_v20 = vsel %vm667_vm5, %v469_v3, %v731_v13  ;;  %v827_v26 = vsel %vm699_vm6, %v597_v4, %v763_v15  ;;  %v610_v32 = vadd.f32 %v1642_v6, %v1847_v34  ;;  %v474_v33 = vadd.f32 %v1847_v34, %v473_v10 }
 0x10b   :  { %v1407_v25 = vpack.c.bf16 %v795_v20, %v794_v2  ;;  %vm665_vm7 = vcmp.ge.f32.partialorder %v461_v16, 0.0  ;;  %v729_v27 = vmul.f32 0.2, %v461_v16  ;;  %v1487_v28 = vpack.c.bf16 %v827_v26, %v826_v8 }
 0x10c   :  { %vm697_vm8 = vcmp.ge.f32.partialorder %v589_v21, 0.0  ;;  %v761_v29 = vmul.f32 0.2, %v589_v21  ;;  %vm670_vm9 = vcmp.ge.f32.partialorder %v482_v22, 0.0  ;;  %v734_v31 = vmul.f32 0.2, %v482_v22 }
 0x10d   :  { %1527 = vst [vmem:[%s2021_s3 + $0x48] sm:$0xff] %v1407_v25   ;;  %v793_v30 = vsel %vm665_vm7, %v461_v16, %v729_v27  ;;  %1543 = vst [vmem:[%s2021_s3 + $0xc8] sm:$0xff] %v1487_v28   ;;  %v602_v37 = vadd.f32 %v1847_v34, %v601_v11  ;;  %v485_v38 = vadd.f32 %v1611_v17, %v1847_v34  ;;  %v1614_v39 = vpop.f32.mrb[24].mxu0  ;;  %v1646_v40 = vpop.f32.mrb[24].mxu1  ;;  %vm702_vm10 = vcmp.ge.f32.partialorder %v610_v32, 0.0 }
 0x10e   :  { %v1402_v35 = vpack.c.bf16 %v793_v30, %v792_v14  ;;  %v825_v36 = vsel %vm697_vm8, %v589_v21, %v761_v29  ;;  %v766_v42 = vmul.f32 0.2, %v610_v32  ;;  %v489_v43 = vpop.f32.mrb[25].mxu0  ;;  %v617_v44 = vpop.f32.mrb[25].mxu1  ;;  %v798_v45 = vsel %vm670_vm9, %v482_v22, %v734_v31 }
 0x10f   :  { %v1482_v41 = vpack.c.bf16 %v825_v36, %v824_v19  ;;  %vm668_vm11 = vcmp.ge.f32.partialorder %v474_v33, 0.0  ;;  %v732_v46 = vmul.f32 0.2, %v474_v33  ;;  %v764_v47 = vmul.f32 0.2, %v602_v37  ;;  %v1615_v50 = vpop.f32.mrb[26].mxu0 }
 0x110   :  { %1526 = vst [vmem:[%s2021_s3 + $0x40] sm:$0xff] %v1402_v35   ;;  %vm700_vm12 = vcmp.ge.f32.partialorder %v602_v37, 0.0  ;;  %vm671_vm13 = vcmp.ge.f32.partialorder %v485_v38, 0.0  ;;  %v735_v48 = vmul.f32 0.2, %v485_v38  ;;  %v613_v49 = vadd.f32 %v1643_v18, %v1847_v34  ;;  %v1647_v51 = vpop.f32.mrb[26].mxu1 }
 0x111   :  { %1542 = vst [vmem:[%s2021_s3 + $0xc0] sm:$0xff] %v1482_v41   ;;  %v830_v52 = vsel %vm702_vm10, %v610_v32, %v766_v42  ;;  %v796_v53 = vsel %vm668_vm11, %v474_v33, %v732_v46  ;;  %v477_v54 = vadd.f32 %v1847_v34, %v476_v23  ;;  %v605_v55 = vadd.f32 %v1847_v34, %v604_v24  ;;  %v492_v56 = vpop.f32.mrb[27].mxu0  ;;  %v620_v57 = vpop.f32.mrb[27].mxu1 }
 0x112   :  { %v799_v58 = vsel %vm671_vm13, %v485_v38, %v735_v48  ;;  %vm703_vm14 = vcmp.ge.f32.partialorder %v613_v49, 0.0  ;;  %v767_v59 = vmul.f32 0.2, %v613_v49  ;;  %v498_v60 = vadd.f32 %v1614_v39, %v1847_v34 }
 0x113   :  { %v1417_v61 = vpack.c.bf16 %v799_v58, %v798_v45  ;;  %vm669_vm15 = vcmp.ge.f32.partialorder %v477_v54, 0.0  ;;  %v733_v62 = vmul.f32 0.2, %v477_v54  ;;  %vm701_vm0 = vcmp.ge.f32.partialorder %v605_v55, 0.0 }
 0x114   :  { %v831_v63 = vsel %vm703_vm14, %v613_v49, %v767_v59  ;;  %v765_v0 = vmul.f32 0.2, %v605_v55  ;;  %vm674_vm1 = vcmp.ge.f32.partialorder %v498_v60, 0.0  ;;  %v738_v1 = vmul.f32 0.2, %v498_v60 }
 0x115   :  { %1529 = vst [vmem:[%s2021_s3 + $0x58] sm:$0xff] %v1417_v61   ;;  %v1497_v2 = vpack.c.bf16 %v831_v63, %v830_v52  ;;  %v797_v3 = vsel %vm669_vm15, %v477_v54, %v733_v62  ;;  %v626_v4 = vadd.f32 %v1646_v40, %v1847_v34  ;;  %v490_v5 = vadd.f32 %v1847_v34, %v489_v43  ;;  %v1618_v6 = vpop.f32.mrb[28].mxu0  ;;  %v1650_v7 = vpop.f32.mrb[28].mxu1 }
 0x116   :  { %v828_v8 = vsel %vm700_vm12, %v602_v37, %v764_v47  ;;  %v1412_v9 = vpack.c.bf16 %v797_v3, %v796_v53  ;;  %v829_v10 = vsel %vm701_vm0, %v605_v55, %v765_v0  ;;  %v618_v11 = vadd.f32 %v1847_v34, %v617_v44  ;;  %v505_v12 = vpop.f32.mrb[29].mxu0  ;;  %v633_v13 = vpop.f32.mrb[29].mxu1 }
 0x117   :  { %1545 = vst [vmem:[%s2021_s3 + $0xd8] sm:$0xff] %v1497_v2   ;;  %v1492_v14 = vpack.c.bf16 %v829_v10, %v828_v8  ;;  %vm706_vm2 = vcmp.ge.f32.partialorder %v626_v4, 0.0  ;;  %v770_v15 = vmul.f32 0.2, %v626_v4  ;;  %vm672_vm3 = vcmp.ge.f32.partialorder %v490_v5, 0.0  ;;  %v1619_v16 = vpop.f32.mrb[30].mxu0 }
 0x118   :  { %v1651_v17 = vpop.f32.mrb[30].mxu1  ;;  %1528 = vst [vmem:[%s2021_s3 + $0x50] sm:$0xff] %v1412_v9   ;;  %v802_v18 = vsel %vm674_vm1, %v498_v60, %v738_v1  ;;  %v736_v19 = vmul.f32 0.2, %v490_v5  ;;  %vm704_vm4 = vcmp.ge.f32.partialorder %v618_v11, 0.0  ;;  %v501_v20 = vadd.f32 %v1615_v50, %v1847_v34  ;;  %v508_v21 = vpop.f32.mrb[31].mxu0 }
 0x119   :  { %1544 = vst [vmem:[%s2021_s3 + $0xd0] sm:$0xff] %v1492_v14   ;;  %v768_v22 = vmul.f32 0.2, %v618_v11  ;;  %v629_v23 = vadd.f32 %v1647_v51, %v1847_v34  ;;  %v493_v24 = vadd.f32 %v1847_v34, %v492_v56  ;;  %v621_v25 = vadd.f32 %v1847_v34, %v620_v57  ;;  %v636_v26 = vpop.f32.mrb[31].mxu1 }
 0x11a   :  { %v834_v27 = vsel %vm706_vm2, %v626_v4, %v770_v15  ;;  %v800_v28 = vsel %vm672_vm3, %v490_v5, %v736_v19  ;;  %vm675_vm5 = vcmp.ge.f32.partialorder %v501_v20, 0.0  ;;  %v739_v29 = vmul.f32 0.2, %v501_v20 }
 0x11b   :  { %vm707_vm6 = vcmp.ge.f32.partialorder %v629_v23, 0.0  ;;  %v771_v30 = vmul.f32 0.2, %v629_v23  ;;  %vm673_vm7 = vcmp.ge.f32.partialorder %v493_v24, 0.0  ;;  %v737_v31 = vmul.f32 0.2, %v493_v24 }
 0x11c   :  { %v803_v32 = vsel %vm675_vm5, %v501_v20, %v739_v29  ;;  %vm705_vm8 = vcmp.ge.f32.partialorder %v621_v25, 0.0  ;;  %v769_v33 = vmul.f32 0.2, %v621_v25  ;;  %v514_v35 = vadd.f32 %v1618_v6, %v1847_v34 }
 0x11d   :  { %v1427_v36 = vpack.c.bf16 %v803_v32, %v802_v18  ;;  %v835_v37 = vsel %vm707_vm6, %v629_v23, %v771_v30  ;;  %v801_v38 = vsel %vm673_vm7, %v493_v24, %v737_v31  ;;  %v642_v39 = vadd.f32 %v1650_v7, %v1847_v34 }
 0x11e   :  { %v832_v40 = vsel %vm704_vm4, %v618_v11, %v768_v22  ;;  %v1507_v41 = vpack.c.bf16 %v835_v37, %v834_v27  ;;  %v1422_v42 = vpack.c.bf16 %v801_v38, %v800_v28  ;;  %v833_v43 = vsel %vm705_vm8, %v621_v25, %v769_v33 }
 0x11f   :  { %1531 = vst [vmem:[%s2021_s3 + $0x68] sm:$0xff] %v1427_v36   ;;  %v1502_v44 = vpack.c.bf16 %v833_v43, %v832_v40  ;;  %vm678_vm9 = vcmp.ge.f32.partialorder %v514_v35, 0.0  ;;  %v742_v45 = vmul.f32 0.2, %v514_v35  ;;  %v774_v46 = vmul.f32 0.2, %v642_v39 }
 0x120   :  { %1547 = vst [vmem:[%s2021_s3 + $0xe8] sm:$0xff] %v1507_v41   ;;  %1530 = vst [vmem:[%s2021_s3 + $0x60] sm:$0xff] %v1422_v42   ;;  %v506_v47 = vadd.f32 %v1847_v34, %v505_v12  ;;  %v634_v48 = vadd.f32 %v1847_v34, %v633_v13  ;;  %v517_v49 = vadd.f32 %v1619_v16, %v1847_v34  ;;  %vm710_vm10 = vcmp.ge.f32.partialorder %v642_v39, 0.0 }
 0x121   :  { %v645_v50 = vadd.f32 %v1651_v17, %v1847_v34  ;;  %1546 = vst [vmem:[%s2021_s3 + $0xe0] sm:$0xff] %v1502_v44   ;;  %v509_v51 = vadd.f32 %v1847_v34, %v508_v21  ;;  %v637_v52 = vadd.f32 %v1847_v34, %v636_v26  ;;  %v806_v53 = vsel %vm678_vm9, %v514_v35, %v742_v45 }
 0x122   :  { %vm676_vm11 = vcmp.ge.f32.partialorder %v506_v47, 0.0  ;;  %v740_v54 = vmul.f32 0.2, %v506_v47  ;;  %v772_v55 = vmul.f32 0.2, %v634_v48  ;;  %vm679_vm12 = vcmp.ge.f32.partialorder %v517_v49, 0.0 }
 0x123   :  { %v743_v56 = vmul.f32 0.2, %v517_v49  ;;  %vm711_vm13 = vcmp.ge.f32.partialorder %v645_v50, 0.0  ;;  %v775_v57 = vmul.f32 0.2, %v645_v50  ;;  %v838_v58 = vsel %vm710_vm10, %v642_v39, %v774_v46 }
 0x124   :  { %vm708_vm14 = vcmp.ge.f32.partialorder %v634_v48, 0.0  ;;  %vm677_vm15 = vcmp.ge.f32.partialorder %v509_v51, 0.0  ;;  %v741_v59 = vmul.f32 0.2, %v509_v51  ;;  %vm709_vm0 = vcmp.ge.f32.partialorder %v637_v52, 0.0 }
 0x125   :  { %v807_v60 = vsel %vm679_vm12, %v517_v49, %v743_v56  ;;  %v839_v61 = vsel %vm711_vm13, %v645_v50, %v775_v57  ;;  %v773_v62 = vmul.f32 0.2, %v637_v52  ;;  %v804_v63 = vsel %vm676_vm11, %v506_v47, %v740_v54 }
 0x126   :  { %v1437_v0 = vpack.c.bf16 %v807_v60, %v806_v53  ;;  %v1517_v1 = vpack.c.bf16 %v839_v61, %v838_v58  ;;  %v805_v34 = vsel %vm677_vm15, %v509_v51, %v741_v59  ;;  %v836_v2 = vsel %vm708_vm14, %v634_v48, %v772_v55 }
 0x127   :  { %v1432_v3 = vpack.c.bf16 %v805_v34, %v804_v63  ;;  %v837_v4 = vsel %vm709_vm0, %v637_v52, %v773_v62 }
 0x128   :  { %1533 = vst [vmem:[%s2021_s3 + $0x78] sm:$0xff] %v1437_v0   ;;  %1549 = vst [vmem:[%s2021_s3 + $0xf8] sm:$0xff] %v1517_v1   ;;  %v1512_v5 = vpack.c.bf16 %v837_v4, %v836_v2 }
 0x129   :  { %1532 = vst [vmem:[%s2021_s3 + $0x70] sm:$0xff] %v1432_v3  }
 0x12a   :  { %1548 = vst [vmem:[%s2021_s3 + $0xf0] sm:$0xff] %v1512_v5  }

// kernel: discriminator_forward.10
= control target key start
LH: loop header
LB: loop body
LE: loop exit
PB: predicated region body
PF: predicated region fallthrough
CT: control target
= control target key end

     0   :  { %s423_s0 = inlined_call_operand.vmem [shape: f32[128,128], index: 0, kind: input, shape index: {}]   ;;  %s424_s1 = inlined_call_operand.vmem [shape: f32[1,128], index: 1, kind: input, shape index: {}]   ;;  %s425_s2 = inlined_call_operand.vmem [shape: f32[1,128], index: 2, kind: input, shape index: {}]   ;;  %s426_s3 = inlined_call_operand.vmem [shape: bf16[128,128], index: 3, kind: output, shape index: {}]  }
   0x1   :  { %v14_v0 = vld [vmem:[%s423_s0] sm:$0xff]  ;;  %v15_v1 = vld [vmem:[%s423_s0 + $0x8] sm:$0xff]  ;;  %v16_v6 = vld [vmem:[%s423_s0 + $0x10] sm:$0xff] }
   0x2   :  { %v318_v2 = vld [vmem:[%s424_s1] ss:$0 sm:$0xff]  ;;  %v17_v7 = vld [vmem:[%s423_s0 + $0x18] sm:$0xff]  ;;  %v19_v11 = vld [vmem:[%s423_s0 + $0x28] sm:$0xff] }
   0x3   :  { %v37_v3 = vmul.f32 %v318_v2, %v14_v0  ;;  %v38_v4 = vmul.f32 %v318_v2, %v15_v1  ;;  %v325_v5 = vld [vmem:[%s425_s2] ss:$0 sm:$0xff]  ;;  %v39_v8 = vmul.f32 %v318_v2, %v16_v6  ;;  %v40_v9 = vmul.f32 %v318_v2, %v17_v7  ;;  %v20_v12 = vld [vmem:[%s423_s0 + $0x30] sm:$0xff]  ;;  %v21_v17 = vld [vmem:[%s423_s0 + $0x38] sm:$0xff] }
   0x4   :  { %v18_v10 = vld [vmem:[%s423_s0 + $0x20] sm:$0xff]  ;;  %v42_v16 = vmul.f32 %v318_v2, %v19_v11  ;;  %v43_v20 = vmul.f32 %v318_v2, %v20_v12  ;;  %v44_v21 = vmul.f32 %v318_v2, %v21_v17  ;;  %v23_v35 = vld [vmem:[%s423_s0 + $0x48] sm:$0xff]  ;;  %v24_v36 = vld [vmem:[%s423_s0 + $0x50] sm:$0xff] }
   0x5   :  { %v60_v13 = vadd.f32 %v325_v5, %v37_v3  ;;  %v61_v14 = vadd.f32 %v325_v5, %v38_v4  ;;  %v41_v15 = vmul.f32 %v318_v2, %v18_v10  ;;  %v62_v18 = vadd.f32 %v325_v5, %v39_v8  ;;  %v22_v34 = vld [vmem:[%s423_s0 + $0x40] sm:$0xff]  ;;  %v25_v42 = vld [vmem:[%s423_s0 + $0x58] sm:$0xff]  ;;  %v27_v48 = vld [vmem:[%s423_s0 + $0x68] sm:$0xff] }
   0x6   :  { %v63_v19 = vadd.f32 %v325_v5, %v40_v9  ;;  %v65_v29 = vadd.f32 %v325_v5, %v42_v16  ;;  %v66_v33 = vadd.f32 %v325_v5, %v43_v20  ;;  %v67_v40 = vadd.f32 %v325_v5, %v44_v21  ;;  %v26_v47 = vld [vmem:[%s423_s0 + $0x60] sm:$0xff]  ;;  %v28_v60 = vld [vmem:[%s423_s0 + $0x70] sm:$0xff]  ;;  %v29_v7 = vld [vmem:[%s423_s0 + $0x78] sm:$0xff] }
   0x7   :  { %vm76_vm0 = vcmp.ge.f32.partialorder %v60_v13, 0.0  ;;  %vm77_vm1 = vcmp.ge.f32.partialorder %v61_v14, 0.0  ;;  %v92_v22 = vmul.f32 0.2, %v60_v13  ;;  %v93_v23 = vmul.f32 0.2, %v61_v14 }
   0x8   :  { %vm78_vm2 = vcmp.ge.f32.partialorder %v62_v18, 0.0  ;;  %vm79_vm3 = vcmp.ge.f32.partialorder %v63_v19, 0.0  ;;  %v94_v24 = vmul.f32 0.2, %v62_v18  ;;  %v95_v25 = vmul.f32 0.2, %v63_v19 }
   0x9   :  { %v108_v26 = vsel %vm76_vm0, %v60_v13, %v92_v22  ;;  %v109_v27 = vsel %vm77_vm1, %v61_v14, %v93_v23  ;;  %v64_v28 = vadd.f32 %v325_v5, %v41_v15  ;;  %vm81_vm5 = vcmp.ge.f32.partialorder %v65_v29, 0.0 }
   0xa   :  { %v245_v30 = vpack.c.bf16 %v109_v27, %v108_v26  ;;  %v110_v31 = vsel %vm78_vm2, %v62_v18, %v94_v24  ;;  %v111_v32 = vsel %vm79_vm3, %v63_v19, %v95_v25  ;;  %v97_v39 = vmul.f32 0.2, %v65_v29 }
   0xb   :  { %v250_v37 = vpack.c.bf16 %v111_v32, %v110_v31  ;;  %vm80_vm4 = vcmp.ge.f32.partialorder %v64_v28, 0.0  ;;  %v96_v38 = vmul.f32 0.2, %v64_v28  ;;  %vm82_vm6 = vcmp.ge.f32.partialorder %v66_v33, 0.0 }
   0xc   :  { %246 = vst [vmem:[%s426_s3] sm:$0xff] %v245_v30   ;;  %v98_v41 = vmul.f32 0.2, %v66_v33  ;;  %v45_v44 = vmul.f32 %v318_v2, %v22_v34  ;;  %v46_v45 = vmul.f32 %v318_v2, %v23_v35  ;;  %v47_v46 = vmul.f32 %v318_v2, %v24_v36 }
   0xd   :  { %282 = vst [vmem:[%s426_s3 + $0x8] sm:$0xff] %v250_v37   ;;  %v112_v43 = vsel %vm80_vm4, %v64_v28, %v96_v38  ;;  %v113_v49 = vsel %vm81_vm5, %v65_v29, %v97_v39  ;;  %vm83_vm7 = vcmp.ge.f32.partialorder %v67_v40, 0.0  ;;  %v99_v50 = vmul.f32 0.2, %v67_v40 }
   0xe   :  { %v114_v51 = vsel %vm82_vm6, %v66_v33, %v98_v41  ;;  %v255_v52 = vpack.c.bf16 %v113_v49, %v112_v43  ;;  %v68_v53 = vadd.f32 %v325_v5, %v45_v44  ;;  %v69_v54 = vadd.f32 %v325_v5, %v46_v45 }
   0xf   :  { %v48_v55 = vmul.f32 %v318_v2, %v25_v42  ;;  %v115_v56 = vsel %vm83_vm7, %v67_v40, %v99_v50  ;;  %v70_v57 = vadd.f32 %v325_v5, %v47_v46  ;;  %v49_v58 = vmul.f32 %v318_v2, %v26_v47 }
  0x10   :  { %v50_v59 = vmul.f32 %v318_v2, %v27_v48  ;;  %283 = vst [vmem:[%s426_s3 + $0x10] sm:$0xff] %v255_v52   ;;  %v260_v61 = vpack.c.bf16 %v115_v56, %v114_v51  ;;  %vm84_vm8 = vcmp.ge.f32.partialorder %v68_v53, 0.0  ;;  %vm85_vm9 = vcmp.ge.f32.partialorder %v69_v54, 0.0 }
  0x11   :  { %v100_v62 = vmul.f32 0.2, %v68_v53  ;;  %v101_v63 = vmul.f32 0.2, %v69_v54  ;;  %v71_v0 = vadd.f32 %v325_v5, %v48_v55  ;;  %vm86_vm10 = vcmp.ge.f32.partialorder %v70_v57, 0.0 }
  0x12   :  { %v102_v1 = vmul.f32 0.2, %v70_v57  ;;  %284 = vst [vmem:[%s426_s3 + $0x18] sm:$0xff] %v260_v61   ;;  %v72_v4 = vadd.f32 %v325_v5, %v49_v58  ;;  %v73_v6 = vadd.f32 %v325_v5, %v50_v59  ;;  %v51_v8 = vmul.f32 %v318_v2, %v28_v60 }
  0x13   :  { %v116_v3 = vsel %vm84_vm8, %v68_v53, %v100_v62  ;;  %v117_v9 = vsel %vm85_vm9, %v69_v54, %v101_v63  ;;  %vm87_vm11 = vcmp.ge.f32.partialorder %v71_v0, 0.0  ;;  %v103_v10 = vmul.f32 0.2, %v71_v0 }
  0x14   :  { %v118_v11 = vsel %vm86_vm10, %v70_v57, %v102_v1  ;;  %v265_v12 = vpack.c.bf16 %v117_v9, %v116_v3  ;;  %vm88_vm12 = vcmp.ge.f32.partialorder %v72_v4, 0.0  ;;  %vm89_vm13 = vcmp.ge.f32.partialorder %v73_v6, 0.0 }
  0x15   :  { %v104_v13 = vmul.f32 0.2, %v72_v4  ;;  %v119_v14 = vsel %vm87_vm11, %v71_v0, %v103_v10  ;;  %v105_v15 = vmul.f32 0.2, %v73_v6  ;;  %v52_v16 = vmul.f32 %v318_v2, %v29_v7 }
  0x16   :  { %v74_v17 = vadd.f32 %v325_v5, %v51_v8  ;;  %285 = vst [vmem:[%s426_s3 + $0x20] sm:$0xff] %v265_v12   ;;  %v270_v18 = vpack.c.bf16 %v119_v14, %v118_v11 }
  0x17   :  { %v120_v19 = vsel %vm88_vm12, %v72_v4, %v104_v13  ;;  %v121_v20 = vsel %vm89_vm13, %v73_v6, %v105_v15  ;;  %v75_v21 = vadd.f32 %v325_v5, %v52_v16 }
  0x18   :  { %vm90_vm14 = vcmp.ge.f32.partialorder %v74_v17, 0.0  ;;  %v106_v22 = vmul.f32 0.2, %v74_v17  ;;  %286 = vst [vmem:[%s426_s3 + $0x28] sm:$0xff] %v270_v18   ;;  %v275_v23 = vpack.c.bf16 %v121_v20, %v120_v19 }
  0x19   :  { %vm91_vm15 = vcmp.ge.f32.partialorder %v75_v21, 0.0  ;;  %v107_v2 = vmul.f32 0.2, %v75_v21 }
  0x1a   :  { %v122_v24 = vsel %vm90_vm14, %v74_v17, %v106_v22  ;;  %287 = vst [vmem:[%s426_s3 + $0x30] sm:$0xff] %v275_v23  }
  0x1b   :  { %v123_v25 = vsel %vm91_vm15, %v75_v21, %v107_v2 }
  0x1c   :  { %v280_v26 = vpack.c.bf16 %v123_v25, %v122_v24 }
  0x1e   :  { %288 = vst [vmem:[%s426_s3 + $0x38] sm:$0xff] %v280_v26  }

// kernel: discriminator_forward.9
= control target key start
LH: loop header
LB: loop body
LE: loop exit
PB: predicated region body
PF: predicated region fallthrough
CT: control target
= control target key end

     0   :  { %vm1356_vm0 = vcmask 1040384   ;;  %s2334_s1 = inlined_call_operand.vmem [shape: bf16[1024,128], index: 1, kind: input, shape index: {}]   ;;  %s2335_s0 = inlined_call_operand.vmem [shape: bf16[128,1024], index: 0, kind: input, shape index: {}]   ;;  %s2336_s2 = inlined_call_operand.vmem [shape: f32[128,128], index: 2, kind: output, shape index: {0}]   ;;  %s2337_s3 = inlined_call_operand.vmem [shape: f32[1,2,128], index: 3, kind: output, shape index: {1}]  }
   0x1   :  { %v1767_v0 = vld [vmem:[%s2334_s1 + $0x40] sm:$0xff]   ;;  %v1771_v4 = vld [vmem:[%s2334_s1 + $0x48] sm:$0xff]   ;;  %v1775_v8 = vld [vmem:[%s2334_s1 + $0x50] sm:$0xff]  }
   0x2   :  { %v1768_v1 = vld [vmem:[%s2334_s1 + $0xc0] sm:$0xff]   ;;  %1511 = vmatprep.subr.bf16.mxu0 %v1767_v0  ;;  %v1772_v5 = vld [vmem:[%s2334_s1 + $0xc8] sm:$0xff]   ;;  %v1776_v9 = vld [vmem:[%s2334_s1 + $0xd0] sm:$0xff]  }
   0x3   :  { %v1769_v2 = vld [vmem:[%s2334_s1] sm:$0xff]   ;;  %1575 = vmatprep.subr.bf16.mxu1 %v1768_v1  ;;  %v1773_v6 = vld [vmem:[%s2334_s1 + $0x8] sm:$0xff]   ;;  %v1777_v10 = vld [vmem:[%s2334_s1 + $0x10] sm:$0xff]  }
   0x4   :  { %v1770_v3 = vld [vmem:[%s2334_s1 + $0x80] sm:$0xff]   ;;  %1512 = vmatpush3.bf16.msra.mxu0 %v1769_v2  ;;  %v1774_v7 = vld [vmem:[%s2334_s1 + $0x88] sm:$0xff]   ;;  %v1778_v11 = vld [vmem:[%s2334_s1 + $0x90] sm:$0xff]  }
   0x5   :  { %1576 = vmatpush3.bf16.msra.mxu1 %v1770_v3  ;;  %1513 = vmatprep.subr.bf16.mxu0 %v1771_v4  ;;  %v1779_v12 = vld [vmem:[%s2334_s1 + $0x58] sm:$0xff]   ;;  %v1783_v16 = vld [vmem:[%s2334_s1 + $0x60] sm:$0xff]   ;;  %v1787_v20 = vld [vmem:[%s2334_s1 + $0x68] sm:$0xff]  }
   0x6   :  { %1577 = vmatprep.subr.bf16.mxu1 %v1772_v5  ;;  %v1780_v13 = vld [vmem:[%s2334_s1 + $0xd8] sm:$0xff]   ;;  %v1784_v17 = vld [vmem:[%s2334_s1 + $0xe0] sm:$0xff]   ;;  %v1788_v21 = vld [vmem:[%s2334_s1 + $0xe8] sm:$0xff]  }
   0x7   :  { %v1781_v14 = vld [vmem:[%s2334_s1 + $0x18] sm:$0xff]   ;;  %v1785_v18 = vld [vmem:[%s2334_s1 + $0x20] sm:$0xff]   ;;  %v1789_v22 = vld [vmem:[%s2334_s1 + $0x28] sm:$0xff]  }
   0x8   :  { %1514 = vmatpush3.bf16.msra.mxu0 %v1773_v6  ;;  %v1782_v15 = vld [vmem:[%s2334_s1 + $0x98] sm:$0xff]   ;;  %v1786_v19 = vld [vmem:[%s2334_s1 + $0xa0] sm:$0xff]   ;;  %v1790_v23 = vld [vmem:[%s2334_s1 + $0xa8] sm:$0xff]  }
   0x9   :  { %1578 = vmatpush3.bf16.msra.mxu1 %v1774_v7  ;;  %1515 = vmatprep.subr.bf16.mxu0 %v1775_v8  ;;  %v1791_v24 = vld [vmem:[%s2334_s1 + $0x70] sm:$0xff]   ;;  %v1795_v28 = vld [vmem:[%s2334_s1 + $0x78] sm:$0xff]   ;;  %v14_v32 = vld [vmem:[%s2335_s0] sm:$0xff] }
   0xa   :  { %1579 = vmatprep.subr.bf16.mxu1 %v1776_v9  ;;  %v1792_v25 = vld [vmem:[%s2334_s1 + $0xf0] sm:$0xff]   ;;  %v1796_v29 = vld [vmem:[%s2334_s1 + $0xf8] sm:$0xff]   ;;  %v18_v33 = vld [vmem:[%s2335_s0 + $0x20] sm:$0xff] }
   0xb   :  { %v1793_v26 = vld [vmem:[%s2334_s1 + $0x30] sm:$0xff]   ;;  %v1797_v30 = vld [vmem:[%s2334_s1 + $0x38] sm:$0xff]   ;;  %v15_v34 = vld [vmem:[%s2335_s0 + $0x8] sm:$0xff]  ;;  %v1383_v35 = vcombine.low %v14_v32, %v18_v33  ;;  %v1384_v36 = vcombine.high %v14_v32, %v18_v33 }
   0xc   :  { %1516 = vmatpush3.bf16.msra.mxu0 %v1777_v10  ;;  %v1794_v27 = vld [vmem:[%s2334_s1 + $0xb0] sm:$0xff]   ;;  %v1798_v31 = vld [vmem:[%s2334_s1 + $0xb8] sm:$0xff]   ;;  %v19_v37 = vld [vmem:[%s2335_s0 + $0x28] sm:$0xff] }
   0xd   :  { %1580 = vmatpush3.bf16.msra.mxu1 %v1778_v11  ;;  %1517 = vmatprep.subr.bf16.mxu0 %v1779_v12  ;;  %v1385_v38 = vcombine.low %v15_v34, %v19_v37  ;;  %v1386_v39 = vcombine.high %v15_v34, %v19_v37  ;;  %v1799_v40 = vld [vmem:[%s2334_s1 + $0x140] sm:$0xff]   ;;  %v23_v47 = vld [vmem:[%s2335_s0 + $0x48] sm:$0xff]  ;;  %v1807_v62 = vld [vmem:[%s2334_s1 + $0x150] sm:$0xff]  }
   0xe   :  { %1581 = vmatprep.subr.bf16.mxu1 %v1780_v13  ;;  %942 = vmatprep.mubr.bf16.mxu0 %v1384_v36  ;;  %v1800_v41 = vld [vmem:[%s2334_s1 + $0x100] sm:$0xff]   ;;  %v27_v48 = vld [vmem:[%s2335_s0 + $0x68] sm:$0xff]  ;;  %v1808_v63 = vld [vmem:[%s2334_s1 + $0x110] sm:$0xff]  }
   0xf   :  { %1039 = vmatprep.mubr.bf16.mxu1 %v1386_v39  ;;  %v1801_v42 = vld [vmem:[%s2334_s1 + $0x1c0] sm:$0xff]   ;;  %v1394_v49 = vcombine.high %v23_v47, %v27_v48  ;;  %v1803_v50 = vld [vmem:[%s2334_s1 + $0x148] sm:$0xff]   ;;  %v1393_v53 = vcombine.low %v23_v47, %v27_v48  ;;  %v1809_v0 = vld [vmem:[%s2334_s1 + $0x1d0] sm:$0xff]  }
  0x10   :  { %1518 = vmatpush3.bf16.msra.mxu0 %v1781_v14  ;;  %v1802_v43 = vld [vmem:[%s2334_s1 + $0x180] sm:$0xff]   ;;  %v1804_v52 = vld [vmem:[%s2334_s1 + $0x108] sm:$0xff]   ;;  %v1810_v1 = vld [vmem:[%s2334_s1 + $0x190] sm:$0xff]  }
  0x11   :  { %1582 = vmatpush3.bf16.msra.mxu1 %v1782_v15  ;;  %1519 = vmatprep.subr.bf16.mxu0 %v1783_v16  ;;  %v22_v44 = vld [vmem:[%s2335_s0 + $0x40] sm:$0xff]  ;;  %v1805_v54 = vld [vmem:[%s2334_s1 + $0x1c8] sm:$0xff]   ;;  %v1811_v10 = vld [vmem:[%s2334_s1 + $0x158] sm:$0xff]  }
  0x12   :  { %1583 = vmatprep.subr.bf16.mxu1 %v1784_v17  ;;  %v26_v45 = vld [vmem:[%s2335_s0 + $0x60] sm:$0xff]  ;;  %v1806_v55 = vld [vmem:[%s2334_s1 + $0x188] sm:$0xff]   ;;  %v1812_v11 = vld [vmem:[%s2334_s1 + $0x118] sm:$0xff]  }
  0x13   :  { %v1392_v46 = vcombine.high %v22_v44, %v26_v45  ;;  %v1391_v51 = vcombine.low %v22_v44, %v26_v45  ;;  %v30_v56 = vld [vmem:[%s2335_s0 + $0x80] sm:$0xff]  ;;  %v31_v58 = vld [vmem:[%s2335_s0 + $0x88] sm:$0xff]  ;;  %v1813_v12 = vld [vmem:[%s2334_s1 + $0x1d8] sm:$0xff]  }
  0x14   :  { %1520 = vmatpush3.bf16.msra.mxu0 %v1785_v18  ;;  %v34_v57 = vld [vmem:[%s2335_s0 + $0xa0] sm:$0xff]  ;;  %v35_v59 = vld [vmem:[%s2335_s0 + $0xa8] sm:$0xff]  ;;  %v1814_v13 = vld [vmem:[%s2334_s1 + $0x198] sm:$0xff]  }
  0x15   :  { %1584 = vmatpush3.bf16.msra.mxu1 %v1786_v19  ;;  %1521 = vmatprep.subr.bf16.mxu0 %v1787_v20  ;;  %v1400_v60 = vcombine.high %v30_v56, %v34_v57  ;;  %v1402_v61 = vcombine.high %v31_v58, %v35_v59  ;;  %v1399_v2 = vcombine.low %v30_v56, %v34_v57  ;;  %v38_v3 = vld [vmem:[%s2335_s0 + $0xc0] sm:$0xff]  ;;  %v39_v5 = vld [vmem:[%s2335_s0 + $0xc8] sm:$0xff]  ;;  %v1824_v39 = vld [vmem:[%s2334_s1 + $0x130] sm:$0xff]  }
  0x16   :  { %1585 = vmatprep.subr.bf16.mxu1 %v1788_v21  ;;  %v42_v4 = vld [vmem:[%s2335_s0 + $0xe0] sm:$0xff]  ;;  %v1401_v6 = vcombine.low %v31_v58, %v35_v59  ;;  %v43_v8 = vld [vmem:[%s2335_s0 + $0xe8] sm:$0xff]  ;;  %v1828_v48 = vld [vmem:[%s2334_s1 + $0x138] sm:$0xff]  }
  0x17   :  { %v1408_v7 = vcombine.high %v38_v3, %v42_v4  ;;  %v1410_v9 = vcombine.high %v39_v5, %v43_v8  ;;  %v46_v14 = vld [vmem:[%s2335_s0 + $0x100] sm:$0xff]  ;;  %v47_v16 = vld [vmem:[%s2335_s0 + $0x108] sm:$0xff]  ;;  %v1407_v19 = vcombine.low %v38_v3, %v42_v4  ;;  %v1409_v21 = vcombine.low %v39_v5, %v43_v8  ;;  %v25_v8 = vld [vmem:[%s2335_s0 + $0x58] sm:$0xff] }
  0x18   :  { %1522 = vmatpush3.bf16.msra.mxu0 %v1789_v22  ;;  %v50_v15 = vld [vmem:[%s2335_s0 + $0x120] sm:$0xff]  ;;  %v51_v17 = vld [vmem:[%s2335_s0 + $0x128] sm:$0xff] }
  0x19   :  { %1586 = vmatpush3.bf16.msra.mxu1 %v1790_v23  ;;  %1523 = vmatprep.subr.bf16.mxu0 %v1791_v24  ;;  %v1815_v18 = vld [vmem:[%s2334_s1 + $0x160] sm:$0xff]   ;;  %v1416_v22 = vcombine.high %v46_v14, %v50_v15  ;;  %v1418_v24 = vcombine.high %v47_v16, %v51_v17  ;;  %v1821_v32 = vld [vmem:[%s2334_s1 + $0x1e8] sm:$0xff]   ;;  %v1415_v34 = vcombine.low %v46_v14, %v50_v15  ;;  %v32_v14 = vld [vmem:[%s2335_s0 + $0x90] sm:$0xff] }
  0x1a   :  { %1587 = vmatprep.subr.bf16.mxu1 %v1792_v25  ;;  %v1816_v20 = vld [vmem:[%s2334_s1 + $0x120] sm:$0xff]   ;;  %v1822_v33 = vld [vmem:[%s2334_s1 + $0x1a8] sm:$0xff]   ;;  %v36_v15 = vld [vmem:[%s2335_s0 + $0xb0] sm:$0xff] }
  0x1b   :  { %v1817_v23 = vld [vmem:[%s2334_s1 + $0x1e0] sm:$0xff]   ;;  %v63_v44 = vld [vmem:[%s2335_s0 + $0x188] sm:$0xff] }
  0x1c   :  { %1524 = vmatpush3.bf16.msra.mxu0 %v1793_v26  ;;  %v1818_v25 = vld [vmem:[%s2334_s1 + $0x1a0] sm:$0xff]   ;;  %v67_v45 = vld [vmem:[%s2335_s0 + $0x1a8] sm:$0xff] }
  0x1d   :  { %1588 = vmatpush3.bf16.msra.mxu1 %v1794_v27  ;;  %1525 = vmatprep.subr.bf16.mxu0 %v1795_v28  ;;  %v54_v26 = vld [vmem:[%s2335_s0 + $0x140] sm:$0xff]  ;;  %v1819_v28 = vld [vmem:[%s2334_s1 + $0x168] sm:$0xff]   ;;  %v1433_v59 = vcombine.low %v63_v44, %v67_v45 }
  0x1e   :  { %1589 = vmatprep.subr.bf16.mxu1 %v1796_v29  ;;  %v58_v27 = vld [vmem:[%s2335_s0 + $0x160] sm:$0xff]  ;;  %v55_v29 = vld [vmem:[%s2335_s0 + $0x148] sm:$0xff] }
  0x1f   :  { %v1424_v36 = vcombine.high %v54_v26, %v58_v27  ;;  %v1423_v47 = vcombine.low %v54_v26, %v58_v27  ;;  %v71_v56 = vld [vmem:[%s2335_s0 + $0x1c8] sm:$0xff]  ;;  %v1403_v26 = vcombine.low %v32_v14, %v36_v15 }
  0x20   :  { %1526 = vmatpush3.bf16.msra.mxu0 %v1797_v30  ;;  %v59_v30 = vld [vmem:[%s2335_s0 + $0x168] sm:$0xff] }
  0x21   :  { %1590 = vmatpush3.bf16.msra.mxu1 %v1798_v31  ;;  %1639 = vmatprep.subr.bf16.mxu0 %v1799_v40  ;;  %v1820_v31 = vld [vmem:[%s2334_s1 + $0x128] sm:$0xff]   ;;  %v1426_v37 = vcombine.high %v55_v29, %v59_v30  ;;  %v1825_v40 = vld [vmem:[%s2334_s1 + $0x1f0] sm:$0xff]  }
  0x22   :  { %1703 = vmatprep.subr.bf16.mxu1 %v1801_v42  ;;  %v66_v42 = vld [vmem:[%s2335_s0 + $0x1a0] sm:$0xff]  ;;  %v75_v57 = vld [vmem:[%s2335_s0 + $0x1e8] sm:$0xff] }
  0x23   :  { %943 = vmatmul.mubr.bf16.vlgmr.msra.gmra.mrb[0].mxu0 %v1383_v35  ;;  %v1417_v35 = vcombine.low %v47_v16, %v51_v17  ;;  %v1441_v3 = vcombine.low %v71_v56, %v75_v57  ;;  %v33_v16 = vld [vmem:[%s2335_s0 + $0x98] sm:$0xff] }
  0x24   :  { %1040 = vmatmul.mubr.bf16.vlgmr.msra.gmra.mrb[0].mxu1 %v1385_v38  ;;  %1640 = vmatpush3.bf16.msra.mxu0 %v1800_v41  ;;  %v1823_v38 = vld [vmem:[%s2334_s1 + $0x170] sm:$0xff]   ;;  %v62_v41 = vld [vmem:[%s2335_s0 + $0x180] sm:$0xff]  ;;  %v37_v17 = vld [vmem:[%s2335_s0 + $0xb8] sm:$0xff] }
  0x25   :  { %1704 = vmatpush3.bf16.msra.mxu1 %v1802_v43  ;;  %950 = vmatprep.mubr.bf16.mxu0 %v1392_v46  ;;  %v1826_v43 = vld [vmem:[%s2334_s1 + $0x1b0] sm:$0xff]   ;;  %v1827_v46 = vld [vmem:[%s2334_s1 + $0x178] sm:$0xff]   ;;  %v1431_v58 = vcombine.low %v62_v41, %v66_v42  ;;  %v1405_v27 = vcombine.low %v33_v16, %v37_v17 }
  0x26   :  { %1047 = vmatprep.mubr.bf16.mxu1 %v1394_v49  ;;  %1641 = vmatprep.subr.bf16.mxu0 %v1803_v50  ;;  %v1425_v49 = vcombine.low %v55_v29, %v59_v30  ;;  %v1432_v50 = vcombine.high %v62_v41, %v66_v42  ;;  %v48_v30 = vld [vmem:[%s2335_s0 + $0x110] sm:$0xff]  ;;  %v61_v41 = vld [vmem:[%s2335_s0 + $0x178] sm:$0xff] }
  0x27   :  { %1705 = vmatprep.subr.bf16.mxu1 %v1805_v54  ;;  %v70_v54 = vld [vmem:[%s2335_s0 + $0x1c0] sm:$0xff] }
  0x28   :  { %1642 = vmatpush3.bf16.msra.mxu0 %v1804_v52  ;;  %v1434_v52 = vcombine.high %v63_v44, %v67_v45 }
  0x29   :  { %1706 = vmatpush3.bf16.msra.mxu1 %v1806_v55  ;;  %1643 = vmatprep.subr.bf16.mxu0 %v1807_v62  ;;  %v74_v55 = vld [vmem:[%s2335_s0 + $0x1e0] sm:$0xff]  ;;  %v16_v62 = vld [vmem:[%s2335_s0 + $0x10] sm:$0xff] }
  0x2a   :  { %1707 = vmatprep.subr.bf16.mxu1 %v1809_v0  ;;  %v17_v0 = vld [vmem:[%s2335_s0 + $0x18] sm:$0xff] }
  0x2b   :  { %951 = vmatmul.mubr.bf16.gmra.mrb[4].mxu0 %v1391_v51  ;;  %v1829_v51 = vld [vmem:[%s2334_s1 + $0x1f8] sm:$0xff]  }
  0x2c   :  { %1048 = vmatmul.mubr.bf16.gmra.mrb[4].mxu1 %v1393_v53  ;;  %958 = vmatprep.mubr.bf16.mxu0 %v1400_v60  ;;  %v1830_v53 = vld [vmem:[%s2334_s1 + $0x1b8] sm:$0xff]   ;;  %v1440_v60 = vcombine.high %v70_v54, %v74_v55 }
  0x2d   :  { %1055 = vmatprep.mubr.bf16.mxu1 %v1402_v61  ;;  %1644 = vmatpush3.bf16.msra.mxu0 %v1808_v63  ;;  %v1442_v61 = vcombine.high %v71_v56, %v75_v57  ;;  %v20_v63 = vld [vmem:[%s2335_s0 + $0x30] sm:$0xff]  ;;  %v73_v56 = vld [vmem:[%s2335_s0 + $0x1d8] sm:$0xff] }
  0x2e   :  { %1708 = vmatpush3.bf16.msra.mxu1 %v1810_v1  ;;  %1645 = vmatprep.subr.bf16.mxu0 %v1811_v10  ;;  %v21_v1 = vld [vmem:[%s2335_s0 + $0x38] sm:$0xff]  ;;  %v1388_v4 = vcombine.high %v16_v62, %v20_v63  ;;  %v1387_v10 = vcombine.low %v16_v62, %v20_v63 }
  0x2f   :  { %1709 = vmatprep.subr.bf16.mxu1 %v1813_v12  ;;  %v1390_v5 = vcombine.high %v17_v0, %v21_v1  ;;  %v77_v57 = vld [vmem:[%s2335_s0 + $0x1f8] sm:$0xff] }
  0x30   :  { %v1445_v63 = vcombine.low %v73_v56, %v77_v57 }
  0x31   :  { %1646 = vmatpush3.bf16.msra.mxu0 %v1812_v11  ;;  %v1389_v11 = vcombine.low %v17_v0, %v21_v1 }
  0x32   :  { %1710 = vmatpush3.bf16.msra.mxu1 %v1814_v13  ;;  %1647 = vmatprep.subr.bf16.mxu0 %v1815_v18 }
  0x33   :  { %959 = vmatmul.mubr.bf16.gmra.mrb[8].mxu0 %v1399_v2  ;;  %1711 = vmatprep.subr.bf16.mxu1 %v1817_v23  ;;  %v1439_v2 = vcombine.low %v70_v54, %v74_v55  ;;  %v44_v23 = vld [vmem:[%s2335_s0 + $0xf0] sm:$0xff] }
  0x34   :  { %1056 = vmatmul.mubr.bf16.gmra.mrb[8].mxu1 %v1401_v6  ;;  %966 = vmatprep.mubr.bf16.mxu0 %v1408_v7  ;;  %v24_v6 = vld [vmem:[%s2335_s0 + $0x50] sm:$0xff] }
  0x35   :  { %1063 = vmatprep.mubr.bf16.mxu1 %v1410_v9  ;;  %1648 = vmatpush3.bf16.msra.mxu0 %v1816_v20  ;;  %v28_v7 = vld [vmem:[%s2335_s0 + $0x70] sm:$0xff]  ;;  %v29_v9 = vld [vmem:[%s2335_s0 + $0x78] sm:$0xff]  ;;  %v1404_v20 = vcombine.high %v32_v14, %v36_v15 }
  0x36   :  { %1712 = vmatpush3.bf16.msra.mxu1 %v1818_v25  ;;  %1649 = vmatprep.subr.bf16.mxu0 %v1819_v28  ;;  %v1396_v12 = vcombine.high %v24_v6, %v28_v7  ;;  %v1398_v13 = vcombine.high %v25_v8, %v29_v9  ;;  %v1395_v18 = vcombine.low %v24_v6, %v28_v7  ;;  %v45_v25 = vld [vmem:[%s2335_s0 + $0xf8] sm:$0xff]  ;;  %v72_v54 = vld [vmem:[%s2335_s0 + $0x1d0] sm:$0xff] }
  0x37   :  { %1713 = vmatprep.subr.bf16.mxu1 %v1821_v32  ;;  %v49_v32 = vld [vmem:[%s2335_s0 + $0x118] sm:$0xff]  ;;  %v76_v55 = vld [vmem:[%s2335_s0 + $0x1f0] sm:$0xff] }
  0x38   :  { %v1443_v62 = vcombine.low %v72_v54, %v76_v55 }
  0x39   :  { %1650 = vmatpush3.bf16.msra.mxu0 %v1820_v31  ;;  %v52_v31 = vld [vmem:[%s2335_s0 + $0x130] sm:$0xff] }
  0x3a   :  { %1714 = vmatpush3.bf16.msra.mxu1 %v1822_v33  ;;  %1651 = vmatprep.subr.bf16.mxu0 %v1823_v38  ;;  %v53_v33 = vld [vmem:[%s2335_s0 + $0x138] sm:$0xff]  ;;  %v56_v38 = vld [vmem:[%s2335_s0 + $0x150] sm:$0xff]  ;;  %v1419_v42 = vcombine.low %v48_v30, %v52_v31 }
  0x3b   :  { %967 = vmatmul.mubr.bf16.gmra.mrb[12].mxu0 %v1407_v19  ;;  %1715 = vmatprep.subr.bf16.mxu1 %v1825_v40  ;;  %v1397_v19 = vcombine.low %v25_v8, %v29_v9  ;;  %v57_v40 = vld [vmem:[%s2335_s0 + $0x158] sm:$0xff] }
  0x3c   :  { %1064 = vmatmul.mubr.bf16.gmra.mrb[12].mxu1 %v1409_v21  ;;  %974 = vmatprep.mubr.bf16.mxu0 %v1416_v22  ;;  %v1406_v21 = vcombine.high %v33_v16, %v37_v17  ;;  %v40_v22 = vld [vmem:[%s2335_s0 + $0xd0] sm:$0xff]  ;;  %v1430_v45 = vcombine.high %v57_v40, %v61_v41 }
  0x3d   :  { %1071 = vmatprep.mubr.bf16.mxu1 %v1418_v24  ;;  %1652 = vmatpush3.bf16.msra.mxu0 %v1824_v39  ;;  %v41_v24 = vld [vmem:[%s2335_s0 + $0xd8] sm:$0xff]  ;;  %v1412_v28 = vcombine.high %v40_v22, %v44_v23  ;;  %v60_v39 = vld [vmem:[%s2335_s0 + $0x170] sm:$0xff] }
  0x3e   :  { %1716 = vmatpush3.bf16.msra.mxu1 %v1826_v43  ;;  %1653 = vmatprep.subr.bf16.mxu0 %v1827_v46  ;;  %v1414_v29 = vcombine.high %v41_v24, %v45_v25  ;;  %v1421_v43 = vcombine.low %v49_v32, %v53_v33  ;;  %v1428_v44 = vcombine.high %v56_v38, %v60_v39  ;;  %v64_v46 = vld [vmem:[%s2335_s0 + $0x190] sm:$0xff] }
  0x3f   :  { %1717 = vmatprep.subr.bf16.mxu1 %v1829_v51  ;;  %v1429_v51 = vcombine.low %v57_v40, %v61_v41 }
  0x41   :  { %1654 = vmatpush3.bf16.msra.mxu0 %v1828_v48  ;;  %v65_v48 = vld [vmem:[%s2335_s0 + $0x198] sm:$0xff] }
  0x42   :  { %1718 = vmatpush3.bf16.msra.mxu1 %v1830_v53 }
  0x43   :  { %975 = vmatmul.mubr.bf16.gmra.mrb[16].mxu0 %v1415_v34  ;;  %v1411_v34 = vcombine.low %v40_v22, %v44_v23 }
  0x44   :  { %1072 = vmatmul.mubr.bf16.gmra.mrb[16].mxu1 %v1417_v35  ;;  %982 = vmatprep.mubr.bf16.mxu0 %v1424_v36  ;;  %v1413_v35 = vcombine.low %v41_v24, %v45_v25  ;;  %v1420_v36 = vcombine.high %v48_v30, %v52_v31 }
  0x45   :  { %1079 = vmatprep.mubr.bf16.mxu1 %v1426_v37  ;;  %v1422_v37 = vcombine.high %v49_v32, %v53_v33 }
  0x4b   :  { %983 = vmatmul.mubr.bf16.gmra.mrb[20].mxu0 %v1423_v47  ;;  %v68_v47 = vld [vmem:[%s2335_s0 + $0x1b0] sm:$0xff] }
  0x4c   :  { %1080 = vmatmul.mubr.bf16.gmra.mrb[20].mxu1 %v1425_v49  ;;  %990 = vmatprep.mubr.bf16.mxu0 %v1432_v50  ;;  %v69_v49 = vld [vmem:[%s2335_s0 + $0x1b8] sm:$0xff]  ;;  %v1427_v50 = vcombine.low %v56_v38, %v60_v39 }
  0x4d   :  { %1087 = vmatprep.mubr.bf16.mxu1 %v1434_v52  ;;  %v1436_v52 = vcombine.high %v64_v46, %v68_v47  ;;  %v1438_v53 = vcombine.high %v65_v48, %v69_v49 }
  0x53   :  { %991 = vmatmul.mubr.bf16.gmra.mrb[24].mxu0 %v1431_v58  ;;  %v1435_v58 = vcombine.low %v64_v46, %v68_v47 }
  0x54   :  { %1088 = vmatmul.mubr.bf16.gmra.mrb[24].mxu1 %v1433_v59  ;;  %998 = vmatprep.mubr.bf16.mxu0 %v1440_v60  ;;  %v1437_v59 = vcombine.low %v65_v48, %v69_v49  ;;  %v1444_v60 = vcombine.high %v72_v54, %v76_v55 }
  0x55   :  { %1095 = vmatprep.mubr.bf16.mxu1 %v1442_v61  ;;  %v1446_v61 = vcombine.high %v73_v56, %v77_v57 }
  0x5b   :  { %999 = vmatmul.mubr.bf16.gmra.mrb[28].mxu0 %v1439_v2 }
  0x5c   :  { %1096 = vmatmul.mubr.bf16.gmra.mrb[28].mxu1 %v1441_v3  ;;  %1136 = vmatprep.mubr.bf16.mxu0 %v1388_v4 }
  0x5d   :  { %1233 = vmatprep.mubr.bf16.mxu1 %v1390_v5 }
  0x63   :  { %1137 = vmatmul.mubr.bf16.vlgmr.msra.gmra.mrb[32].mxu0 %v1387_v10 }
  0x64   :  { %1234 = vmatmul.mubr.bf16.vlgmr.msra.gmra.mrb[32].mxu1 %v1389_v11  ;;  %1144 = vmatprep.mubr.bf16.mxu0 %v1396_v12 }
  0x65   :  { %1241 = vmatprep.mubr.bf16.mxu1 %v1398_v13 }
  0x6b   :  { %1145 = vmatmul.mubr.bf16.gmra.mrb[36].mxu0 %v1395_v18 }
  0x6c   :  { %1242 = vmatmul.mubr.bf16.gmra.mrb[36].mxu1 %v1397_v19  ;;  %1152 = vmatprep.mubr.bf16.mxu0 %v1404_v20 }
  0x6d   :  { %1249 = vmatprep.mubr.bf16.mxu1 %v1406_v21 }
  0x73   :  { %1153 = vmatmul.mubr.bf16.gmra.mrb[40].mxu0 %v1403_v26 }
  0x74   :  { %1250 = vmatmul.mubr.bf16.gmra.mrb[40].mxu1 %v1405_v27  ;;  %1160 = vmatprep.mubr.bf16.mxu0 %v1412_v28 }
  0x75   :  { %1257 = vmatprep.mubr.bf16.mxu1 %v1414_v29 }
  0x7b   :  { %1161 = vmatmul.mubr.bf16.gmra.mrb[44].mxu0 %v1411_v34 }
  0x7c   :  { %1258 = vmatmul.mubr.bf16.gmra.mrb[44].mxu1 %v1413_v35  ;;  %1168 = vmatprep.mubr.bf16.mxu0 %v1420_v36 }
  0x7d   :  { %1265 = vmatprep.mubr.bf16.mxu1 %v1422_v37 }
  0x83   :  { %1169 = vmatmul.mubr.bf16.gmra.mrb[48].mxu0 %v1419_v42 }
  0x84   :  { %1266 = vmatmul.mubr.bf16.gmra.mrb[48].mxu1 %v1421_v43  ;;  %1176 = vmatprep.mubr.bf16.mxu0 %v1428_v44 }
  0x85   :  { %1273 = vmatprep.mubr.bf16.mxu1 %v1430_v45 }
  0x8b   :  { %1177 = vmatmul.mubr.bf16.gmra.mrb[52].mxu0 %v1427_v50 }
  0x8c   :  { %1274 = vmatmul.mubr.bf16.gmra.mrb[52].mxu1 %v1429_v51  ;;  %1184 = vmatprep.mubr.bf16.mxu0 %v1436_v52 }
  0x8d   :  { %1281 = vmatprep.mubr.bf16.mxu1 %v1438_v53 }
  0x93   :  { %1185 = vmatmul.mubr.bf16.gmra.mrb[56].mxu0 %v1435_v58 }
  0x94   :  { %1282 = vmatmul.mubr.bf16.gmra.mrb[56].mxu1 %v1437_v59  ;;  %1192 = vmatprep.mubr.bf16.mxu0 %v1444_v60 }
  0x95   :  { %1289 = vmatprep.mubr.bf16.mxu1 %v1446_v61 }
  0x9b   :  { %1193 = vmatmul.mubr.bf16.gmra.mrb[60].mxu0 %v1443_v62 }
  0x9c   :  { %1290 = vmatmul.mubr.bf16.gmra.mrb[60].mxu1 %v1445_v63 }
  0xf6   :  { %v1527_v0 = vpop.f32.mrb[0].mxu0 }
  0xf7   :  { %v1591_v1 = vpop.f32.mrb[0].mxu1  ;;  %v1528_v2 = vpop.f32.mrb[1].mxu0 }
  0xf8   :  { %v1529_v3 = vadd.f32 %v1528_v2, %v1527_v0  ;;  %v1592_v4 = vpop.f32.mrb[1].mxu1  ;;  %v1530_v5 = vpop.f32.mrb[2].mxu0 }
  0xf9   :  { %v1593_v6 = vadd.f32 %v1592_v4, %v1591_v1  ;;  %v1594_v7 = vpop.f32.mrb[2].mxu1  ;;  %v1531_v8 = vpop.f32.mrb[3].mxu0 }
  0xfa   :  { %v1532_v9 = vadd.f32 %v1531_v8, %v1530_v5  ;;  %v1595_v10 = vpop.f32.mrb[3].mxu1 }
  0xfb   :  { %v2235_v11 = vadd.f32 %v1593_v6, %v1529_v3  ;;  %v1596_v12 = vadd.f32 %v1595_v10, %v1594_v7 }
  0xfd   :  { %v2237_v13 = vadd.f32 %v1596_v12, %v1532_v9 }
  0xfe   :  { %v1533_v14 = vpop.f32.mrb[4].mxu0 }
  0xff   :  { %v1597_v15 = vpop.f32.mrb[4].mxu1  ;;  %v1534_v16 = vpop.f32.mrb[5].mxu0 }
 0x100   :  { %v1535_v17 = vadd.f32 %v1534_v16, %v1533_v14  ;;  %v1598_v18 = vpop.f32.mrb[5].mxu1  ;;  %v1536_v19 = vpop.f32.mrb[6].mxu0 }
 0x101   :  { %v1599_v20 = vadd.f32 %v1598_v18, %v1597_v15  ;;  %v1600_v21 = vpop.f32.mrb[6].mxu1  ;;  %v1537_v22 = vpop.f32.mrb[7].mxu0 }
 0x102   :  { %v1538_v23 = vadd.f32 %v1537_v22, %v1536_v19  ;;  %v1601_v24 = vpop.f32.mrb[7].mxu1 }
 0x103   :  { %v2239_v25 = vadd.f32 %v1599_v20, %v1535_v17  ;;  %v1602_v26 = vadd.f32 %v1601_v24, %v1600_v21 }
 0x105   :  { %v2241_v27 = vadd.f32 %v1602_v26, %v1538_v23 }
 0x106   :  { %v1539_v28 = vpop.f32.mrb[8].mxu0 }
 0x107   :  { %v1603_v29 = vpop.f32.mrb[8].mxu1  ;;  %v1540_v30 = vpop.f32.mrb[9].mxu0 }
 0x108   :  { %v1541_v31 = vadd.f32 %v1540_v30, %v1539_v28  ;;  %v1604_v32 = vpop.f32.mrb[9].mxu1  ;;  %v1542_v33 = vpop.f32.mrb[10].mxu0 }
 0x109   :  { %v1605_v34 = vadd.f32 %v1604_v32, %v1603_v29  ;;  %v1606_v35 = vpop.f32.mrb[10].mxu1  ;;  %v1543_v36 = vpop.f32.mrb[11].mxu0 }
 0x10a   :  { %v1544_v37 = vadd.f32 %v1543_v36, %v1542_v33  ;;  %v1607_v38 = vpop.f32.mrb[11].mxu1 }
 0x10b   :  { %v2243_v39 = vadd.f32 %v1605_v34, %v1541_v31  ;;  %v1608_v40 = vadd.f32 %v1607_v38, %v1606_v35 }
 0x10d   :  { %v2245_v41 = vadd.f32 %v1608_v40, %v1544_v37 }
 0x10e   :  { %v1545_v42 = vpop.f32.mrb[12].mxu0 }
 0x10f   :  { %v1609_v43 = vpop.f32.mrb[12].mxu1  ;;  %v1546_v44 = vpop.f32.mrb[13].mxu0 }
 0x110   :  { %v1547_v45 = vadd.f32 %v1546_v44, %v1545_v42  ;;  %v1610_v46 = vpop.f32.mrb[13].mxu1  ;;  %v1548_v47 = vpop.f32.mrb[14].mxu0 }
 0x111   :  { %v1611_v48 = vadd.f32 %v1610_v46, %v1609_v43  ;;  %v1612_v49 = vpop.f32.mrb[14].mxu1  ;;  %v1549_v50 = vpop.f32.mrb[15].mxu0 }
 0x112   :  { %v1550_v51 = vadd.f32 %v1549_v50, %v1548_v47  ;;  %v1613_v52 = vpop.f32.mrb[15].mxu1 }
 0x113   :  { %v2247_v53 = vadd.f32 %v1611_v48, %v1547_v45  ;;  %v1614_v54 = vadd.f32 %v1613_v52, %v1612_v49 }
 0x115   :  { %v2249_v55 = vadd.f32 %v1614_v54, %v1550_v51 }
 0x116   :  { %v1551_v56 = vpop.f32.mrb[16].mxu0 }
 0x117   :  { %v1615_v57 = vpop.f32.mrb[16].mxu1  ;;  %v1552_v58 = vpop.f32.mrb[17].mxu0 }
 0x118   :  { %v1553_v59 = vadd.f32 %v1552_v58, %v1551_v56  ;;  %v1616_v60 = vpop.f32.mrb[17].mxu1  ;;  %v1554_v61 = vpop.f32.mrb[18].mxu0 }
 0x119   :  { %v1617_v62 = vadd.f32 %v1616_v60, %v1615_v57  ;;  %v1618_v63 = vpop.f32.mrb[18].mxu1  ;;  %v1555_v0 = vpop.f32.mrb[19].mxu0 }
 0x11a   :  { %v1556_v1 = vadd.f32 %v1555_v0, %v1554_v61  ;;  %v1619_v2 = vpop.f32.mrb[19].mxu1 }
 0x11b   :  { %v2251_v3 = vadd.f32 %v1617_v62, %v1553_v59  ;;  %v1620_v4 = vadd.f32 %v1619_v2, %v1618_v63 }
 0x11d   :  { %v2253_v5 = vadd.f32 %v1620_v4, %v1556_v1 }
 0x11e   :  { %v1557_v6 = vpop.f32.mrb[20].mxu0 }
 0x11f   :  { %v1621_v7 = vpop.f32.mrb[20].mxu1  ;;  %v1558_v8 = vpop.f32.mrb[21].mxu0 }
 0x120   :  { %v1559_v9 = vadd.f32 %v1558_v8, %v1557_v6  ;;  %v1622_v10 = vpop.f32.mrb[21].mxu1  ;;  %v1560_v12 = vpop.f32.mrb[22].mxu0 }
 0x121   :  { %v1623_v14 = vadd.f32 %v1622_v10, %v1621_v7  ;;  %v1624_v15 = vpop.f32.mrb[22].mxu1  ;;  %v1561_v16 = vpop.f32.mrb[23].mxu0 }
 0x122   :  { %v1562_v17 = vadd.f32 %v1561_v16, %v1560_v12  ;;  %v1625_v18 = vpop.f32.mrb[23].mxu1 }
 0x123   :  { %v2255_v19 = vadd.f32 %v1623_v14, %v1559_v9  ;;  %v1626_v20 = vadd.f32 %v1625_v18, %v1624_v15 }
 0x125   :  { %v2257_v21 = vadd.f32 %v1626_v20, %v1562_v17 }
 0x126   :  { %v1563_v22 = vpop.f32.mrb[24].mxu0 }
 0x127   :  { %v1627_v23 = vpop.f32.mrb[24].mxu1  ;;  %v1564_v24 = vpop.f32.mrb[25].mxu0 }
 0x128   :  { %v1565_v26 = vadd.f32 %v1564_v24, %v1563_v22  ;;  %v1628_v28 = vpop.f32.mrb[25].mxu1  ;;  %v1566_v29 = vpop.f32.mrb[26].mxu0 }
 0x129   :  { %v1629_v30 = vadd.f32 %v1628_v28, %v1627_v23  ;;  %v1630_v31 = vpop.f32.mrb[26].mxu1  ;;  %v1567_v32 = vpop.f32.mrb[27].mxu0 }
 0x12a   :  { %v1568_v33 = vadd.f32 %v1567_v32, %v1566_v29  ;;  %v1631_v34 = vpop.f32.mrb[27].mxu1 }
 0x12b   :  { %v2259_v35 = vadd.f32 %v1629_v30, %v1565_v26  ;;  %v1632_v36 = vadd.f32 %v1631_v34, %v1630_v31 }
 0x12d   :  { %v2261_v37 = vadd.f32 %v1632_v36, %v1568_v33 }
 0x12e   :  { %v1569_v38 = vpop.f32.mrb[28].mxu0 }
 0x12f   :  { %v1633_v40 = vpop.f32.mrb[28].mxu1  ;;  %v1570_v42 = vpop.f32.mrb[29].mxu0 }
 0x130   :  { %v1571_v43 = vadd.f32 %v1570_v42, %v1569_v38  ;;  %v1634_v44 = vpop.f32.mrb[29].mxu1  ;;  %v1572_v45 = vpop.f32.mrb[30].mxu0 }
 0x131   :  { %v1635_v46 = vadd.f32 %v1634_v44, %v1633_v40  ;;  %v1636_v47 = vpop.f32.mrb[30].mxu1  ;;  %v1573_v48 = vpop.f32.mrb[31].mxu0 }
 0x132   :  { %v1574_v49 = vadd.f32 %v1573_v48, %v1572_v45  ;;  %v1637_v50 = vpop.f32.mrb[31].mxu1 }
 0x133   :  { %v2263_v51 = vadd.f32 %v1635_v46, %v1571_v43  ;;  %v1638_v52 = vadd.f32 %v1637_v50, %v1636_v47 }
 0x135   :  { %v2265_v54 = vadd.f32 %v1638_v52, %v1574_v49 }
 0x136   :  { %v1655_v56 = vpop.f32.mrb[32].mxu0 }
 0x137   :  { %v1719_v57 = vpop.f32.mrb[32].mxu1  ;;  %v1656_v58 = vpop.f32.mrb[33].mxu0 }
 0x138   :  { %v1657_v59 = vadd.f32 %v1656_v58, %v1655_v56  ;;  %v1720_v60 = vpop.f32.mrb[33].mxu1  ;;  %v1658_v61 = vpop.f32.mrb[34].mxu0 }
 0x139   :  { %v1721_v62 = vadd.f32 %v1720_v60, %v1719_v57  ;;  %v1722_v63 = vpop.f32.mrb[34].mxu1  ;;  %v1659_v0 = vpop.f32.mrb[35].mxu0 }
 0x13a   :  { %v1139_v1 = vadd.f32 %v1657_v59, %v2235_v11  ;;  %v1660_v2 = vadd.f32 %v1659_v0, %v1658_v61  ;;  %v1723_v4 = vpop.f32.mrb[35].mxu1 }
 0x13b   :  { %v1724_v6 = vadd.f32 %v1723_v4, %v1722_v63 }
 0x13c   :  { %v1236_v7 = vadd.f32 %v1721_v62, %v1139_v1  ;;  %v1142_v8 = vadd.f32 %v1660_v2, %v2237_v13 }
 0x13e   :  { %1359 = vst [vmem:[%s2336_s2] sm:$0xff] %v1236_v7  ;;  %v1239_v9 = vadd.f32 %v1724_v6, %v1142_v8  ;;  %v1661_v10 = vpop.f32.mrb[36].mxu0  ;;  %v1319_v15 = vmul.f32 %v1236_v7, %v1236_v7 }
 0x13f   :  { %v1725_v12 = vpop.f32.mrb[36].mxu1  ;;  %v1662_v14 = vpop.f32.mrb[37].mxu0 }
 0x140   :  { %v1298_v16 = vadd.f32 %v1239_v9, %v1236_v7  ;;  %v1320_v17 = vmul.f32 %v1239_v9, %v1239_v9  ;;  %1360 = vst [vmem:[%s2336_s2 + $0x8] sm:$0xff] %v1239_v9  ;;  %v1663_v11 = vadd.f32 %v1662_v14, %v1661_v10  ;;  %v1726_v18 = vpop.f32.mrb[37].mxu1  ;;  %v1664_v20 = vpop.f32.mrb[38].mxu0 }
 0x141   :  { %v1727_v22 = vadd.f32 %v1726_v18, %v1725_v12  ;;  %v1728_v13 = vpop.f32.mrb[38].mxu1  ;;  %v1665_v23 = vpop.f32.mrb[39].mxu0 }
 0x142   :  { %v1335_v24 = vadd.f32 %v1320_v17, %v1319_v15  ;;  %v1147_v26 = vadd.f32 %v1663_v11, %v2239_v25  ;;  %v1666_v28 = vadd.f32 %v1665_v23, %v1664_v20  ;;  %v1729_v29 = vpop.f32.mrb[39].mxu1 }
 0x143   :  { %v1730_v30 = vadd.f32 %v1729_v29, %v1728_v13 }
 0x144   :  { %v1244_v31 = vadd.f32 %v1727_v22, %v1147_v26  ;;  %v1150_v32 = vadd.f32 %v1666_v28, %v2241_v27 }
 0x146   :  { %v1299_v33 = vadd.f32 %v1298_v16, %v1244_v31  ;;  %v1321_v34 = vmul.f32 %v1244_v31, %v1244_v31  ;;  %1361 = vst [vmem:[%s2336_s2 + $0x10] sm:$0xff] %v1244_v31  ;;  %v1247_v36 = vadd.f32 %v1730_v30, %v1150_v32  ;;  %v1667_v38 = vpop.f32.mrb[40].mxu0 }
 0x147   :  { %v1731_v40 = vpop.f32.mrb[40].mxu1  ;;  %v1668_v42 = vpop.f32.mrb[41].mxu0 }
 0x148   :  { %v1336_v43 = vadd.f32 %v1335_v24, %v1321_v34  ;;  %v1300_v44 = vadd.f32 %v1299_v33, %v1247_v36  ;;  %v1322_v45 = vmul.f32 %v1247_v36, %v1247_v36  ;;  %1362 = vst [vmem:[%s2336_s2 + $0x18] sm:$0xff] %v1247_v36  ;;  %v1669_v25 = vadd.f32 %v1668_v42, %v1667_v38  ;;  %v1732_v46 = vpop.f32.mrb[41].mxu1  ;;  %v1670_v27 = vpop.f32.mrb[42].mxu0 }
 0x149   :  { %v1733_v47 = vadd.f32 %v1732_v46, %v1731_v40  ;;  %v1734_v48 = vpop.f32.mrb[42].mxu1  ;;  %v1671_v49 = vpop.f32.mrb[43].mxu0 }
 0x14a   :  { %v1337_v50 = vadd.f32 %v1336_v43, %v1322_v45  ;;  %v1155_v52 = vadd.f32 %v1669_v25, %v2243_v39  ;;  %v1672_v56 = vadd.f32 %v1671_v49, %v1670_v27  ;;  %v1735_v57 = vpop.f32.mrb[43].mxu1 }
 0x14b   :  { %v1736_v58 = vadd.f32 %v1735_v57, %v1734_v48 }
 0x14c   :  { %v1252_v59 = vadd.f32 %v1733_v47, %v1155_v52  ;;  %v1158_v60 = vadd.f32 %v1672_v56, %v2245_v41 }
 0x14e   :  { %v1301_v61 = vadd.f32 %v1300_v44, %v1252_v59  ;;  %v1323_v62 = vmul.f32 %v1252_v59, %v1252_v59  ;;  %1363 = vst [vmem:[%s2336_s2 + $0x20] sm:$0xff] %v1252_v59  ;;  %v1255_v63 = vadd.f32 %v1736_v58, %v1158_v60  ;;  %v1673_v0 = vpop.f32.mrb[44].mxu0 }
 0x14f   :  { %v1737_v1 = vpop.f32.mrb[44].mxu1  ;;  %v1674_v2 = vpop.f32.mrb[45].mxu0 }
 0x150   :  { %v1338_v4 = vadd.f32 %v1337_v50, %v1323_v62  ;;  %v1302_v6 = vadd.f32 %v1301_v61, %v1255_v63  ;;  %v1324_v7 = vmul.f32 %v1255_v63, %v1255_v63  ;;  %1364 = vst [vmem:[%s2336_s2 + $0x28] sm:$0xff] %v1255_v63  ;;  %v1675_v39 = vadd.f32 %v1674_v2, %v1673_v0  ;;  %v1738_v8 = vpop.f32.mrb[45].mxu1  ;;  %v1676_v41 = vpop.f32.mrb[46].mxu0 }
 0x151   :  { %v1739_v9 = vadd.f32 %v1738_v8, %v1737_v1  ;;  %v1740_v10 = vpop.f32.mrb[46].mxu1  ;;  %v1677_v12 = vpop.f32.mrb[47].mxu0 }
 0x152   :  { %v1339_v14 = vadd.f32 %v1338_v4, %v1324_v7  ;;  %v1163_v15 = vadd.f32 %v1675_v39, %v2247_v53  ;;  %v1678_v16 = vadd.f32 %v1677_v12, %v1676_v41  ;;  %v1741_v17 = vpop.f32.mrb[47].mxu1 }
 0x153   :  { %v1742_v11 = vadd.f32 %v1741_v17, %v1740_v10 }
 0x154   :  { %v1260_v18 = vadd.f32 %v1739_v9, %v1163_v15  ;;  %v1166_v20 = vadd.f32 %v1678_v16, %v2249_v55 }
 0x156   :  { %v1303_v22 = vadd.f32 %v1302_v6, %v1260_v18  ;;  %v1325_v13 = vmul.f32 %v1260_v18, %v1260_v18  ;;  %1365 = vst [vmem:[%s2336_s2 + $0x30] sm:$0xff] %v1260_v18  ;;  %v1263_v23 = vadd.f32 %v1742_v11, %v1166_v20  ;;  %v1679_v24 = vpop.f32.mrb[48].mxu0 }
 0x157   :  { %v1743_v26 = vpop.f32.mrb[48].mxu1  ;;  %v1680_v28 = vpop.f32.mrb[49].mxu0 }
 0x158   :  { %v1340_v29 = vadd.f32 %v1339_v14, %v1325_v13  ;;  %v1304_v30 = vadd.f32 %v1303_v22, %v1263_v23  ;;  %v1326_v31 = vmul.f32 %v1263_v23, %v1263_v23  ;;  %1366 = vst [vmem:[%s2336_s2 + $0x38] sm:$0xff] %v1263_v23  ;;  %v1681_v53 = vadd.f32 %v1680_v28, %v1679_v24  ;;  %v1744_v32 = vpop.f32.mrb[49].mxu1  ;;  %v1682_v55 = vpop.f32.mrb[50].mxu0 }
 0x159   :  { %v1745_v33 = vadd.f32 %v1744_v32, %v1743_v26  ;;  %v1746_v34 = vpop.f32.mrb[50].mxu1  ;;  %v1683_v36 = vpop.f32.mrb[51].mxu0 }
 0x15a   :  { %v1341_v38 = vadd.f32 %v1340_v29, %v1326_v31  ;;  %v1171_v40 = vadd.f32 %v1681_v53, %v2251_v3  ;;  %v1684_v42 = vadd.f32 %v1683_v36, %v1682_v55  ;;  %v1747_v43 = vpop.f32.mrb[51].mxu1 }
 0x15b   :  { %v1748_v44 = vadd.f32 %v1747_v43, %v1746_v34 }
 0x15c   :  { %v1268_v45 = vadd.f32 %v1745_v33, %v1171_v40  ;;  %v1174_v25 = vadd.f32 %v1684_v42, %v2253_v5 }
 0x15e   :  { %v1305_v46 = vadd.f32 %v1304_v30, %v1268_v45  ;;  %v1327_v27 = vmul.f32 %v1268_v45, %v1268_v45  ;;  %1367 = vst [vmem:[%s2336_s2 + $0x40] sm:$0xff] %v1268_v45  ;;  %v1271_v47 = vadd.f32 %v1748_v44, %v1174_v25  ;;  %v1685_v48 = vpop.f32.mrb[52].mxu0 }
 0x15f   :  { %v1749_v49 = vpop.f32.mrb[52].mxu1  ;;  %v1686_v50 = vpop.f32.mrb[53].mxu0 }
 0x160   :  { %v1342_v52 = vadd.f32 %v1341_v38, %v1327_v27  ;;  %v1306_v56 = vadd.f32 %v1305_v46, %v1271_v47  ;;  %v1328_v57 = vmul.f32 %v1271_v47, %v1271_v47  ;;  %1368 = vst [vmem:[%s2336_s2 + $0x48] sm:$0xff] %v1271_v47  ;;  %v1687_v3 = vadd.f32 %v1686_v50, %v1685_v48  ;;  %v1750_v58 = vpop.f32.mrb[53].mxu1  ;;  %v1688_v5 = vpop.f32.mrb[54].mxu0 }
 0x161   :  { %v1751_v59 = vadd.f32 %v1750_v58, %v1749_v49  ;;  %v1752_v60 = vpop.f32.mrb[54].mxu1  ;;  %v1689_v61 = vpop.f32.mrb[55].mxu0 }
 0x162   :  { %v1343_v62 = vadd.f32 %v1342_v52, %v1328_v57  ;;  %v1179_v63 = vadd.f32 %v1687_v3, %v2255_v19  ;;  %v1690_v0 = vadd.f32 %v1689_v61, %v1688_v5  ;;  %v1753_v1 = vpop.f32.mrb[55].mxu1 }
 0x163   :  { %v1754_v2 = vadd.f32 %v1753_v1, %v1752_v60 }
 0x164   :  { %v1276_v4 = vadd.f32 %v1751_v59, %v1179_v63  ;;  %v1182_v6 = vadd.f32 %v1690_v0, %v2257_v21 }
 0x166   :  { %v1307_v7 = vadd.f32 %v1306_v56, %v1276_v4  ;;  %v1329_v39 = vmul.f32 %v1276_v4, %v1276_v4  ;;  %1369 = vst [vmem:[%s2336_s2 + $0x50] sm:$0xff] %v1276_v4  ;;  %v1279_v8 = vadd.f32 %v1754_v2, %v1182_v6  ;;  %v1691_v41 = vpop.f32.mrb[56].mxu0 }
 0x167   :  { %v1755_v9 = vpop.f32.mrb[56].mxu1  ;;  %v1692_v10 = vpop.f32.mrb[57].mxu0 }
 0x168   :  { %v1344_v12 = vadd.f32 %v1343_v62, %v1329_v39  ;;  %v1308_v14 = vadd.f32 %v1307_v7, %v1279_v8  ;;  %v1330_v15 = vmul.f32 %v1279_v8, %v1279_v8  ;;  %1370 = vst [vmem:[%s2336_s2 + $0x58] sm:$0xff] %v1279_v8  ;;  %v1693_v19 = vadd.f32 %v1692_v10, %v1691_v41  ;;  %v1756_v16 = vpop.f32.mrb[57].mxu1  ;;  %v1694_v21 = vpop.f32.mrb[58].mxu0 }
 0x169   :  { %v1757_v17 = vadd.f32 %v1756_v16, %v1755_v9  ;;  %v1758_v11 = vpop.f32.mrb[58].mxu1  ;;  %v1695_v18 = vpop.f32.mrb[59].mxu0 }
 0x16a   :  { %v1345_v20 = vadd.f32 %v1344_v12, %v1330_v15  ;;  %v1187_v22 = vadd.f32 %v1693_v19, %v2259_v35  ;;  %v1696_v13 = vadd.f32 %v1695_v18, %v1694_v21  ;;  %v1759_v23 = vpop.f32.mrb[59].mxu1 }
 0x16b   :  { %v1760_v24 = vadd.f32 %v1759_v23, %v1758_v11 }
 0x16c   :  { %v1284_v26 = vadd.f32 %v1757_v17, %v1187_v22  ;;  %v1190_v28 = vadd.f32 %v1696_v13, %v2261_v37 }
 0x16e   :  { %v1309_v29 = vadd.f32 %v1308_v14, %v1284_v26  ;;  %v1331_v30 = vmul.f32 %v1284_v26, %v1284_v26  ;;  %1371 = vst [vmem:[%s2336_s2 + $0x60] sm:$0xff] %v1284_v26  ;;  %v1287_v31 = vadd.f32 %v1760_v24, %v1190_v28  ;;  %v1697_v53 = vpop.f32.mrb[60].mxu0 }
 0x16f   :  { %v1761_v32 = vpop.f32.mrb[60].mxu1  ;;  %v1698_v55 = vpop.f32.mrb[61].mxu0 }
 0x170   :  { %v1346_v33 = vadd.f32 %v1345_v20, %v1331_v30  ;;  %v1310_v34 = vadd.f32 %v1309_v29, %v1287_v31  ;;  %v1332_v36 = vmul.f32 %v1287_v31, %v1287_v31  ;;  %1372 = vst [vmem:[%s2336_s2 + $0x68] sm:$0xff] %v1287_v31  ;;  %v1699_v35 = vadd.f32 %v1698_v55, %v1697_v53  ;;  %v1762_v38 = vpop.f32.mrb[61].mxu1  ;;  %v1700_v37 = vpop.f32.mrb[62].mxu0 }
 0x171   :  { %v1763_v40 = vadd.f32 %v1762_v38, %v1761_v32  ;;  %v1764_v42 = vpop.f32.mrb[62].mxu1  ;;  %v1701_v43 = vpop.f32.mrb[63].mxu0 }
 0x172   :  { %v1347_v44 = vadd.f32 %v1346_v33, %v1332_v36  ;;  %v1195_v45 = vadd.f32 %v1699_v35, %v2263_v51  ;;  %v1702_v25 = vadd.f32 %v1701_v43, %v1700_v37  ;;  %v1765_v46 = vpop.f32.mrb[63].mxu1 }
 0x173   :  { %v1766_v27 = vadd.f32 %v1765_v46, %v1764_v42 }
 0x174   :  { %v1292_v47 = vadd.f32 %v1763_v40, %v1195_v45  ;;  %v1198_v48 = vadd.f32 %v1702_v25, %v2265_v54 }
 0x176   :  { %v1311_v49 = vadd.f32 %v1310_v34, %v1292_v47  ;;  %v1333_v50 = vmul.f32 %v1292_v47, %v1292_v47  ;;  %1373 = vst [vmem:[%s2336_s2 + $0x70] sm:$0xff] %v1292_v47  ;;  %v1295_v52 = vadd.f32 %v1766_v27, %v1198_v48 }
 0x178   :  { %v1348_v56 = vadd.f32 %v1347_v44, %v1333_v50  ;;  %v1312_v57 = vadd.f32 %v1311_v49, %v1295_v52  ;;  %v1334_v3 = vmul.f32 %v1295_v52, %v1295_v52  ;;  %1374 = vst [vmem:[%s2336_s2 + $0x78] sm:$0xff] %v1295_v52 }
 0x17a   :  { %v1313_v51 = vrot.slane %v1312_v57, 4  ;;  %v1349_v58 = vadd.f32 %v1348_v56, %v1334_v3 }
 0x17c   :  { %v1314_v5 = vadd.f32 %v1313_v51, %v1312_v57  ;;  %v1350_v59 = vrot.slane %v1349_v58, 4 }
 0x17e   :  { %v1315_v60 = vrot.slane %v1314_v5, 2  ;;  %v1351_v54 = vadd.f32 %v1350_v59, %v1349_v58 }
 0x180   :  { %v1316_v61 = vadd.f32 %v1315_v60, %v1314_v5  ;;  %v1352_v62 = vrot.slane %v1351_v54, 2 }
 0x182   :  { %v1317_v63 = vrot.slane %v1316_v61, 1  ;;  %v1353_v0 = vadd.f32 %v1352_v62, %v1351_v54 }
 0x184   :  { %v1354_v1 = vrot.slane %v1353_v0, 1  ;;  %v1318_v2 = vadd.f32 %v1317_v63, %v1316_v61 }
 0x186   :  { %v1355_v4 = vadd.f32 %v1354_v1, %v1353_v0 }
 0x188   :  { %v1357_v6 = vsel %vm1356_vm0, %v1318_v2, %v1355_v4 }
 0x189   :  { %1358 = vst [vmem:[%s2337_s3] sm:$0x3] %v1357_v6 }

// kernel: discriminator_forward.12
= control target key start
LH: loop header
LB: loop body
LE: loop exit
PB: predicated region body
PF: predicated region fallthrough
CT: control target
= control target key end

     0   :  { %v24_v0 = vlaneseq  ;;  %s188_s1 = inlined_call_operand.vmem [shape: f32[1,256], index: 1, kind: input, shape index: {}]   ;;  %s189_s2 = inlined_call_operand.vmem [shape: f32[1,256], index: 2, kind: input, shape index: {}]   ;;  %s190_s0 = inlined_call_operand.vmem [shape: f32[32,256], index: 0, kind: input, shape index: {}]   ;;  %s191_s3 = inlined_call_operand.vmem [shape: bf16[32,256], index: 3, kind: output, shape index: {}]  }
   0x1   :  { %v22_v2 = vld [vmem:[%s188_s1] sm:$0x3]  ;;  %v15_v5 = vld [vmem:[%s190_s0 + $0x8] sm:$0xff]  ;;  %v16_v8 = vld [vmem:[%s190_s0 + $0x10] sm:$0xff] }
   0x2   :  { %v25_v1 = vshrl.u32 %v24_v0, 7  ;;  %v42_v3 = vld [vmem:[%s189_s2] sm:$0x3]  ;;  %v17_v9 = vld [vmem:[%s190_s0 + $0x18] sm:$0xff]  ;;  %v19_v15 = vld [vmem:[%s190_s0 + $0x28] sm:$0xff] }
   0x3   :  { %v14_v4 = vld [vmem:[%s190_s0] sm:$0xff]  ;;  %v20_v16 = vld [vmem:[%s190_s0 + $0x30] sm:$0xff]  ;;  %v21_v17 = vld [vmem:[%s190_s0 + $0x38] sm:$0xff] }
   0x4   :  { %v26_v6 = vsub.s32 0, %v25_v1  ;;  %v30_v7 = vsub.s32 1, %v25_v1  ;;  %v18_v10 = vld [vmem:[%s190_s0 + $0x20] sm:$0xff] }
   0x6   :  { %v27_v11 = vrot.slane %v22_v2, %v26_v6  ;;  %v31_v12 = vrot.slane %v22_v2, %v30_v7  ;;  %v47_v13 = vrot.slane %v42_v3, %v26_v6  ;;  %v51_v14 = vrot.slane %v42_v3, %v30_v7 }
   0x8   :  { %v34_v18 = vmul.f32 %v27_v11, %v14_v4  ;;  %v35_v19 = vmul.f32 %v31_v12, %v15_v5  ;;  %v36_v20 = vmul.f32 %v27_v11, %v16_v8  ;;  %v37_v21 = vmul.f32 %v31_v12, %v17_v9 }
   0x9   :  { %v38_v22 = vmul.f32 %v27_v11, %v18_v10  ;;  %v39_v23 = vmul.f32 %v31_v12, %v19_v15  ;;  %v40_v24 = vmul.f32 %v27_v11, %v20_v16  ;;  %v41_v25 = vmul.f32 %v31_v12, %v21_v17 }
   0xa   :  { %v54_v26 = vadd.f32 %v47_v13, %v34_v18  ;;  %v55_v27 = vadd.f32 %v51_v14, %v35_v19  ;;  %v56_v28 = vadd.f32 %v47_v13, %v36_v20  ;;  %v57_v29 = vadd.f32 %v51_v14, %v37_v21 }
   0xb   :  { %v58_v30 = vadd.f32 %v47_v13, %v38_v22  ;;  %v59_v31 = vadd.f32 %v51_v14, %v39_v23  ;;  %v60_v32 = vadd.f32 %v47_v13, %v40_v24  ;;  %v61_v33 = vadd.f32 %v51_v14, %v41_v25 }
   0xc   :  { %vm62_vm0 = vcmp.ge.f32.partialorder %v54_v26, 0.0  ;;  %vm63_vm1 = vcmp.ge.f32.partialorder %v55_v27, 0.0  ;;  %v70_v34 = vmul.f32 0.2, %v54_v26  ;;  %v71_v35 = vmul.f32 0.2, %v55_v27 }
   0xd   :  { %vm64_vm2 = vcmp.ge.f32.partialorder %v56_v28, 0.0  ;;  %vm65_vm3 = vcmp.ge.f32.partialorder %v57_v29, 0.0  ;;  %v72_v36 = vmul.f32 0.2, %v56_v28  ;;  %v73_v37 = vmul.f32 0.2, %v57_v29 }
   0xe   :  { %v78_v38 = vsel %vm62_vm0, %v54_v26, %v70_v34  ;;  %v79_v39 = vsel %vm63_vm1, %v55_v27, %v71_v35  ;;  %vm66_vm4 = vcmp.ge.f32.partialorder %v58_v30, 0.0  ;;  %vm67_vm5 = vcmp.ge.f32.partialorder %v59_v31, 0.0 }
   0xf   :  { %v122_v40 = vpack.c.bf16 %v79_v39, %v78_v38  ;;  %v80_v41 = vsel %vm64_vm2, %v56_v28, %v72_v36  ;;  %v81_v42 = vsel %vm65_vm3, %v57_v29, %v73_v37  ;;  %v74_v43 = vmul.f32 0.2, %v58_v30 }
  0x10   :  { %v123_v44 = vpack.c.bf16 %v81_v42, %v80_v41  ;;  %v75_v45 = vmul.f32 0.2, %v59_v31  ;;  %vm68_vm6 = vcmp.ge.f32.partialorder %v60_v32, 0.0  ;;  %vm69_vm7 = vcmp.ge.f32.partialorder %v61_v33, 0.0 }
  0x11   :  { %110 = vst [vmem:[%s191_s3] sm:$0xff] %v122_v40  ;;  %v82_v46 = vsel %vm66_vm4, %v58_v30, %v74_v43  ;;  %v76_v47 = vmul.f32 0.2, %v60_v32  ;;  %v77_v48 = vmul.f32 0.2, %v61_v33 }
  0x12   :  { %111 = vst [vmem:[%s191_s3 + $0x8] sm:$0xff] %v123_v44  ;;  %v83_v49 = vsel %vm67_vm5, %v59_v31, %v75_v45 }
  0x13   :  { %v124_v50 = vpack.c.bf16 %v83_v49, %v82_v46  ;;  %v84_v51 = vsel %vm68_vm6, %v60_v32, %v76_v47  ;;  %v85_v52 = vsel %vm69_vm7, %v61_v33, %v77_v48 }
  0x14   :  { %v125_v53 = vpack.c.bf16 %v85_v52, %v84_v51 }
  0x15   :  { %112 = vst [vmem:[%s191_s3 + $0x10] sm:$0xff] %v124_v50 }
  0x16   :  { %113 = vst [vmem:[%s191_s3 + $0x18] sm:$0xff] %v125_v53 }

// kernel: discriminator_forward.11
= control target key start
LH: loop header
LB: loop body
LE: loop exit
PB: predicated region body
PF: predicated region fallthrough
CT: control target
= control target key end

     0   :  { %vm2209_vm0 = vcmask 1040384   ;;  %s3928_s1 = inlined_call_operand.vmem [shape: bf16[2048,256], index: 1, kind: input, shape index: {}]   ;;  %s3929_s0 = inlined_call_operand.vmem [shape: bf16[32,2048], index: 0, kind: input, shape index: {}]   ;;  %s3930_s2 = inlined_call_operand.vmem [shape: f32[32,256], index: 2, kind: output, shape index: {0}]   ;;  %s3931_s3 = inlined_call_operand.vmem [shape: f32[1,2,256], index: 3, kind: output, shape index: {1}]  }
   0x1   :  { %v2585_v0 = vld [vmem:[%s3928_s1 + $0x4] ss:$8 sps:$4 sm:$0xff]   ;;  %v2589_v2 = vld [vmem:[%s3928_s1] ss:$8 sps:$4 sm:$0xff]   ;;  %v2591_v4 = vld [vmem:[%s3928_s1 + $0x14] ss:$8 sps:$4 sm:$0xff]  }
   0x2   :  { %v2587_v1 = vld [vmem:[%s3928_s1 + $0x404] ss:$8 sps:$4 sm:$0xff]   ;;  %1741 = vmatprep.subr.bf16.mxu1 %v2585_v0  ;;  %v2590_v3 = vld [vmem:[%s3928_s1 + $0x400] ss:$8 sps:$4 sm:$0xff]   ;;  %v2593_v5 = vld [vmem:[%s3928_s1 + $0x414] ss:$8 sps:$4 sm:$0xff]  }
   0x3   :  { %1953 = vmatprep.subr.bf16.mxu0 %v2587_v1  ;;  %1742 = vmatpush1.bf16.msra.mxu1 %v2589_v2  ;;  %v2595_v6 = vld [vmem:[%s3928_s1 + $0x10] ss:$8 sps:$4 sm:$0xff]   ;;  %v2597_v8 = vld [vmem:[%s3928_s1 + $0x24] ss:$8 sps:$4 sm:$0xff]   ;;  %v2601_v10 = vld [vmem:[%s3928_s1 + $0x20] ss:$8 sps:$4 sm:$0xff]  }
   0x4   :  { %1954 = vmatpush1.bf16.msra.mxu0 %v2590_v3  ;;  %1743 = vmatprep.subr.bf16.mxu1 %v2591_v4  ;;  %v2596_v7 = vld [vmem:[%s3928_s1 + $0x410] ss:$8 sps:$4 sm:$0xff]   ;;  %v2599_v9 = vld [vmem:[%s3928_s1 + $0x424] ss:$8 sps:$4 sm:$0xff]   ;;  %v2602_v11 = vld [vmem:[%s3928_s1 + $0x420] ss:$8 sps:$4 sm:$0xff]  }
   0x5   :  { %1955 = vmatprep.subr.bf16.mxu0 %v2593_v5  ;;  %v2603_v12 = vld [vmem:[%s3928_s1 + $0x34] ss:$8 sps:$4 sm:$0xff]   ;;  %v2607_v14 = vld [vmem:[%s3928_s1 + $0x30] ss:$8 sps:$4 sm:$0xff]   ;;  %v2609_v16 = vld [vmem:[%s3928_s1 + $0x44] ss:$8 sps:$4 sm:$0xff]  }
   0x6   :  { %v2605_v13 = vld [vmem:[%s3928_s1 + $0x434] ss:$8 sps:$4 sm:$0xff]   ;;  %v2608_v15 = vld [vmem:[%s3928_s1 + $0x430] ss:$8 sps:$4 sm:$0xff]   ;;  %v2611_v17 = vld [vmem:[%s3928_s1 + $0x444] ss:$8 sps:$4 sm:$0xff]  }
   0x7   :  { %1744 = vmatpush1.bf16.msra.mxu1 %v2595_v6  ;;  %v2613_v18 = vld [vmem:[%s3928_s1 + $0x40] ss:$8 sps:$4 sm:$0xff]   ;;  %v2615_v20 = vld [vmem:[%s3928_s1 + $0x54] ss:$8 sps:$4 sm:$0xff]   ;;  %v2619_v22 = vld [vmem:[%s3928_s1 + $0x50] ss:$8 sps:$4 sm:$0xff]  }
   0x8   :  { %1956 = vmatpush1.bf16.msra.mxu0 %v2596_v7  ;;  %1745 = vmatprep.subr.bf16.mxu1 %v2597_v8  ;;  %v2614_v19 = vld [vmem:[%s3928_s1 + $0x440] ss:$8 sps:$4 sm:$0xff]   ;;  %v2617_v21 = vld [vmem:[%s3928_s1 + $0x454] ss:$8 sps:$4 sm:$0xff]   ;;  %v2620_v23 = vld [vmem:[%s3928_s1 + $0x450] ss:$8 sps:$4 sm:$0xff]  }
   0x9   :  { %1957 = vmatprep.subr.bf16.mxu0 %v2599_v9  ;;  %v2621_v24 = vld [vmem:[%s3928_s1 + $0x64] ss:$8 sps:$4 sm:$0xff]   ;;  %v2625_v26 = vld [vmem:[%s3928_s1 + $0x60] ss:$8 sps:$4 sm:$0xff]   ;;  %v2627_v28 = vld [vmem:[%s3928_s1 + $0x74] ss:$8 sps:$4 sm:$0xff]  }
   0xa   :  { %v2623_v25 = vld [vmem:[%s3928_s1 + $0x464] ss:$8 sps:$4 sm:$0xff]   ;;  %v2626_v27 = vld [vmem:[%s3928_s1 + $0x460] ss:$8 sps:$4 sm:$0xff]   ;;  %v2629_v29 = vld [vmem:[%s3928_s1 + $0x474] ss:$8 sps:$4 sm:$0xff]  }
   0xb   :  { %1746 = vmatpush1.bf16.msra.mxu1 %v2601_v10  ;;  %v2631_v30 = vld [vmem:[%s3928_s1 + $0x70] ss:$8 sps:$4 sm:$0xff]   ;;  %v2633_v32 = vld [vmem:[%s3928_s1 + $0x84] ss:$8 sps:$4 sm:$0xff]   ;;  %v2637_v34 = vld [vmem:[%s3928_s1 + $0x80] ss:$8 sps:$4 sm:$0xff]  }
   0xc   :  { %1958 = vmatpush1.bf16.msra.mxu0 %v2602_v11  ;;  %1747 = vmatprep.subr.bf16.mxu1 %v2603_v12  ;;  %v2632_v31 = vld [vmem:[%s3928_s1 + $0x470] ss:$8 sps:$4 sm:$0xff]   ;;  %v2635_v33 = vld [vmem:[%s3928_s1 + $0x484] ss:$8 sps:$4 sm:$0xff]   ;;  %v2638_v35 = vld [vmem:[%s3928_s1 + $0x480] ss:$8 sps:$4 sm:$0xff]  }
   0xd   :  { %1959 = vmatprep.subr.bf16.mxu0 %v2605_v13  ;;  %v2639_v36 = vld [vmem:[%s3928_s1 + $0x94] ss:$8 sps:$4 sm:$0xff]   ;;  %v2643_v38 = vld [vmem:[%s3928_s1 + $0x90] ss:$8 sps:$4 sm:$0xff]   ;;  %v2645_v40 = vld [vmem:[%s3928_s1 + $0xa4] ss:$8 sps:$4 sm:$0xff]  }
   0xe   :  { %v2641_v37 = vld [vmem:[%s3928_s1 + $0x494] ss:$8 sps:$4 sm:$0xff]   ;;  %v2644_v39 = vld [vmem:[%s3928_s1 + $0x490] ss:$8 sps:$4 sm:$0xff]   ;;  %v2647_v41 = vld [vmem:[%s3928_s1 + $0x4a4] ss:$8 sps:$4 sm:$0xff]  }
   0xf   :  { %1748 = vmatpush1.bf16.msra.mxu1 %v2607_v14  ;;  %v2649_v42 = vld [vmem:[%s3928_s1 + $0xa0] ss:$8 sps:$4 sm:$0xff]   ;;  %v2651_v44 = vld [vmem:[%s3928_s1 + $0xb4] ss:$8 sps:$4 sm:$0xff]   ;;  %v2655_v46 = vld [vmem:[%s3928_s1 + $0xb0] ss:$8 sps:$4 sm:$0xff]  }
  0x10   :  { %1960 = vmatpush1.bf16.msra.mxu0 %v2608_v15  ;;  %1749 = vmatprep.subr.bf16.mxu1 %v2609_v16  ;;  %v2650_v43 = vld [vmem:[%s3928_s1 + $0x4a0] ss:$8 sps:$4 sm:$0xff]   ;;  %v2653_v45 = vld [vmem:[%s3928_s1 + $0x4b4] ss:$8 sps:$4 sm:$0xff]   ;;  %v2656_v47 = vld [vmem:[%s3928_s1 + $0x4b0] ss:$8 sps:$4 sm:$0xff]  }
  0x11   :  { %1961 = vmatprep.subr.bf16.mxu0 %v2611_v17  ;;  %v13_v48 = vld [vmem:[%s3929_s0] sm:$0xff]  ;;  %v2663_v58 = vld [vmem:[%s3928_s1 + $0xd4] ss:$8 sps:$4 sm:$0xff]   ;;  %v2667_v60 = vld [vmem:[%s3928_s1 + $0xd0] ss:$8 sps:$4 sm:$0xff]  }
  0x12   :  { %v21_v49 = vld [vmem:[%s3929_s0 + $0x40] sm:$0xff]  ;;  %v2665_v59 = vld [vmem:[%s3928_s1 + $0x4d4] ss:$8 sps:$4 sm:$0xff]   ;;  %v2668_v61 = vld [vmem:[%s3928_s1 + $0x4d0] ss:$8 sps:$4 sm:$0xff]  }
  0x13   :  { %1750 = vmatpush1.bf16.msra.mxu1 %v2613_v18  ;;  %v2657_v50 = vld [vmem:[%s3928_s1 + $0xc4] ss:$8 sps:$4 sm:$0xff]   ;;  %v2241_v52 = vcombine.high %v13_v48, %v21_v49  ;;  %v2661_v56 = vld [vmem:[%s3928_s1 + $0xc0] ss:$8 sps:$4 sm:$0xff]   ;;  %v2675_v2 = vld [vmem:[%s3928_s1 + $0xf4] ss:$8 sps:$4 sm:$0xff]   ;;  %v2240_v8 = vcombine.low %v13_v48, %v21_v49 }
  0x14   :  { %1962 = vmatpush1.bf16.msra.mxu0 %v2614_v19  ;;  %1751 = vmatprep.subr.bf16.mxu1 %v2615_v20  ;;  %v2659_v51 = vld [vmem:[%s3928_s1 + $0x4c4] ss:$8 sps:$4 sm:$0xff]   ;;  %v2662_v57 = vld [vmem:[%s3928_s1 + $0x4c0] ss:$8 sps:$4 sm:$0xff]   ;;  %v2677_v3 = vld [vmem:[%s3928_s1 + $0x4f4] ss:$8 sps:$4 sm:$0xff]  }
  0x15   :  { %1963 = vmatprep.subr.bf16.mxu0 %v2617_v21  ;;  %v17_v53 = vld [vmem:[%s3929_s0 + $0x20] sm:$0xff]  ;;  %1773 = vmatprep.mubr.bf16.mxu1 %v2241_v52  ;;  %v2679_v4 = vld [vmem:[%s3928_s1 + $0xf0] ss:$8 sps:$4 sm:$0xff]   ;;  %v2689_v12 = vld [vmem:[%s3928_s1 + $0x114] ss:$8 sps:$4 sm:$0xff]  }
  0x16   :  { %v25_v54 = vld [vmem:[%s3929_s0 + $0x60] sm:$0xff]  ;;  %v2680_v5 = vld [vmem:[%s3928_s1 + $0x4f0] ss:$8 sps:$4 sm:$0xff]   ;;  %v2692_v13 = vld [vmem:[%s3928_s1 + $0x514] ss:$8 sps:$4 sm:$0xff]  }
  0x17   :  { %1752 = vmatpush1.bf16.msra.mxu1 %v2619_v22  ;;  %v2249_v55 = vcombine.high %v17_v53, %v25_v54  ;;  %v2669_v62 = vld [vmem:[%s3928_s1 + $0xe4] ss:$8 sps:$4 sm:$0xff]   ;;  %v2673_v0 = vld [vmem:[%s3928_s1 + $0xe0] ss:$8 sps:$4 sm:$0xff]   ;;  %v2248_v10 = vcombine.low %v17_v53, %v25_v54  ;;  %v2687_v14 = vld [vmem:[%s3928_s1 + $0x110] ss:$8 sps:$4 sm:$0xff]  }
  0x18   :  { %1964 = vmatpush1.bf16.msra.mxu0 %v2620_v23  ;;  %1753 = vmatprep.subr.bf16.mxu1 %v2621_v24  ;;  %v2671_v63 = vld [vmem:[%s3928_s1 + $0x4e4] ss:$8 sps:$4 sm:$0xff]   ;;  %v2674_v1 = vld [vmem:[%s3928_s1 + $0x4e0] ss:$8 sps:$4 sm:$0xff]   ;;  %v2690_v15 = vld [vmem:[%s3928_s1 + $0x510] ss:$8 sps:$4 sm:$0xff]  }
  0x19   :  { %1965 = vmatprep.subr.bf16.mxu0 %v2623_v25  ;;  %1985 = vmatprep.mubr.bf16.mxu0 %v2249_v55  ;;  %v2683_v6 = vld [vmem:[%s3928_s1 + $0x104] ss:$8 sps:$4 sm:$0xff]   ;;  %v2681_v9 = vld [vmem:[%s3928_s1 + $0x100] ss:$8 sps:$4 sm:$0xff]   ;;  %v2701_v20 = vld [vmem:[%s3928_s1 + $0x134] ss:$8 sps:$4 sm:$0xff]  }
  0x1a   :  { %v2686_v7 = vld [vmem:[%s3928_s1 + $0x504] ss:$8 sps:$4 sm:$0xff]   ;;  %v2684_v11 = vld [vmem:[%s3928_s1 + $0x500] ss:$8 sps:$4 sm:$0xff]   ;;  %v2704_v21 = vld [vmem:[%s3928_s1 + $0x534] ss:$8 sps:$4 sm:$0xff]  }
  0x1b   :  { %1754 = vmatpush1.bf16.msra.mxu1 %v2625_v26  ;;  %v2695_v16 = vld [vmem:[%s3928_s1 + $0x124] ss:$8 sps:$4 sm:$0xff]   ;;  %v2693_v18 = vld [vmem:[%s3928_s1 + $0x120] ss:$8 sps:$4 sm:$0xff]   ;;  %v2699_v22 = vld [vmem:[%s3928_s1 + $0x130] ss:$8 sps:$4 sm:$0xff]  }
  0x1c   :  { %1966 = vmatpush1.bf16.msra.mxu0 %v2626_v27  ;;  %1755 = vmatprep.subr.bf16.mxu1 %v2627_v28  ;;  %v2698_v17 = vld [vmem:[%s3928_s1 + $0x524] ss:$8 sps:$4 sm:$0xff]   ;;  %v2696_v19 = vld [vmem:[%s3928_s1 + $0x520] ss:$8 sps:$4 sm:$0xff]   ;;  %v2702_v23 = vld [vmem:[%s3928_s1 + $0x530] ss:$8 sps:$4 sm:$0xff]  }
  0x1d   :  { %1967 = vmatprep.subr.bf16.mxu0 %v2629_v29  ;;  %v2707_v24 = vld [vmem:[%s3928_s1 + $0x144] ss:$8 sps:$4 sm:$0xff]   ;;  %v2705_v26 = vld [vmem:[%s3928_s1 + $0x140] ss:$8 sps:$4 sm:$0xff]   ;;  %v2713_v28 = vld [vmem:[%s3928_s1 + $0x154] ss:$8 sps:$4 sm:$0xff]  }
  0x1e   :  { %v2710_v25 = vld [vmem:[%s3928_s1 + $0x544] ss:$8 sps:$4 sm:$0xff]   ;;  %v2708_v27 = vld [vmem:[%s3928_s1 + $0x540] ss:$8 sps:$4 sm:$0xff]   ;;  %v2716_v29 = vld [vmem:[%s3928_s1 + $0x554] ss:$8 sps:$4 sm:$0xff]  }
  0x1f   :  { %1756 = vmatpush1.bf16.msra.mxu1 %v2631_v30  ;;  %v29_v30 = vld [vmem:[%s3929_s0 + $0x80] sm:$0xff]  ;;  %v3310_v49 = vld [vmem:[%s3929_s0 + $0x28] sm:$0xff]  ;;  %v2726_v52 = vld [vmem:[%s3928_s1 + $0x570] ss:$8 sps:$4 sm:$0xff]  }
  0x20   :  { %1968 = vmatpush1.bf16.msra.mxu0 %v2632_v31  ;;  %1757 = vmatprep.subr.bf16.mxu1 %v2633_v32  ;;  %v37_v31 = vld [vmem:[%s3929_s0 + $0xc0] sm:$0xff]  ;;  %v2711_v32 = vld [vmem:[%s3928_s1 + $0x150] ss:$8 sps:$4 sm:$0xff]  }
  0x21   :  { %1969 = vmatprep.subr.bf16.mxu0 %v2635_v33  ;;  %v2257_v33 = vcombine.high %v29_v30, %v37_v31  ;;  %v2731_v54 = vld [vmem:[%s3928_s1 + $0x184] ss:$8 sps:$4 sm:$0xff]  }
  0x22   :  { %v2734_v55 = vld [vmem:[%s3928_s1 + $0x584] ss:$8 sps:$4 sm:$0xff]  }
  0x23   :  { %1758 = vmatpush1.bf16.msra.mxu1 %v2637_v34  ;;  %v2714_v34 = vld [vmem:[%s3928_s1 + $0x550] ss:$8 sps:$4 sm:$0xff]  }
  0x24   :  { %1970 = vmatpush1.bf16.msra.mxu0 %v2638_v35  ;;  %1759 = vmatprep.subr.bf16.mxu1 %v2639_v36  ;;  %v33_v35 = vld [vmem:[%s3929_s0 + $0xa0] sm:$0xff] }
  0x25   :  { %1971 = vmatprep.subr.bf16.mxu0 %v2641_v37  ;;  %v41_v36 = vld [vmem:[%s3929_s0 + $0xe0] sm:$0xff]  ;;  %v2256_v37 = vcombine.low %v29_v30, %v37_v31  ;;  %v2785_v30 = vld [vmem:[%s3928_s1 + $0x214] ss:$8 sps:$4 sm:$0xff]  }
  0x26   :  { %v2788_v31 = vld [vmem:[%s3928_s1 + $0x614] ss:$8 sps:$4 sm:$0xff]  }
  0x27   :  { %1760 = vmatpush1.bf16.msra.mxu1 %v2643_v38  ;;  %v2719_v38 = vld [vmem:[%s3928_s1 + $0x164] ss:$8 sps:$4 sm:$0xff]  }
  0x28   :  { %1972 = vmatpush1.bf16.msra.mxu0 %v2644_v39  ;;  %1761 = vmatprep.subr.bf16.mxu1 %v2645_v40  ;;  %v2265_v39 = vcombine.high %v33_v35, %v41_v36  ;;  %v2264_v40 = vcombine.low %v33_v35, %v41_v36  ;;  %v2783_v36 = vld [vmem:[%s3928_s1 + $0x210] ss:$8 sps:$4 sm:$0xff]  }
  0x29   :  { %1973 = vmatprep.subr.bf16.mxu0 %v2647_v41  ;;  %v2722_v41 = vld [vmem:[%s3928_s1 + $0x564] ss:$8 sps:$4 sm:$0xff]  }
  0x2b   :  { %1762 = vmatpush1.bf16.msra.mxu1 %v2649_v42  ;;  %v2717_v42 = vld [vmem:[%s3928_s1 + $0x160] ss:$8 sps:$4 sm:$0xff]  }
  0x2c   :  { %1974 = vmatpush1.bf16.msra.mxu0 %v2650_v43  ;;  %1763 = vmatprep.subr.bf16.mxu1 %v2651_v44  ;;  %v2720_v43 = vld [vmem:[%s3928_s1 + $0x560] ss:$8 sps:$4 sm:$0xff]  }
  0x2d   :  { %1975 = vmatprep.subr.bf16.mxu0 %v2653_v45  ;;  %v3292_v44 = vld [vmem:[%s3929_s0 + $0x8] sm:$0xff] }
  0x2e   :  { %v3297_v45 = vld [vmem:[%s3929_s0 + $0x48] sm:$0xff] }
  0x2f   :  { %1764 = vmatpush1.bf16.msra.mxu1 %v2655_v46  ;;  %v2725_v46 = vld [vmem:[%s3928_s1 + $0x174] ss:$8 sps:$4 sm:$0xff]   ;;  %v2243_v48 = vcombine.high %v3292_v44, %v3297_v45 }
  0x30   :  { %1976 = vmatpush1.bf16.msra.mxu0 %v2656_v47  ;;  %1765 = vmatprep.subr.bf16.mxu1 %v2657_v50  ;;  %v2728_v47 = vld [vmem:[%s3928_s1 + $0x574] ss:$8 sps:$4 sm:$0xff]   ;;  %v3315_v50 = vld [vmem:[%s3929_s0 + $0x68] sm:$0xff] }
  0x31   :  { %1977 = vmatprep.subr.bf16.mxu0 %v2659_v51  ;;  %v2723_v51 = vld [vmem:[%s3928_s1 + $0x170] ss:$8 sps:$4 sm:$0xff]   ;;  %v2251_v53 = vcombine.high %v3310_v49, %v3315_v50 }
  0x33   :  { %1766 = vmatpush1.bf16.msra.mxu1 %v2661_v56  ;;  %v2729_v56 = vld [vmem:[%s3928_s1 + $0x180] ss:$8 sps:$4 sm:$0xff]  }
  0x34   :  { %1978 = vmatpush1.bf16.msra.mxu0 %v2662_v57  ;;  %1767 = vmatprep.subr.bf16.mxu1 %v2663_v58  ;;  %v2732_v57 = vld [vmem:[%s3928_s1 + $0x580] ss:$8 sps:$4 sm:$0xff]   ;;  %v2737_v58 = vld [vmem:[%s3928_s1 + $0x194] ss:$8 sps:$4 sm:$0xff]  }
  0x35   :  { %1979 = vmatprep.subr.bf16.mxu0 %v2665_v59  ;;  %v2740_v59 = vld [vmem:[%s3928_s1 + $0x594] ss:$8 sps:$4 sm:$0xff]  }
  0x37   :  { %1768 = vmatpush1.bf16.msra.mxu1 %v2667_v60  ;;  %v2735_v60 = vld [vmem:[%s3928_s1 + $0x190] ss:$8 sps:$4 sm:$0xff]  }
  0x38   :  { %1980 = vmatpush1.bf16.msra.mxu0 %v2668_v61  ;;  %1769 = vmatprep.subr.bf16.mxu1 %v2669_v62  ;;  %v2738_v61 = vld [vmem:[%s3928_s1 + $0x590] ss:$8 sps:$4 sm:$0xff]   ;;  %v2743_v62 = vld [vmem:[%s3928_s1 + $0x1a4] ss:$8 sps:$4 sm:$0xff]  }
  0x39   :  { %1981 = vmatprep.subr.bf16.mxu0 %v2671_v63  ;;  %v2746_v63 = vld [vmem:[%s3928_s1 + $0x5a4] ss:$8 sps:$4 sm:$0xff]  }
  0x3b   :  { %1770 = vmatpush1.bf16.msra.mxu1 %v2673_v0  ;;  %v2741_v0 = vld [vmem:[%s3928_s1 + $0x1a0] ss:$8 sps:$4 sm:$0xff]  }
  0x3c   :  { %1982 = vmatpush1.bf16.msra.mxu0 %v2674_v1  ;;  %1771 = vmatprep.subr.bf16.mxu1 %v2675_v2  ;;  %v2744_v1 = vld [vmem:[%s3928_s1 + $0x5a0] ss:$8 sps:$4 sm:$0xff]   ;;  %v2749_v2 = vld [vmem:[%s3928_s1 + $0x1b4] ss:$8 sps:$4 sm:$0xff]  }
  0x3d   :  { %1983 = vmatprep.subr.bf16.mxu0 %v2677_v3  ;;  %v2752_v3 = vld [vmem:[%s3928_s1 + $0x5b4] ss:$8 sps:$4 sm:$0xff]  }
  0x3f   :  { %1772 = vmatpush1.bf16.msra.mxu1 %v2679_v4  ;;  %v2747_v4 = vld [vmem:[%s3928_s1 + $0x1b0] ss:$8 sps:$4 sm:$0xff]  }
  0x40   :  { %1984 = vmatpush1.bf16.msra.mxu0 %v2680_v5  ;;  %1794 = vmatprep.subr.bf16.mxu1 %v2683_v6  ;;  %v2750_v5 = vld [vmem:[%s3928_s1 + $0x5b0] ss:$8 sps:$4 sm:$0xff]   ;;  %v2755_v6 = vld [vmem:[%s3928_s1 + $0x1c4] ss:$8 sps:$4 sm:$0xff]  }
  0x41   :  { %2006 = vmatprep.subr.bf16.mxu0 %v2686_v7  ;;  %v2758_v7 = vld [vmem:[%s3928_s1 + $0x5c4] ss:$8 sps:$4 sm:$0xff]  }
  0x42   :  { %1774 = vmatmul.mubr.bf16.vlgmr.msra.gmra.mrb[0].mxu1 %v2240_v8  ;;  %v2753_v8 = vld [vmem:[%s3928_s1 + $0x1c0] ss:$8 sps:$4 sm:$0xff]  }
  0x43   :  { %1986 = vmatmul.mubr.bf16.vlgmr.msra.gmra.mrb[0].mxu0 %v2248_v10  ;;  %1795 = vmatpush1.bf16.msra.mxu1 %v2681_v9  ;;  %v2756_v9 = vld [vmem:[%s3928_s1 + $0x5c0] ss:$8 sps:$4 sm:$0xff]   ;;  %v2761_v10 = vld [vmem:[%s3928_s1 + $0x1d4] ss:$8 sps:$4 sm:$0xff]  }
  0x44   :  { %2007 = vmatpush1.bf16.msra.mxu0 %v2684_v11  ;;  %1796 = vmatprep.subr.bf16.mxu1 %v2689_v12  ;;  %v2764_v11 = vld [vmem:[%s3928_s1 + $0x5d4] ss:$8 sps:$4 sm:$0xff]   ;;  %v2759_v12 = vld [vmem:[%s3928_s1 + $0x1d0] ss:$8 sps:$4 sm:$0xff]  }
  0x45   :  { %2008 = vmatprep.subr.bf16.mxu0 %v2692_v13  ;;  %1783 = vmatprep.mubr.bf16.mxu1 %v2257_v33  ;;  %v2762_v13 = vld [vmem:[%s3928_s1 + $0x5d0] ss:$8 sps:$4 sm:$0xff]   ;;  %v42_v33 = vld [vmem:[%s3929_s0 + $0xe8] sm:$0xff] }
  0x46   :  { %1995 = vmatprep.mubr.bf16.mxu0 %v2265_v39  ;;  %v2794_v39 = vld [vmem:[%s3928_s1 + $0x624] ss:$8 sps:$4 sm:$0xff]  }
  0x47   :  { %1797 = vmatpush1.bf16.msra.mxu1 %v2687_v14  ;;  %v2767_v14 = vld [vmem:[%s3928_s1 + $0x1e4] ss:$8 sps:$4 sm:$0xff]  }
  0x48   :  { %2009 = vmatpush1.bf16.msra.mxu0 %v2690_v15  ;;  %1798 = vmatprep.subr.bf16.mxu1 %v2695_v16  ;;  %v2770_v15 = vld [vmem:[%s3928_s1 + $0x5e4] ss:$8 sps:$4 sm:$0xff]   ;;  %v2765_v16 = vld [vmem:[%s3928_s1 + $0x1e0] ss:$8 sps:$4 sm:$0xff]  }
  0x49   :  { %2010 = vmatprep.subr.bf16.mxu0 %v2698_v17  ;;  %v2768_v17 = vld [vmem:[%s3928_s1 + $0x5e0] ss:$8 sps:$4 sm:$0xff]  }
  0x4a   :  { %1784 = vmatmul.mubr.bf16.gmra.mrb[4].mxu1 %v2256_v37  ;;  %v2786_v37 = vld [vmem:[%s3928_s1 + $0x610] ss:$8 sps:$4 sm:$0xff]  }
  0x4b   :  { %1799 = vmatpush1.bf16.msra.mxu1 %v2693_v18  ;;  %1996 = vmatmul.mubr.bf16.gmra.mrb[4].mxu0 %v2264_v40  ;;  %v2773_v18 = vld [vmem:[%s3928_s1 + $0x1f4] ss:$8 sps:$4 sm:$0xff]   ;;  %v2789_v40 = vld [vmem:[%s3928_s1 + $0x220] ss:$8 sps:$4 sm:$0xff]  }
  0x4c   :  { %2011 = vmatpush1.bf16.msra.mxu0 %v2696_v19  ;;  %1800 = vmatprep.subr.bf16.mxu1 %v2701_v20  ;;  %v2776_v19 = vld [vmem:[%s3928_s1 + $0x5f4] ss:$8 sps:$4 sm:$0xff]   ;;  %v2771_v20 = vld [vmem:[%s3928_s1 + $0x1f0] ss:$8 sps:$4 sm:$0xff]  }
  0x4d   :  { %2012 = vmatprep.subr.bf16.mxu0 %v2704_v21  ;;  %1826 = vmatprep.mubr.bf16.mxu1 %v2243_v48  ;;  %v2774_v21 = vld [vmem:[%s3928_s1 + $0x5f0] ss:$8 sps:$4 sm:$0xff]   ;;  %v2797_v48 = vld [vmem:[%s3928_s1 + $0x234] ss:$8 sps:$4 sm:$0xff]  }
  0x4e   :  { %2038 = vmatprep.mubr.bf16.mxu0 %v2251_v53  ;;  %v2798_v53 = vld [vmem:[%s3928_s1 + $0x630] ss:$8 sps:$4 sm:$0xff]  }
  0x4f   :  { %1801 = vmatpush1.bf16.msra.mxu1 %v2699_v22  ;;  %v2779_v22 = vld [vmem:[%s3928_s1 + $0x204] ss:$8 sps:$4 sm:$0xff]  }
  0x50   :  { %2013 = vmatpush1.bf16.msra.mxu0 %v2702_v23  ;;  %1802 = vmatprep.subr.bf16.mxu1 %v2707_v24  ;;  %v2782_v23 = vld [vmem:[%s3928_s1 + $0x604] ss:$8 sps:$4 sm:$0xff]   ;;  %v2777_v24 = vld [vmem:[%s3928_s1 + $0x200] ss:$8 sps:$4 sm:$0xff]  }
  0x51   :  { %2014 = vmatprep.subr.bf16.mxu0 %v2710_v25  ;;  %v2780_v25 = vld [vmem:[%s3928_s1 + $0x600] ss:$8 sps:$4 sm:$0xff]  }
  0x53   :  { %1803 = vmatpush1.bf16.msra.mxu1 %v2705_v26  ;;  %v30_v26 = vld [vmem:[%s3929_s0 + $0x88] sm:$0xff] }
  0x54   :  { %2015 = vmatpush1.bf16.msra.mxu0 %v2708_v27  ;;  %1804 = vmatprep.subr.bf16.mxu1 %v2713_v28  ;;  %v2242_v27 = vcombine.low %v3292_v44, %v3297_v45  ;;  %v2250_v28 = vcombine.low %v3310_v49, %v3315_v50  ;;  %v3481_v45 = vld [vmem:[%s3929_s0 + $0x50] sm:$0xff] }
  0x55   :  { %2016 = vmatprep.subr.bf16.mxu0 %v2716_v29  ;;  %v38_v29 = vld [vmem:[%s3929_s0 + $0xc8] sm:$0xff]  ;;  %v2800_v49 = vld [vmem:[%s3928_s1 + $0x634] ss:$8 sps:$4 sm:$0xff]  }
  0x57   :  { %1805 = vmatpush1.bf16.msra.mxu1 %v2711_v32  ;;  %v34_v32 = vld [vmem:[%s3929_s0 + $0xa8] sm:$0xff] }
  0x58   :  { %2017 = vmatpush1.bf16.msra.mxu0 %v2714_v34  ;;  %1806 = vmatprep.subr.bf16.mxu1 %v2719_v38  ;;  %v2259_v34 = vcombine.high %v30_v26, %v38_v29  ;;  %v2267_v35 = vcombine.high %v34_v32, %v42_v33  ;;  %v2791_v38 = vld [vmem:[%s3928_s1 + $0x224] ss:$8 sps:$4 sm:$0xff]   ;;  %v2266_v44 = vcombine.low %v34_v32, %v42_v33  ;;  %v2861_v32 = vld [vmem:[%s3928_s1 + $0x2e0] ss:$8 sps:$4 sm:$0xff]  }
  0x59   :  { %2018 = vmatprep.subr.bf16.mxu0 %v2722_v41  ;;  %v2792_v41 = vld [vmem:[%s3928_s1 + $0x620] ss:$8 sps:$4 sm:$0xff]  }
  0x5a   :  { %v2864_v33 = vld [vmem:[%s3928_s1 + $0x6e0] ss:$8 sps:$4 sm:$0xff]  }
  0x5b   :  { %1807 = vmatpush1.bf16.msra.mxu1 %v2717_v42  ;;  %v3476_v42 = vld [vmem:[%s3929_s0 + $0x10] sm:$0xff] }
  0x5c   :  { %2019 = vmatpush1.bf16.msra.mxu0 %v2720_v43  ;;  %1808 = vmatprep.subr.bf16.mxu1 %v2725_v46  ;;  %v2258_v43 = vcombine.low %v30_v26, %v38_v29  ;;  %v3486_v46 = vld [vmem:[%s3929_s0 + $0x30] sm:$0xff]  ;;  %v2245_v50 = vcombine.high %v3476_v42, %v3481_v45 }
  0x5d   :  { %2020 = vmatprep.subr.bf16.mxu0 %v2728_v47  ;;  %v3491_v47 = vld [vmem:[%s3929_s0 + $0x70] sm:$0xff] }
  0x5e   :  { %v2857_v26 = vld [vmem:[%s3928_s1 + $0x2d4] ss:$8 sps:$4 sm:$0xff]   ;;  %v2858_v29 = vld [vmem:[%s3928_s1 + $0x6d0] ss:$8 sps:$4 sm:$0xff]  }
  0x5f   :  { %1809 = vmatpush1.bf16.msra.mxu1 %v2723_v51  ;;  %v2253_v51 = vcombine.high %v3486_v46, %v3491_v47 }
  0x60   :  { %2021 = vmatpush1.bf16.msra.mxu0 %v2726_v52  ;;  %1810 = vmatprep.subr.bf16.mxu1 %v2731_v54  ;;  %v2795_v52 = vld [vmem:[%s3928_s1 + $0x230] ss:$8 sps:$4 sm:$0xff]   ;;  %v2803_v54 = vld [vmem:[%s3928_s1 + $0x244] ss:$8 sps:$4 sm:$0xff]  }
  0x61   :  { %2022 = vmatprep.subr.bf16.mxu0 %v2734_v55  ;;  %v2806_v55 = vld [vmem:[%s3928_s1 + $0x644] ss:$8 sps:$4 sm:$0xff]  }
  0x63   :  { %1811 = vmatpush1.bf16.msra.mxu1 %v2729_v56  ;;  %v2801_v56 = vld [vmem:[%s3928_s1 + $0x240] ss:$8 sps:$4 sm:$0xff]  }
  0x64   :  { %2023 = vmatpush1.bf16.msra.mxu0 %v2732_v57  ;;  %1812 = vmatprep.subr.bf16.mxu1 %v2737_v58  ;;  %v2804_v57 = vld [vmem:[%s3928_s1 + $0x640] ss:$8 sps:$4 sm:$0xff]   ;;  %v2809_v58 = vld [vmem:[%s3928_s1 + $0x254] ss:$8 sps:$4 sm:$0xff]  }
  0x65   :  { %2024 = vmatprep.subr.bf16.mxu0 %v2740_v59  ;;  %v2812_v59 = vld [vmem:[%s3928_s1 + $0x654] ss:$8 sps:$4 sm:$0xff]  }
  0x67   :  { %1813 = vmatpush1.bf16.msra.mxu1 %v2735_v60  ;;  %v2807_v60 = vld [vmem:[%s3928_s1 + $0x250] ss:$8 sps:$4 sm:$0xff]  }
  0x68   :  { %2025 = vmatpush1.bf16.msra.mxu0 %v2738_v61  ;;  %1814 = vmatprep.subr.bf16.mxu1 %v2743_v62  ;;  %v2810_v61 = vld [vmem:[%s3928_s1 + $0x650] ss:$8 sps:$4 sm:$0xff]   ;;  %v2815_v62 = vld [vmem:[%s3928_s1 + $0x264] ss:$8 sps:$4 sm:$0xff]  }
  0x69   :  { %2026 = vmatprep.subr.bf16.mxu0 %v2746_v63  ;;  %v2818_v63 = vld [vmem:[%s3928_s1 + $0x664] ss:$8 sps:$4 sm:$0xff]  }
  0x6b   :  { %1815 = vmatpush1.bf16.msra.mxu1 %v2741_v0  ;;  %v2813_v0 = vld [vmem:[%s3928_s1 + $0x260] ss:$8 sps:$4 sm:$0xff]  }
  0x6c   :  { %2027 = vmatpush1.bf16.msra.mxu0 %v2744_v1  ;;  %1816 = vmatprep.subr.bf16.mxu1 %v2749_v2  ;;  %v2816_v1 = vld [vmem:[%s3928_s1 + $0x660] ss:$8 sps:$4 sm:$0xff]   ;;  %v2821_v2 = vld [vmem:[%s3928_s1 + $0x274] ss:$8 sps:$4 sm:$0xff]  }
  0x6d   :  { %2028 = vmatprep.subr.bf16.mxu0 %v2752_v3  ;;  %v2824_v3 = vld [vmem:[%s3928_s1 + $0x674] ss:$8 sps:$4 sm:$0xff]  }
  0x6f   :  { %1817 = vmatpush1.bf16.msra.mxu1 %v2747_v4  ;;  %v2819_v4 = vld [vmem:[%s3928_s1 + $0x270] ss:$8 sps:$4 sm:$0xff]  }
  0x70   :  { %2029 = vmatpush1.bf16.msra.mxu0 %v2750_v5  ;;  %1818 = vmatprep.subr.bf16.mxu1 %v2755_v6  ;;  %v2822_v5 = vld [vmem:[%s3928_s1 + $0x670] ss:$8 sps:$4 sm:$0xff]   ;;  %v2827_v6 = vld [vmem:[%s3928_s1 + $0x284] ss:$8 sps:$4 sm:$0xff]  }
  0x71   :  { %2030 = vmatprep.subr.bf16.mxu0 %v2758_v7  ;;  %v2830_v7 = vld [vmem:[%s3928_s1 + $0x684] ss:$8 sps:$4 sm:$0xff]  }
  0x73   :  { %1819 = vmatpush1.bf16.msra.mxu1 %v2753_v8  ;;  %v2825_v8 = vld [vmem:[%s3928_s1 + $0x280] ss:$8 sps:$4 sm:$0xff]  }
  0x74   :  { %2031 = vmatpush1.bf16.msra.mxu0 %v2756_v9  ;;  %1820 = vmatprep.subr.bf16.mxu1 %v2761_v10  ;;  %v2828_v9 = vld [vmem:[%s3928_s1 + $0x680] ss:$8 sps:$4 sm:$0xff]   ;;  %v2833_v10 = vld [vmem:[%s3928_s1 + $0x294] ss:$8 sps:$4 sm:$0xff]  }
  0x75   :  { %2032 = vmatprep.subr.bf16.mxu0 %v2764_v11  ;;  %v2836_v11 = vld [vmem:[%s3928_s1 + $0x694] ss:$8 sps:$4 sm:$0xff]  }
  0x77   :  { %1821 = vmatpush1.bf16.msra.mxu1 %v2759_v12  ;;  %v2831_v12 = vld [vmem:[%s3928_s1 + $0x290] ss:$8 sps:$4 sm:$0xff]  }
  0x78   :  { %2033 = vmatpush1.bf16.msra.mxu0 %v2762_v13  ;;  %1822 = vmatprep.subr.bf16.mxu1 %v2767_v14  ;;  %v2834_v13 = vld [vmem:[%s3928_s1 + $0x690] ss:$8 sps:$4 sm:$0xff]   ;;  %v2839_v14 = vld [vmem:[%s3928_s1 + $0x2a4] ss:$8 sps:$4 sm:$0xff]  }
  0x79   :  { %2034 = vmatprep.subr.bf16.mxu0 %v2770_v15  ;;  %v2842_v15 = vld [vmem:[%s3928_s1 + $0x6a4] ss:$8 sps:$4 sm:$0xff]  }
  0x7b   :  { %1823 = vmatpush1.bf16.msra.mxu1 %v2765_v16  ;;  %v2837_v16 = vld [vmem:[%s3928_s1 + $0x2a0] ss:$8 sps:$4 sm:$0xff]  }
  0x7c   :  { %2035 = vmatpush1.bf16.msra.mxu0 %v2768_v17  ;;  %1824 = vmatprep.subr.bf16.mxu1 %v2773_v18  ;;  %v2840_v17 = vld [vmem:[%s3928_s1 + $0x6a0] ss:$8 sps:$4 sm:$0xff]   ;;  %v2845_v18 = vld [vmem:[%s3928_s1 + $0x2b4] ss:$8 sps:$4 sm:$0xff]  }
  0x7d   :  { %2036 = vmatprep.subr.bf16.mxu0 %v2776_v19  ;;  %v2848_v19 = vld [vmem:[%s3928_s1 + $0x6b4] ss:$8 sps:$4 sm:$0xff]  }
  0x7f   :  { %1825 = vmatpush1.bf16.msra.mxu1 %v2771_v20  ;;  %v2843_v20 = vld [vmem:[%s3928_s1 + $0x2b0] ss:$8 sps:$4 sm:$0xff]  }
  0x80   :  { %2037 = vmatpush1.bf16.msra.mxu0 %v2774_v21  ;;  %1847 = vmatprep.subr.bf16.mxu1 %v2779_v22  ;;  %v2846_v21 = vld [vmem:[%s3928_s1 + $0x6b0] ss:$8 sps:$4 sm:$0xff]   ;;  %v2851_v22 = vld [vmem:[%s3928_s1 + $0x2c4] ss:$8 sps:$4 sm:$0xff]  }
  0x81   :  { %2059 = vmatprep.subr.bf16.mxu0 %v2782_v23  ;;  %v2854_v23 = vld [vmem:[%s3928_s1 + $0x6c4] ss:$8 sps:$4 sm:$0xff]  }
  0x82   :  { %1827 = vmatmul.mubr.bf16.vlgmr.msra.gmra.mrb[0].mxu1 %v2242_v27  ;;  %v2860_v27 = vld [vmem:[%s3928_s1 + $0x6d4] ss:$8 sps:$4 sm:$0xff]  }
  0x83   :  { %2039 = vmatmul.mubr.bf16.vlgmr.msra.gmra.mrb[0].mxu0 %v2250_v28  ;;  %1848 = vmatpush1.bf16.msra.mxu1 %v2777_v24  ;;  %v2849_v24 = vld [vmem:[%s3928_s1 + $0x2c0] ss:$8 sps:$4 sm:$0xff]   ;;  %v2855_v28 = vld [vmem:[%s3928_s1 + $0x2d0] ss:$8 sps:$4 sm:$0xff]  }
  0x84   :  { %2060 = vmatpush1.bf16.msra.mxu0 %v2780_v25  ;;  %1849 = vmatprep.subr.bf16.mxu1 %v2785_v30  ;;  %v2852_v25 = vld [vmem:[%s3928_s1 + $0x6c0] ss:$8 sps:$4 sm:$0xff]   ;;  %v2863_v30 = vld [vmem:[%s3928_s1 + $0x2e4] ss:$8 sps:$4 sm:$0xff]  }
  0x85   :  { %2061 = vmatprep.subr.bf16.mxu0 %v2788_v31  ;;  %1836 = vmatprep.mubr.bf16.mxu1 %v2259_v34  ;;  %v2866_v31 = vld [vmem:[%s3928_s1 + $0x6e4] ss:$8 sps:$4 sm:$0xff]   ;;  %v2869_v34 = vld [vmem:[%s3928_s1 + $0x2f4] ss:$8 sps:$4 sm:$0xff]  }
  0x86   :  { %2048 = vmatprep.mubr.bf16.mxu0 %v2267_v35  ;;  %v2872_v35 = vld [vmem:[%s3928_s1 + $0x6f4] ss:$8 sps:$4 sm:$0xff]  }
  0x87   :  { %1850 = vmatpush1.bf16.msra.mxu1 %v2783_v36  ;;  %v2867_v36 = vld [vmem:[%s3928_s1 + $0x2f0] ss:$8 sps:$4 sm:$0xff]  }
  0x88   :  { %2062 = vmatpush1.bf16.msra.mxu0 %v2786_v37  ;;  %1851 = vmatprep.subr.bf16.mxu1 %v2791_v38  ;;  %v2870_v37 = vld [vmem:[%s3928_s1 + $0x6f0] ss:$8 sps:$4 sm:$0xff]   ;;  %v2875_v38 = vld [vmem:[%s3928_s1 + $0x304] ss:$8 sps:$4 sm:$0xff]  }
  0x89   :  { %2063 = vmatprep.subr.bf16.mxu0 %v2794_v39  ;;  %v2878_v39 = vld [vmem:[%s3928_s1 + $0x704] ss:$8 sps:$4 sm:$0xff]  }
  0x8a   :  { %1837 = vmatmul.mubr.bf16.gmra.mrb[4].mxu1 %v2258_v43  ;;  %v2252_v43 = vcombine.low %v3486_v46, %v3491_v47  ;;  %v2881_v46 = vld [vmem:[%s3928_s1 + $0x314] ss:$8 sps:$4 sm:$0xff]  }
  0x8b   :  { %2049 = vmatmul.mubr.bf16.gmra.mrb[4].mxu0 %v2266_v44  ;;  %1852 = vmatpush1.bf16.msra.mxu1 %v2789_v40  ;;  %v31_v40 = vld [vmem:[%s3929_s0 + $0x90] sm:$0xff] }
  0x8c   :  { %2064 = vmatpush1.bf16.msra.mxu0 %v2792_v41  ;;  %1853 = vmatprep.subr.bf16.mxu1 %v2797_v48  ;;  %v2244_v41 = vcombine.low %v3476_v42, %v3481_v45  ;;  %v39_v44 = vld [vmem:[%s3929_s0 + $0xd0] sm:$0xff]  ;;  %v2873_v42 = vld [vmem:[%s3928_s1 + $0x300] ss:$8 sps:$4 sm:$0xff]  }
  0x8d   :  { %2065 = vmatprep.subr.bf16.mxu0 %v2800_v49  ;;  %1879 = vmatprep.mubr.bf16.mxu1 %v2245_v50  ;;  %v35_v48 = vld [vmem:[%s3929_s0 + $0xb0] sm:$0xff]  ;;  %v2876_v45 = vld [vmem:[%s3928_s1 + $0x700] ss:$8 sps:$4 sm:$0xff]   ;;  %v2261_v50 = vcombine.high %v31_v40, %v39_v44 }
  0x8e   :  { %2091 = vmatprep.mubr.bf16.mxu0 %v2253_v51  ;;  %v43_v49 = vld [vmem:[%s3929_s0 + $0xf0] sm:$0xff] }
  0x8f   :  { %1854 = vmatpush1.bf16.msra.mxu1 %v2795_v52  ;;  %v2884_v47 = vld [vmem:[%s3928_s1 + $0x714] ss:$8 sps:$4 sm:$0xff]   ;;  %v2269_v51 = vcombine.high %v35_v48, %v43_v49  ;;  %v2879_v52 = vld [vmem:[%s3928_s1 + $0x310] ss:$8 sps:$4 sm:$0xff]  }
  0x90   :  { %2066 = vmatpush1.bf16.msra.mxu0 %v2798_v53  ;;  %1855 = vmatprep.subr.bf16.mxu1 %v2803_v54  ;;  %v2882_v53 = vld [vmem:[%s3928_s1 + $0x710] ss:$8 sps:$4 sm:$0xff]   ;;  %v2887_v54 = vld [vmem:[%s3928_s1 + $0x324] ss:$8 sps:$4 sm:$0xff]  }
  0x91   :  { %2067 = vmatprep.subr.bf16.mxu0 %v2806_v55  ;;  %v2890_v55 = vld [vmem:[%s3928_s1 + $0x724] ss:$8 sps:$4 sm:$0xff]  }
  0x93   :  { %1856 = vmatpush1.bf16.msra.mxu1 %v2801_v56  ;;  %v3702_v56 = vld [vmem:[%s3929_s0 + $0x18] sm:$0xff] }
  0x94   :  { %2068 = vmatpush1.bf16.msra.mxu0 %v2804_v57  ;;  %1857 = vmatprep.subr.bf16.mxu1 %v2809_v58  ;;  %v2260_v57 = vcombine.low %v31_v40, %v39_v44  ;;  %v2268_v58 = vcombine.low %v35_v48, %v43_v49  ;;  %v2945_v40 = vld [vmem:[%s3928_s1 + $0x3c0] ss:$8 sps:$4 sm:$0xff]   ;;  %v2956_v44 = vld [vmem:[%s3928_s1 + $0x7d4] ss:$8 sps:$4 sm:$0xff]   ;;  %v2951_v48 = vld [vmem:[%s3928_s1 + $0x3d0] ss:$8 sps:$4 sm:$0xff]  }
  0x95   :  { %2069 = vmatprep.subr.bf16.mxu0 %v2812_v59  ;;  %v3707_v59 = vld [vmem:[%s3929_s0 + $0x58] sm:$0xff] }
  0x96   :  { %v2954_v49 = vld [vmem:[%s3928_s1 + $0x7d0] ss:$8 sps:$4 sm:$0xff]  }
  0x97   :  { %1858 = vmatpush1.bf16.msra.mxu1 %v2807_v60  ;;  %v3712_v60 = vld [vmem:[%s3929_s0 + $0x38] sm:$0xff] }
  0x98   :  { %2070 = vmatpush1.bf16.msra.mxu0 %v2810_v61  ;;  %1859 = vmatprep.subr.bf16.mxu1 %v2815_v62  ;;  %v3717_v61 = vld [vmem:[%s3929_s0 + $0x78] sm:$0xff]  ;;  %v2885_v62 = vld [vmem:[%s3928_s1 + $0x320] ss:$8 sps:$4 sm:$0xff]  }
  0x99   :  { %2071 = vmatprep.subr.bf16.mxu0 %v2818_v63  ;;  %v2888_v63 = vld [vmem:[%s3928_s1 + $0x720] ss:$8 sps:$4 sm:$0xff]  }
  0x9b   :  { %1860 = vmatpush1.bf16.msra.mxu1 %v2813_v0  ;;  %v2893_v0 = vld [vmem:[%s3928_s1 + $0x334] ss:$8 sps:$4 sm:$0xff]  }
  0x9c   :  { %2072 = vmatpush1.bf16.msra.mxu0 %v2816_v1  ;;  %1861 = vmatprep.subr.bf16.mxu1 %v2821_v2  ;;  %v2896_v1 = vld [vmem:[%s3928_s1 + $0x734] ss:$8 sps:$4 sm:$0xff]   ;;  %v2247_v2 = vcombine.high %v3702_v56, %v3707_v59 }
  0x9d   :  { %2073 = vmatprep.subr.bf16.mxu0 %v2824_v3  ;;  %v2255_v3 = vcombine.high %v3712_v60, %v3717_v61 }
  0x9f   :  { %1862 = vmatpush1.bf16.msra.mxu1 %v2819_v4  ;;  %v2891_v4 = vld [vmem:[%s3928_s1 + $0x330] ss:$8 sps:$4 sm:$0xff]  }
  0xa0   :  { %2074 = vmatpush1.bf16.msra.mxu0 %v2822_v5  ;;  %1863 = vmatprep.subr.bf16.mxu1 %v2827_v6  ;;  %v2894_v5 = vld [vmem:[%s3928_s1 + $0x730] ss:$8 sps:$4 sm:$0xff]   ;;  %v2899_v6 = vld [vmem:[%s3928_s1 + $0x344] ss:$8 sps:$4 sm:$0xff]  }
  0xa1   :  { %2075 = vmatprep.subr.bf16.mxu0 %v2830_v7  ;;  %v2902_v7 = vld [vmem:[%s3928_s1 + $0x744] ss:$8 sps:$4 sm:$0xff]  }
  0xa3   :  { %1864 = vmatpush1.bf16.msra.mxu1 %v2825_v8  ;;  %v2897_v8 = vld [vmem:[%s3928_s1 + $0x340] ss:$8 sps:$4 sm:$0xff]  }
  0xa4   :  { %2076 = vmatpush1.bf16.msra.mxu0 %v2828_v9  ;;  %1865 = vmatprep.subr.bf16.mxu1 %v2833_v10  ;;  %v2900_v9 = vld [vmem:[%s3928_s1 + $0x740] ss:$8 sps:$4 sm:$0xff]   ;;  %v2905_v10 = vld [vmem:[%s3928_s1 + $0x354] ss:$8 sps:$4 sm:$0xff]  }
  0xa5   :  { %2077 = vmatprep.subr.bf16.mxu0 %v2836_v11  ;;  %v2908_v11 = vld [vmem:[%s3928_s1 + $0x754] ss:$8 sps:$4 sm:$0xff]  }
  0xa7   :  { %1866 = vmatpush1.bf16.msra.mxu1 %v2831_v12  ;;  %v2903_v12 = vld [vmem:[%s3928_s1 + $0x350] ss:$8 sps:$4 sm:$0xff]  }
  0xa8   :  { %2078 = vmatpush1.bf16.msra.mxu0 %v2834_v13  ;;  %1867 = vmatprep.subr.bf16.mxu1 %v2839_v14  ;;  %v2906_v13 = vld [vmem:[%s3928_s1 + $0x750] ss:$8 sps:$4 sm:$0xff]   ;;  %v2911_v14 = vld [vmem:[%s3928_s1 + $0x364] ss:$8 sps:$4 sm:$0xff]  }
  0xa9   :  { %2079 = vmatprep.subr.bf16.mxu0 %v2842_v15  ;;  %v2914_v15 = vld [vmem:[%s3928_s1 + $0x764] ss:$8 sps:$4 sm:$0xff]  }
  0xab   :  { %1868 = vmatpush1.bf16.msra.mxu1 %v2837_v16  ;;  %v2909_v16 = vld [vmem:[%s3928_s1 + $0x360] ss:$8 sps:$4 sm:$0xff]  }
  0xac   :  { %2080 = vmatpush1.bf16.msra.mxu0 %v2840_v17  ;;  %1869 = vmatprep.subr.bf16.mxu1 %v2845_v18  ;;  %v2912_v17 = vld [vmem:[%s3928_s1 + $0x760] ss:$8 sps:$4 sm:$0xff]   ;;  %v2917_v18 = vld [vmem:[%s3928_s1 + $0x374] ss:$8 sps:$4 sm:$0xff]  }
  0xad   :  { %2081 = vmatprep.subr.bf16.mxu0 %v2848_v19  ;;  %v2920_v19 = vld [vmem:[%s3928_s1 + $0x774] ss:$8 sps:$4 sm:$0xff]  }
  0xaf   :  { %1870 = vmatpush1.bf16.msra.mxu1 %v2843_v20  ;;  %v2915_v20 = vld [vmem:[%s3928_s1 + $0x370] ss:$8 sps:$4 sm:$0xff]  }
  0xb0   :  { %2082 = vmatpush1.bf16.msra.mxu0 %v2846_v21  ;;  %1871 = vmatprep.subr.bf16.mxu1 %v2851_v22  ;;  %v2918_v21 = vld [vmem:[%s3928_s1 + $0x770] ss:$8 sps:$4 sm:$0xff]   ;;  %v2923_v22 = vld [vmem:[%s3928_s1 + $0x384] ss:$8 sps:$4 sm:$0xff]  }
  0xb1   :  { %2083 = vmatprep.subr.bf16.mxu0 %v2854_v23  ;;  %v2926_v23 = vld [vmem:[%s3928_s1 + $0x784] ss:$8 sps:$4 sm:$0xff]  }
  0xb3   :  { %1872 = vmatpush1.bf16.msra.mxu1 %v2849_v24  ;;  %v2921_v24 = vld [vmem:[%s3928_s1 + $0x380] ss:$8 sps:$4 sm:$0xff]  }
  0xb4   :  { %2084 = vmatpush1.bf16.msra.mxu0 %v2852_v25  ;;  %1873 = vmatprep.subr.bf16.mxu1 %v2857_v26  ;;  %v2924_v25 = vld [vmem:[%s3928_s1 + $0x780] ss:$8 sps:$4 sm:$0xff]   ;;  %v2929_v26 = vld [vmem:[%s3928_s1 + $0x394] ss:$8 sps:$4 sm:$0xff]  }
  0xb5   :  { %2085 = vmatprep.subr.bf16.mxu0 %v2860_v27  ;;  %v2932_v27 = vld [vmem:[%s3928_s1 + $0x794] ss:$8 sps:$4 sm:$0xff]  }
  0xb7   :  { %1874 = vmatpush1.bf16.msra.mxu1 %v2855_v28  ;;  %v2927_v28 = vld [vmem:[%s3928_s1 + $0x390] ss:$8 sps:$4 sm:$0xff]  }
  0xb8   :  { %2086 = vmatpush1.bf16.msra.mxu0 %v2858_v29  ;;  %1875 = vmatprep.subr.bf16.mxu1 %v2863_v30  ;;  %v2930_v29 = vld [vmem:[%s3928_s1 + $0x790] ss:$8 sps:$4 sm:$0xff]   ;;  %v2935_v30 = vld [vmem:[%s3928_s1 + $0x3a4] ss:$8 sps:$4 sm:$0xff]  }
  0xb9   :  { %2087 = vmatprep.subr.bf16.mxu0 %v2866_v31  ;;  %v2938_v31 = vld [vmem:[%s3928_s1 + $0x7a4] ss:$8 sps:$4 sm:$0xff]  }
  0xbb   :  { %1876 = vmatpush1.bf16.msra.mxu1 %v2861_v32  ;;  %v2933_v32 = vld [vmem:[%s3928_s1 + $0x3a0] ss:$8 sps:$4 sm:$0xff]  }
  0xbc   :  { %2088 = vmatpush1.bf16.msra.mxu0 %v2864_v33  ;;  %1877 = vmatprep.subr.bf16.mxu1 %v2869_v34  ;;  %v2936_v33 = vld [vmem:[%s3928_s1 + $0x7a0] ss:$8 sps:$4 sm:$0xff]   ;;  %v2941_v34 = vld [vmem:[%s3928_s1 + $0x3b4] ss:$8 sps:$4 sm:$0xff]  }
  0xbd   :  { %2089 = vmatprep.subr.bf16.mxu0 %v2872_v35  ;;  %v2944_v35 = vld [vmem:[%s3928_s1 + $0x7b4] ss:$8 sps:$4 sm:$0xff]  }
  0xbf   :  { %1878 = vmatpush1.bf16.msra.mxu1 %v2867_v36  ;;  %v2939_v36 = vld [vmem:[%s3928_s1 + $0x3b0] ss:$8 sps:$4 sm:$0xff]  }
  0xc0   :  { %2090 = vmatpush1.bf16.msra.mxu0 %v2870_v37  ;;  %1900 = vmatprep.subr.bf16.mxu1 %v2875_v38  ;;  %v2942_v37 = vld [vmem:[%s3928_s1 + $0x7b0] ss:$8 sps:$4 sm:$0xff]   ;;  %v2947_v38 = vld [vmem:[%s3928_s1 + $0x3c4] ss:$8 sps:$4 sm:$0xff]  }
  0xc1   :  { %2112 = vmatprep.subr.bf16.mxu0 %v2878_v39  ;;  %v2950_v39 = vld [vmem:[%s3928_s1 + $0x7c4] ss:$8 sps:$4 sm:$0xff]  }
  0xc2   :  { %1880 = vmatmul.mubr.bf16.vlgmr.msra.gmra.mrb[0].mxu1 %v2244_v41  ;;  %v2948_v41 = vld [vmem:[%s3928_s1 + $0x7c0] ss:$8 sps:$4 sm:$0xff]  }
  0xc3   :  { %2092 = vmatmul.mubr.bf16.vlgmr.msra.gmra.mrb[0].mxu0 %v2252_v43  ;;  %1901 = vmatpush1.bf16.msra.mxu1 %v2873_v42  ;;  %v2953_v43 = vld [vmem:[%s3928_s1 + $0x3d4] ss:$8 sps:$4 sm:$0xff]   ;;  %v2959_v42 = vld [vmem:[%s3928_s1 + $0x3e4] ss:$8 sps:$4 sm:$0xff]  }
  0xc4   :  { %2113 = vmatpush1.bf16.msra.mxu0 %v2876_v45  ;;  %1902 = vmatprep.subr.bf16.mxu1 %v2881_v46  ;;  %v2962_v45 = vld [vmem:[%s3928_s1 + $0x7e4] ss:$8 sps:$4 sm:$0xff]   ;;  %v2957_v46 = vld [vmem:[%s3928_s1 + $0x3e0] ss:$8 sps:$4 sm:$0xff]  }
  0xc5   :  { %2114 = vmatprep.subr.bf16.mxu0 %v2884_v47  ;;  %1889 = vmatprep.mubr.bf16.mxu1 %v2261_v50  ;;  %v2960_v47 = vld [vmem:[%s3928_s1 + $0x7e0] ss:$8 sps:$4 sm:$0xff]   ;;  %v2965_v50 = vld [vmem:[%s3928_s1 + $0x3f4] ss:$8 sps:$4 sm:$0xff]  }
  0xc6   :  { %2101 = vmatprep.mubr.bf16.mxu0 %v2269_v51  ;;  %v2968_v51 = vld [vmem:[%s3928_s1 + $0x7f4] ss:$8 sps:$4 sm:$0xff]  }
  0xc7   :  { %1903 = vmatpush1.bf16.msra.mxu1 %v2879_v52  ;;  %v2963_v52 = vld [vmem:[%s3928_s1 + $0x3f0] ss:$8 sps:$4 sm:$0xff]  }
  0xc8   :  { %2115 = vmatpush1.bf16.msra.mxu0 %v2882_v53  ;;  %1904 = vmatprep.subr.bf16.mxu1 %v2887_v54  ;;  %v2966_v53 = vld [vmem:[%s3928_s1 + $0x7f0] ss:$8 sps:$4 sm:$0xff]  }
  0xc9   :  { %2116 = vmatprep.subr.bf16.mxu0 %v2890_v55  ;;  %v32_v54 = vld [vmem:[%s3929_s0 + $0x98] sm:$0xff] }
  0xca   :  { %1890 = vmatmul.mubr.bf16.gmra.mrb[4].mxu1 %v2260_v57  ;;  %v40_v55 = vld [vmem:[%s3929_s0 + $0xd8] sm:$0xff] }
  0xcb   :  { %2102 = vmatmul.mubr.bf16.gmra.mrb[4].mxu0 %v2268_v58  ;;  %1905 = vmatpush1.bf16.msra.mxu1 %v2885_v62  ;;  %v36_v57 = vld [vmem:[%s3929_s0 + $0xb8] sm:$0xff]  ;;  %v2246_v62 = vcombine.low %v3702_v56, %v3707_v59 }
  0xcc   :  { %2117 = vmatpush1.bf16.msra.mxu0 %v2888_v63  ;;  %1906 = vmatprep.subr.bf16.mxu1 %v2893_v0  ;;  %v44_v58 = vld [vmem:[%s3929_s0 + $0xf8] sm:$0xff]  ;;  %v2254_v63 = vcombine.low %v3712_v60, %v3717_v61  ;;  %v2263_v0 = vcombine.high %v32_v54, %v40_v55 }
  0xcd   :  { %2118 = vmatprep.subr.bf16.mxu0 %v2896_v1  ;;  %1932 = vmatprep.mubr.bf16.mxu1 %v2247_v2  ;;  %v2271_v1 = vcombine.high %v36_v57, %v44_v58  ;;  %v2262_v2 = vcombine.low %v32_v54, %v40_v55 }
  0xce   :  { %2144 = vmatprep.mubr.bf16.mxu0 %v2255_v3  ;;  %v2270_v3 = vcombine.low %v36_v57, %v44_v58 }
  0xcf   :  { %1907 = vmatpush1.bf16.msra.mxu1 %v2891_v4 }
  0xd0   :  { %2119 = vmatpush1.bf16.msra.mxu0 %v2894_v5  ;;  %1908 = vmatprep.subr.bf16.mxu1 %v2899_v6 }
  0xd1   :  { %2120 = vmatprep.subr.bf16.mxu0 %v2902_v7 }
  0xd3   :  { %1909 = vmatpush1.bf16.msra.mxu1 %v2897_v8 }
  0xd4   :  { %2121 = vmatpush1.bf16.msra.mxu0 %v2900_v9  ;;  %1910 = vmatprep.subr.bf16.mxu1 %v2905_v10 }
  0xd5   :  { %2122 = vmatprep.subr.bf16.mxu0 %v2908_v11 }
  0xd7   :  { %1911 = vmatpush1.bf16.msra.mxu1 %v2903_v12 }
  0xd8   :  { %2123 = vmatpush1.bf16.msra.mxu0 %v2906_v13  ;;  %1912 = vmatprep.subr.bf16.mxu1 %v2911_v14 }
  0xd9   :  { %2124 = vmatprep.subr.bf16.mxu0 %v2914_v15 }
  0xdb   :  { %1913 = vmatpush1.bf16.msra.mxu1 %v2909_v16 }
  0xdc   :  { %2125 = vmatpush1.bf16.msra.mxu0 %v2912_v17  ;;  %1914 = vmatprep.subr.bf16.mxu1 %v2917_v18 }
  0xdd   :  { %2126 = vmatprep.subr.bf16.mxu0 %v2920_v19 }
  0xdf   :  { %1915 = vmatpush1.bf16.msra.mxu1 %v2915_v20 }
  0xe0   :  { %2127 = vmatpush1.bf16.msra.mxu0 %v2918_v21  ;;  %1916 = vmatprep.subr.bf16.mxu1 %v2923_v22 }
  0xe1   :  { %2128 = vmatprep.subr.bf16.mxu0 %v2926_v23 }
  0xe3   :  { %1917 = vmatpush1.bf16.msra.mxu1 %v2921_v24 }
  0xe4   :  { %2129 = vmatpush1.bf16.msra.mxu0 %v2924_v25  ;;  %1918 = vmatprep.subr.bf16.mxu1 %v2929_v26 }
  0xe5   :  { %2130 = vmatprep.subr.bf16.mxu0 %v2932_v27 }
  0xe7   :  { %1919 = vmatpush1.bf16.msra.mxu1 %v2927_v28 }
  0xe8   :  { %2131 = vmatpush1.bf16.msra.mxu0 %v2930_v29  ;;  %1920 = vmatprep.subr.bf16.mxu1 %v2935_v30 }
  0xe9   :  { %2132 = vmatprep.subr.bf16.mxu0 %v2938_v31 }
  0xeb   :  { %1921 = vmatpush1.bf16.msra.mxu1 %v2933_v32 }
  0xec   :  { %2133 = vmatpush1.bf16.msra.mxu0 %v2936_v33  ;;  %1922 = vmatprep.subr.bf16.mxu1 %v2941_v34 }
  0xed   :  { %2134 = vmatprep.subr.bf16.mxu0 %v2944_v35 }
  0xef   :  { %1923 = vmatpush1.bf16.msra.mxu1 %v2939_v36 }
  0xf0   :  { %2135 = vmatpush1.bf16.msra.mxu0 %v2942_v37  ;;  %1924 = vmatprep.subr.bf16.mxu1 %v2947_v38 }
  0xf1   :  { %2136 = vmatprep.subr.bf16.mxu0 %v2950_v39 }
  0xf3   :  { %1925 = vmatpush1.bf16.msra.mxu1 %v2945_v40 }
  0xf4   :  { %2137 = vmatpush1.bf16.msra.mxu0 %v2948_v41  ;;  %1926 = vmatprep.subr.bf16.mxu1 %v2953_v43 }
  0xf5   :  { %2138 = vmatprep.subr.bf16.mxu0 %v2956_v44 }
  0xf7   :  { %1927 = vmatpush1.bf16.msra.mxu1 %v2951_v48 }
  0xf8   :  { %2139 = vmatpush1.bf16.msra.mxu0 %v2954_v49  ;;  %1928 = vmatprep.subr.bf16.mxu1 %v2959_v42 }
  0xf9   :  { %2140 = vmatprep.subr.bf16.mxu0 %v2962_v45 }
  0xfb   :  { %1929 = vmatpush1.bf16.msra.mxu1 %v2957_v46 }
  0xfc   :  { %2141 = vmatpush1.bf16.msra.mxu0 %v2960_v47  ;;  %1930 = vmatprep.subr.bf16.mxu1 %v2965_v50 }
  0xfd   :  { %2142 = vmatprep.subr.bf16.mxu0 %v2968_v51 }
  0xff   :  { %1931 = vmatpush1.bf16.msra.mxu1 %v2963_v52 }
 0x100   :  { %2143 = vmatpush1.bf16.msra.mxu0 %v2966_v53 }
 0x102   :  { %1933 = vmatmul.mubr.bf16.vlgmr.msra.gmra.mrb[0].mxu1 %v2246_v62 }
 0x103   :  { %2145 = vmatmul.mubr.bf16.vlgmr.msra.gmra.mrb[0].mxu0 %v2254_v63  ;;  %1942 = vmatprep.mubr.bf16.mxu1 %v2263_v0 }
 0x104   :  { %2154 = vmatprep.mubr.bf16.mxu0 %v2271_v1 }
 0x10a   :  { %1943 = vmatmul.mubr.bf16.gmra.mrb[4].mxu1 %v2262_v2 }
 0x10b   :  { %2155 = vmatmul.mubr.bf16.gmra.mrb[4].mxu0 %v2270_v3 }
 0x1d5   :  { %v1934_v4 = vpop.f32.mrb[0].mxu1 }
 0x1d6   :  { %v2146_v5 = vpop.f32.mrb[0].mxu0  ;;  %v1936_v7 = vpop.f32.mrb[1].mxu1 }
 0x1d7   :  { %v2529_v6 = vadd.f32 %v2146_v5, %v1934_v4  ;;  %v2148_v56 = vpop.f32.mrb[1].mxu0  ;;  %v1938_v8 = vpop.f32.mrb[2].mxu1 }
 0x1d8   :  { %v2530_v59 = vadd.f32 %v2148_v56, %v1936_v7  ;;  %v2150_v60 = vpop.f32.mrb[2].mxu0  ;;  %v1940_v9 = vpop.f32.mrb[3].mxu1 }
 0x1d9   :  { %2224 = vst [vmem:[%s3930_s2] sm:$0xff] %v2529_v6  ;;  %v2531_v61 = vadd.f32 %v2150_v60, %v1938_v8  ;;  %v2152_v10 = vpop.f32.mrb[3].mxu0  ;;  %v2183_v12 = vmul.f32 %v2529_v6, %v2529_v6 }
 0x1da   :  { %2225 = vst [vmem:[%s3930_s2 + $0x8] sm:$0xff] %v2530_v59  ;;  %v2532_v11 = vadd.f32 %v2152_v10, %v1940_v9  ;;  %v2184_v15 = vmul.f32 %v2530_v59, %v2530_v59 }
 0x1db   :  { %v2165_v13 = vadd.f32 %v2531_v61, %v2529_v6  ;;  %v2185_v14 = vmul.f32 %v2531_v61, %v2531_v61  ;;  %2226 = vst [vmem:[%s3930_s2 + $0x10] sm:$0xff] %v2531_v61 }
 0x1dc   :  { %v2174_v16 = vadd.f32 %v2532_v11, %v2530_v59  ;;  %v2186_v17 = vmul.f32 %v2532_v11, %v2532_v11  ;;  %2227 = vst [vmem:[%s3930_s2 + $0x18] sm:$0xff] %v2532_v11 }
 0x1dd   :  { %v2191_v18 = vadd.f32 %v2185_v14, %v2183_v12  ;;  %v1944_v20 = vpop.f32.mrb[4].mxu1 }
 0x1de   :  { %v2200_v19 = vadd.f32 %v2186_v17, %v2184_v15  ;;  %v2156_v21 = vpop.f32.mrb[4].mxu0  ;;  %v1946_v23 = vpop.f32.mrb[5].mxu1 }
 0x1df   :  { %v2533_v22 = vadd.f32 %v2156_v21, %v1944_v20  ;;  %v2158_v24 = vpop.f32.mrb[5].mxu0  ;;  %v1948_v26 = vpop.f32.mrb[6].mxu1 }
 0x1e0   :  { %v2534_v25 = vadd.f32 %v2158_v24, %v1946_v23  ;;  %v2160_v27 = vpop.f32.mrb[6].mxu0  ;;  %v1950_v31 = vpop.f32.mrb[7].mxu1 }
 0x1e1   :  { %v2166_v28 = vadd.f32 %v2533_v22, %v2165_v13  ;;  %v2187_v29 = vmul.f32 %v2533_v22, %v2533_v22  ;;  %2228 = vst [vmem:[%s3930_s2 + $0x20] sm:$0xff] %v2533_v22  ;;  %v2535_v30 = vadd.f32 %v2160_v27, %v1948_v26  ;;  %v2162_v32 = vpop.f32.mrb[7].mxu0 }
 0x1e2   :  { %v2175_v33 = vadd.f32 %v2534_v25, %v2174_v16  ;;  %v2188_v34 = vmul.f32 %v2534_v25, %v2534_v25  ;;  %2229 = vst [vmem:[%s3930_s2 + $0x28] sm:$0xff] %v2534_v25  ;;  %v2536_v35 = vadd.f32 %v2162_v32, %v1950_v31 }
 0x1e3   :  { %v2192_v36 = vadd.f32 %v2191_v18, %v2187_v29  ;;  %v2167_v37 = vadd.f32 %v2535_v30, %v2166_v28  ;;  %v2189_v38 = vmul.f32 %v2535_v30, %v2535_v30  ;;  %2230 = vst [vmem:[%s3930_s2 + $0x30] sm:$0xff] %v2535_v30 }
 0x1e4   :  { %v2201_v39 = vadd.f32 %v2200_v19, %v2188_v34  ;;  %v2176_v40 = vadd.f32 %v2536_v35, %v2175_v33  ;;  %v2190_v41 = vmul.f32 %v2536_v35, %v2536_v35  ;;  %2231 = vst [vmem:[%s3930_s2 + $0x38] sm:$0xff] %v2536_v35 }
 0x1e5   :  { %v2168_v43 = vrot.slane %v2167_v37, 4  ;;  %v2193_v44 = vadd.f32 %v2192_v36, %v2189_v38 }
 0x1e6   :  { %v2177_v48 = vrot.slane %v2176_v40, 4  ;;  %v2202_v49 = vadd.f32 %v2201_v39, %v2190_v41 }
 0x1e7   :  { %v2169_v42 = vadd.f32 %v2168_v43, %v2167_v37  ;;  %v2194_v45 = vrot.slane %v2193_v44, 4 }
 0x1e8   :  { %v2178_v46 = vadd.f32 %v2177_v48, %v2176_v40  ;;  %v2203_v47 = vrot.slane %v2202_v49, 4 }
 0x1e9   :  { %v2170_v50 = vrot.slane %v2169_v42, 2  ;;  %v2195_v51 = vadd.f32 %v2194_v45, %v2193_v44 }
 0x1ea   :  { %v2179_v52 = vrot.slane %v2178_v46, 2  ;;  %v2204_v53 = vadd.f32 %v2203_v47, %v2202_v49 }
 0x1eb   :  { %v2171_v54 = vadd.f32 %v2170_v50, %v2169_v42  ;;  %v2196_v55 = vrot.slane %v2195_v51, 2 }
 0x1ec   :  { %v2180_v57 = vadd.f32 %v2179_v52, %v2178_v46  ;;  %v2205_v58 = vrot.slane %v2204_v53, 2 }
 0x1ed   :  { %v2172_v62 = vrot.slane %v2171_v54, 1  ;;  %v2197_v63 = vadd.f32 %v2196_v55, %v2195_v51 }
 0x1ee   :  { %v2181_v0 = vrot.slane %v2180_v57, 1  ;;  %v2206_v1 = vadd.f32 %v2205_v58, %v2204_v53 }
 0x1ef   :  { %v2198_v2 = vrot.slane %v2197_v63, 1  ;;  %v2173_v4 = vadd.f32 %v2172_v62, %v2171_v54 }
 0x1f0   :  { %v2207_v3 = vrot.slane %v2206_v1, 1  ;;  %v2182_v6 = vadd.f32 %v2181_v0, %v2180_v57 }
 0x1f1   :  { %v2199_v5 = vadd.f32 %v2198_v2, %v2197_v63 }
 0x1f2   :  { %v2208_v7 = vadd.f32 %v2207_v3, %v2206_v1 }
 0x1f3   :  { %v2210_v56 = vsel %vm2209_vm0, %v2173_v4, %v2199_v5 }
 0x1f4   :  { %v2211_v59 = vsel %vm2209_vm0, %v2182_v6, %v2208_v7 }
 0x1f5   :  { %v2214_v8 = vcombine.low %v2210_v56, %v2211_v59 }
 0x1f7   :  { %2528 = vst.sshfl [vmem:[%s3931_s3] sm:$0x33 pattern:$0x76325410] %v2214_v8 }

// kernel: discriminator_forward.13
= control target key start
LH: loop header
LB: loop body
LE: loop exit
PB: predicated region body
PF: predicated region fallthrough
CT: control target
= control target key end

     0   :  { %s4614_s1 = inlined_call_operand.vmem [shape: bf16[4096,128], index: 1, kind: input, shape index: {}]   ;;  %s4615_s0 = inlined_call_operand.vmem [shape: bf16[8,4096], index: 0, kind: input, shape index: {}]   ;;  %s4616_s2 = inlined_call_operand.vmem [shape: f32[1,128], index: 2, kind: input, shape index: {}]   ;;  %s4617_s3 = inlined_call_operand.vmem [shape: f32[8,128], index: 3, kind: output, shape index: {}]  }
   0x1   :  { %v3484_v0 = vld [vmem:[%s4614_s1 + $0x40] sm:$0xff]   ;;  %v3488_v4 = vld [vmem:[%s4614_s1 + $0x48] sm:$0xff]   ;;  %v3492_v8 = vld [vmem:[%s4614_s1 + $0x50] sm:$0xff]  }
   0x2   :  { %v3485_v1 = vld [vmem:[%s4614_s1 + $0xc0] sm:$0xff]   ;;  %3132 = vmatprep.subr.bf16.mxu0 %v3484_v0  ;;  %v3489_v5 = vld [vmem:[%s4614_s1 + $0xc8] sm:$0xff]   ;;  %v3493_v9 = vld [vmem:[%s4614_s1 + $0xd0] sm:$0xff]  }
   0x3   :  { %v3486_v2 = vld [vmem:[%s4614_s1] sm:$0xff]   ;;  %3154 = vmatprep.subr.bf16.mxu1 %v3485_v1  ;;  %v3490_v6 = vld [vmem:[%s4614_s1 + $0x8] sm:$0xff]   ;;  %v3494_v10 = vld [vmem:[%s4614_s1 + $0x10] sm:$0xff]  }
   0x4   :  { %v3487_v3 = vld [vmem:[%s4614_s1 + $0x80] sm:$0xff]   ;;  %3133 = vmatpush3.bf16.msra.mxu0 %v3486_v2  ;;  %v3491_v7 = vld [vmem:[%s4614_s1 + $0x88] sm:$0xff]   ;;  %v3495_v11 = vld [vmem:[%s4614_s1 + $0x90] sm:$0xff]  }
   0x5   :  { %3155 = vmatpush3.bf16.msra.mxu1 %v3487_v3  ;;  %3134 = vmatprep.subr.bf16.mxu0 %v3488_v4  ;;  %v3496_v12 = vld [vmem:[%s4614_s1 + $0x58] sm:$0xff]   ;;  %v3500_v16 = vld [vmem:[%s4614_s1 + $0x60] sm:$0xff]   ;;  %v3504_v20 = vld [vmem:[%s4614_s1 + $0x68] sm:$0xff]  }
   0x6   :  { %3156 = vmatprep.subr.bf16.mxu1 %v3489_v5  ;;  %v3497_v13 = vld [vmem:[%s4614_s1 + $0xd8] sm:$0xff]   ;;  %v3501_v17 = vld [vmem:[%s4614_s1 + $0xe0] sm:$0xff]   ;;  %v3505_v21 = vld [vmem:[%s4614_s1 + $0xe8] sm:$0xff]  }
   0x7   :  { %v3498_v14 = vld [vmem:[%s4614_s1 + $0x18] sm:$0xff]   ;;  %v3502_v18 = vld [vmem:[%s4614_s1 + $0x20] sm:$0xff]   ;;  %v3506_v22 = vld [vmem:[%s4614_s1 + $0x28] sm:$0xff]  }
   0x8   :  { %3135 = vmatpush3.bf16.msra.mxu0 %v3490_v6  ;;  %v3499_v15 = vld [vmem:[%s4614_s1 + $0x98] sm:$0xff]   ;;  %v3503_v19 = vld [vmem:[%s4614_s1 + $0xa0] sm:$0xff]   ;;  %v3507_v23 = vld [vmem:[%s4614_s1 + $0xa8] sm:$0xff]  }
   0x9   :  { %3157 = vmatpush3.bf16.msra.mxu1 %v3491_v7  ;;  %3136 = vmatprep.subr.bf16.mxu0 %v3492_v8  ;;  %v3508_v24 = vld [vmem:[%s4614_s1 + $0x70] sm:$0xff]   ;;  %v3512_v28 = vld [vmem:[%s4614_s1 + $0x78] sm:$0xff]   ;;  %v15_v32 = vld [vmem:[%s4615_s0] sm:$0xff] }
   0xa   :  { %3158 = vmatprep.subr.bf16.mxu1 %v3493_v9  ;;  %v3509_v25 = vld [vmem:[%s4614_s1 + $0xf0] sm:$0xff]   ;;  %v3513_v29 = vld [vmem:[%s4614_s1 + $0xf8] sm:$0xff]   ;;  %v16_v33 = vld [vmem:[%s4615_s0 + $0x8] sm:$0xff]  ;;  %v2844_v34 = vcombine.low %v15_v32, %v15_v32  ;;  %v2845_v35 = vcombine.high %v15_v32, %v15_v32 }
   0xb   :  { %v3510_v26 = vld [vmem:[%s4614_s1 + $0x30] sm:$0xff]   ;;  %v3514_v30 = vld [vmem:[%s4614_s1 + $0x38] sm:$0xff]   ;;  %v2846_v36 = vcombine.low %v16_v33, %v16_v33  ;;  %v2847_v37 = vcombine.high %v16_v33, %v16_v33  ;;  %v3520_v38 = vld [vmem:[%s4614_s1 + $0x140] sm:$0xff]  }
   0xc   :  { %3137 = vmatpush3.bf16.msra.mxu0 %v3494_v10  ;;  %v3511_v27 = vld [vmem:[%s4614_s1 + $0xb0] sm:$0xff]   ;;  %v3515_v31 = vld [vmem:[%s4614_s1 + $0xb8] sm:$0xff]   ;;  %v3521_v39 = vld [vmem:[%s4614_s1 + $0x1c0] sm:$0xff]   ;;  %2230 = vmatprep.mubr.bf16.mxu0 %v2845_v35 }
   0xd   :  { %3159 = vmatpush3.bf16.msra.mxu1 %v3495_v11  ;;  %3138 = vmatprep.subr.bf16.mxu0 %v3496_v12  ;;  %v3522_v40 = vld [vmem:[%s4614_s1 + $0x100] sm:$0xff]   ;;  %v3524_v42 = vld [vmem:[%s4614_s1 + $0x148] sm:$0xff]   ;;  %v3528_v46 = vld [vmem:[%s4614_s1 + $0x150] sm:$0xff]  }
   0xe   :  { %3160 = vmatprep.subr.bf16.mxu1 %v3497_v13  ;;  %2270 = vmatprep.mubr.bf16.mxu1 %v2847_v37  ;;  %v3523_v41 = vld [vmem:[%s4614_s1 + $0x180] sm:$0xff]   ;;  %v3525_v43 = vld [vmem:[%s4614_s1 + $0x1c8] sm:$0xff]   ;;  %v3529_v47 = vld [vmem:[%s4614_s1 + $0x1d0] sm:$0xff]  }
   0xf   :  { %v3526_v44 = vld [vmem:[%s4614_s1 + $0x108] sm:$0xff]   ;;  %v3530_v48 = vld [vmem:[%s4614_s1 + $0x110] sm:$0xff]   ;;  %v3532_v50 = vld [vmem:[%s4614_s1 + $0x158] sm:$0xff]  }
  0x10   :  { %3139 = vmatpush3.bf16.msra.mxu0 %v3498_v14  ;;  %v3527_v45 = vld [vmem:[%s4614_s1 + $0x188] sm:$0xff]   ;;  %v3531_v49 = vld [vmem:[%s4614_s1 + $0x190] sm:$0xff]   ;;  %v3533_v51 = vld [vmem:[%s4614_s1 + $0x1d8] sm:$0xff]  }
  0x11   :  { %3161 = vmatpush3.bf16.msra.mxu1 %v3499_v15  ;;  %3140 = vmatprep.subr.bf16.mxu0 %v3500_v16  ;;  %v3534_v52 = vld [vmem:[%s4614_s1 + $0x118] sm:$0xff]   ;;  %v3536_v54 = vld [vmem:[%s4614_s1 + $0x160] sm:$0xff]   ;;  %v3540_v58 = vld [vmem:[%s4614_s1 + $0x168] sm:$0xff]  }
  0x12   :  { %3162 = vmatprep.subr.bf16.mxu1 %v3501_v17  ;;  %v3535_v53 = vld [vmem:[%s4614_s1 + $0x198] sm:$0xff]   ;;  %v3537_v55 = vld [vmem:[%s4614_s1 + $0x1e0] sm:$0xff]   ;;  %v3541_v59 = vld [vmem:[%s4614_s1 + $0x1e8] sm:$0xff]  }
  0x13   :  { %v3538_v56 = vld [vmem:[%s4614_s1 + $0x120] sm:$0xff]   ;;  %v3542_v60 = vld [vmem:[%s4614_s1 + $0x128] sm:$0xff]   ;;  %v3544_v62 = vld [vmem:[%s4614_s1 + $0x170] sm:$0xff]  }
  0x14   :  { %3141 = vmatpush3.bf16.msra.mxu0 %v3502_v18  ;;  %v3539_v57 = vld [vmem:[%s4614_s1 + $0x1a0] sm:$0xff]   ;;  %v3543_v61 = vld [vmem:[%s4614_s1 + $0x1a8] sm:$0xff]   ;;  %v3545_v63 = vld [vmem:[%s4614_s1 + $0x1f0] sm:$0xff]  }
  0x15   :  { %3163 = vmatpush3.bf16.msra.mxu1 %v3503_v19  ;;  %3142 = vmatprep.subr.bf16.mxu0 %v3504_v20  ;;  %v3546_v0 = vld [vmem:[%s4614_s1 + $0x130] sm:$0xff]   ;;  %v3548_v2 = vld [vmem:[%s4614_s1 + $0x178] sm:$0xff]   ;;  %v3556_v12 = vld [vmem:[%s4614_s1 + $0x240] sm:$0xff]  }
  0x16   :  { %3164 = vmatprep.subr.bf16.mxu1 %v3505_v21  ;;  %v3547_v1 = vld [vmem:[%s4614_s1 + $0x1b0] sm:$0xff]   ;;  %v3549_v3 = vld [vmem:[%s4614_s1 + $0x1f8] sm:$0xff]   ;;  %v3557_v13 = vld [vmem:[%s4614_s1 + $0x2c0] sm:$0xff]  }
  0x17   :  { %v3550_v4 = vld [vmem:[%s4614_s1 + $0x138] sm:$0xff]   ;;  %v17_v6 = vld [vmem:[%s4615_s0 + $0x10] sm:$0xff]  ;;  %v3558_v14 = vld [vmem:[%s4614_s1 + $0x200] sm:$0xff]  }
  0x18   :  { %3143 = vmatpush3.bf16.msra.mxu0 %v3506_v22  ;;  %v3551_v5 = vld [vmem:[%s4614_s1 + $0x1b8] sm:$0xff]   ;;  %v2848_v7 = vcombine.low %v17_v6, %v17_v6  ;;  %v2849_v8 = vcombine.high %v17_v6, %v17_v6  ;;  %v3559_v15 = vld [vmem:[%s4614_s1 + $0x280] sm:$0xff]   ;;  %v3560_v16 = vld [vmem:[%s4614_s1 + $0x248] sm:$0xff]  }
  0x19   :  { %3165 = vmatpush3.bf16.msra.mxu1 %v3507_v23  ;;  %3144 = vmatprep.subr.bf16.mxu0 %v3508_v24  ;;  %v18_v9 = vld [vmem:[%s4615_s0 + $0x18] sm:$0xff]  ;;  %v3561_v17 = vld [vmem:[%s4614_s1 + $0x2c8] sm:$0xff]   ;;  %v3564_v20 = vld [vmem:[%s4614_s1 + $0x250] sm:$0xff]  }
  0x1a   :  { %3166 = vmatprep.subr.bf16.mxu1 %v3509_v25  ;;  %v2850_v10 = vcombine.low %v18_v9, %v18_v9  ;;  %v2851_v11 = vcombine.high %v18_v9, %v18_v9  ;;  %v3562_v18 = vld [vmem:[%s4614_s1 + $0x208] sm:$0xff]   ;;  %v3565_v21 = vld [vmem:[%s4614_s1 + $0x2d0] sm:$0xff]   ;;  %v3568_v24 = vld [vmem:[%s4614_s1 + $0x258] sm:$0xff]  }
  0x1b   :  { %v3563_v19 = vld [vmem:[%s4614_s1 + $0x288] sm:$0xff]   ;;  %v3566_v22 = vld [vmem:[%s4614_s1 + $0x210] sm:$0xff]   ;;  %v3569_v25 = vld [vmem:[%s4614_s1 + $0x2d8] sm:$0xff]  }
  0x1c   :  { %3145 = vmatpush3.bf16.msra.mxu0 %v3510_v26  ;;  %v3567_v23 = vld [vmem:[%s4614_s1 + $0x290] sm:$0xff]   ;;  %v3570_v26 = vld [vmem:[%s4614_s1 + $0x218] sm:$0xff]   ;;  %v3576_v32 = vld [vmem:[%s4614_s1 + $0x268] sm:$0xff]  }
  0x1d   :  { %3167 = vmatpush3.bf16.msra.mxu1 %v3511_v27  ;;  %3146 = vmatprep.subr.bf16.mxu0 %v3512_v28  ;;  %v3571_v27 = vld [vmem:[%s4614_s1 + $0x298] sm:$0xff]   ;;  %v3572_v28 = vld [vmem:[%s4614_s1 + $0x260] sm:$0xff]   ;;  %v3577_v33 = vld [vmem:[%s4614_s1 + $0x2e8] sm:$0xff]  }
  0x1e   :  { %3168 = vmatprep.subr.bf16.mxu1 %v3513_v29  ;;  %v3573_v29 = vld [vmem:[%s4614_s1 + $0x2e0] sm:$0xff]   ;;  %v3579_v35 = vld [vmem:[%s4614_s1 + $0x2a8] sm:$0xff]   ;;  %v3581_v37 = vld [vmem:[%s4614_s1 + $0x2f0] sm:$0xff]  }
  0x1f   :  { %v3612_v6 = vld [vmem:[%s4614_s1 + $0x368] sm:$0xff]  }
  0x20   :  { %3147 = vmatpush3.bf16.msra.mxu0 %v3514_v30  ;;  %v3574_v30 = vld [vmem:[%s4614_s1 + $0x220] sm:$0xff]   ;;  %v3615_v9 = vld [vmem:[%s4614_s1 + $0x3a8] sm:$0xff]  }
  0x21   :  { %3169 = vmatpush3.bf16.msra.mxu1 %v3515_v31  ;;  %3176 = vmatprep.subr.bf16.mxu0 %v3520_v38  ;;  %v3575_v31 = vld [vmem:[%s4614_s1 + $0x2a0] sm:$0xff]   ;;  %v3582_v38 = vld [vmem:[%s4614_s1 + $0x230] sm:$0xff]  }
  0x22   :  { %3198 = vmatprep.subr.bf16.mxu1 %v3521_v39  ;;  %v3583_v39 = vld [vmem:[%s4614_s1 + $0x2b0] sm:$0xff]  }
  0x23   :  { %2231 = vmatmul.mubr.bf16.vlgmr.msra.gmra.mrb[0].mxu0 %v2844_v34  ;;  %v3578_v34 = vld [vmem:[%s4614_s1 + $0x228] sm:$0xff]  }
  0x24   :  { %2271 = vmatmul.mubr.bf16.vlgmr.msra.gmra.mrb[0].mxu1 %v2846_v36  ;;  %3177 = vmatpush3.bf16.msra.mxu0 %v3522_v40  ;;  %v3580_v36 = vld [vmem:[%s4614_s1 + $0x270] sm:$0xff]   ;;  %v3584_v40 = vld [vmem:[%s4614_s1 + $0x278] sm:$0xff]  }
  0x25   :  { %3199 = vmatpush3.bf16.msra.mxu1 %v3523_v41  ;;  %3178 = vmatprep.subr.bf16.mxu0 %v3524_v42  ;;  %v3585_v41 = vld [vmem:[%s4614_s1 + $0x2f8] sm:$0xff]  }
  0x26   :  { %3200 = vmatprep.subr.bf16.mxu1 %v3525_v43  ;;  %2310 = vmatprep.mubr.bf16.mxu0 %v2849_v8  ;;  %v3586_v42 = vld [vmem:[%s4614_s1 + $0x238] sm:$0xff]   ;;  %v3614_v8 = vld [vmem:[%s4614_s1 + $0x328] sm:$0xff]  }
  0x27   :  { %2350 = vmatprep.mubr.bf16.mxu1 %v2851_v11  ;;  %v3587_v43 = vld [vmem:[%s4614_s1 + $0x2b8] sm:$0xff]   ;;  %v3617_v11 = vld [vmem:[%s4614_s1 + $0x3f0] sm:$0xff]  }
  0x28   :  { %3179 = vmatpush3.bf16.msra.mxu0 %v3526_v44  ;;  %v19_v44 = vld [vmem:[%s4615_s0 + $0x20] sm:$0xff] }
  0x29   :  { %3201 = vmatpush3.bf16.msra.mxu1 %v3527_v45  ;;  %3180 = vmatprep.subr.bf16.mxu0 %v3528_v46  ;;  %v20_v45 = vld [vmem:[%s4615_s0 + $0x28] sm:$0xff]  ;;  %v2852_v46 = vcombine.low %v19_v44, %v19_v44 }
  0x2a   :  { %3202 = vmatprep.subr.bf16.mxu1 %v3529_v47  ;;  %v2853_v47 = vcombine.high %v19_v44, %v19_v44  ;;  %v3648_v44 = vld [vmem:[%s4614_s1 + $0x468] sm:$0xff]  }
  0x2c   :  { %3181 = vmatpush3.bf16.msra.mxu0 %v3530_v48  ;;  %v2854_v48 = vcombine.low %v20_v45, %v20_v45 }
  0x2d   :  { %3203 = vmatpush3.bf16.msra.mxu1 %v3531_v49  ;;  %3182 = vmatprep.subr.bf16.mxu0 %v3532_v50  ;;  %v2855_v49 = vcombine.high %v20_v45, %v20_v45  ;;  %v3592_v50 = vld [vmem:[%s4614_s1 + $0x340] sm:$0xff]   ;;  %v3649_v45 = vld [vmem:[%s4614_s1 + $0x4e8] sm:$0xff]  }
  0x2e   :  { %3204 = vmatprep.subr.bf16.mxu1 %v3533_v51  ;;  %v3593_v51 = vld [vmem:[%s4614_s1 + $0x3c0] sm:$0xff]  }
  0x30   :  { %3183 = vmatpush3.bf16.msra.mxu0 %v3534_v52  ;;  %v3594_v52 = vld [vmem:[%s4614_s1 + $0x300] sm:$0xff]  }
  0x31   :  { %3205 = vmatpush3.bf16.msra.mxu1 %v3535_v53  ;;  %3184 = vmatprep.subr.bf16.mxu0 %v3536_v54  ;;  %v3595_v53 = vld [vmem:[%s4614_s1 + $0x380] sm:$0xff]   ;;  %v3596_v54 = vld [vmem:[%s4614_s1 + $0x348] sm:$0xff]  }
  0x32   :  { %3206 = vmatprep.subr.bf16.mxu1 %v3537_v55  ;;  %v3597_v55 = vld [vmem:[%s4614_s1 + $0x3c8] sm:$0xff]  }
  0x34   :  { %3185 = vmatpush3.bf16.msra.mxu0 %v3538_v56  ;;  %v3598_v56 = vld [vmem:[%s4614_s1 + $0x308] sm:$0xff]  }
  0x35   :  { %3207 = vmatpush3.bf16.msra.mxu1 %v3539_v57  ;;  %3186 = vmatprep.subr.bf16.mxu0 %v3540_v58  ;;  %v3599_v57 = vld [vmem:[%s4614_s1 + $0x388] sm:$0xff]   ;;  %v3600_v58 = vld [vmem:[%s4614_s1 + $0x350] sm:$0xff]  }
  0x36   :  { %3208 = vmatprep.subr.bf16.mxu1 %v3541_v59  ;;  %v3601_v59 = vld [vmem:[%s4614_s1 + $0x3d0] sm:$0xff]  }
  0x38   :  { %3187 = vmatpush3.bf16.msra.mxu0 %v3542_v60  ;;  %v3602_v60 = vld [vmem:[%s4614_s1 + $0x310] sm:$0xff]  }
  0x39   :  { %3209 = vmatpush3.bf16.msra.mxu1 %v3543_v61  ;;  %3188 = vmatprep.subr.bf16.mxu0 %v3544_v62  ;;  %v3603_v61 = vld [vmem:[%s4614_s1 + $0x390] sm:$0xff]   ;;  %v3604_v62 = vld [vmem:[%s4614_s1 + $0x358] sm:$0xff]  }
  0x3a   :  { %3210 = vmatprep.subr.bf16.mxu1 %v3545_v63  ;;  %v3605_v63 = vld [vmem:[%s4614_s1 + $0x3d8] sm:$0xff]  }
  0x3c   :  { %3189 = vmatpush3.bf16.msra.mxu0 %v3546_v0  ;;  %v3606_v0 = vld [vmem:[%s4614_s1 + $0x318] sm:$0xff]  }
  0x3d   :  { %3211 = vmatpush3.bf16.msra.mxu1 %v3547_v1  ;;  %3190 = vmatprep.subr.bf16.mxu0 %v3548_v2  ;;  %v3607_v1 = vld [vmem:[%s4614_s1 + $0x398] sm:$0xff]   ;;  %v3608_v2 = vld [vmem:[%s4614_s1 + $0x360] sm:$0xff]  }
  0x3e   :  { %3212 = vmatprep.subr.bf16.mxu1 %v3549_v3  ;;  %v3609_v3 = vld [vmem:[%s4614_s1 + $0x3e0] sm:$0xff]  }
  0x40   :  { %3191 = vmatpush3.bf16.msra.mxu0 %v3550_v4  ;;  %v3610_v4 = vld [vmem:[%s4614_s1 + $0x320] sm:$0xff]  }
  0x41   :  { %3213 = vmatpush3.bf16.msra.mxu1 %v3551_v5  ;;  %3220 = vmatprep.subr.bf16.mxu0 %v3556_v12  ;;  %v3611_v5 = vld [vmem:[%s4614_s1 + $0x3a0] sm:$0xff]   ;;  %v3618_v12 = vld [vmem:[%s4614_s1 + $0x330] sm:$0xff]  }
  0x42   :  { %3242 = vmatprep.subr.bf16.mxu1 %v3557_v13  ;;  %v3619_v13 = vld [vmem:[%s4614_s1 + $0x3b0] sm:$0xff]  }
  0x43   :  { %2311 = vmatmul.mubr.bf16.vlgmr.msra.gmra.mrb[4].mxu0 %v2848_v7  ;;  %v3613_v7 = vld [vmem:[%s4614_s1 + $0x3e8] sm:$0xff]  }
  0x44   :  { %2351 = vmatmul.mubr.bf16.vlgmr.msra.gmra.mrb[4].mxu1 %v2850_v10  ;;  %3221 = vmatpush3.bf16.msra.mxu0 %v3558_v14  ;;  %v3616_v10 = vld [vmem:[%s4614_s1 + $0x370] sm:$0xff]   ;;  %v3620_v14 = vld [vmem:[%s4614_s1 + $0x378] sm:$0xff]  }
  0x45   :  { %3243 = vmatpush3.bf16.msra.mxu1 %v3559_v15  ;;  %3222 = vmatprep.subr.bf16.mxu0 %v3560_v16  ;;  %v3621_v15 = vld [vmem:[%s4614_s1 + $0x3f8] sm:$0xff]  }
  0x46   :  { %3244 = vmatprep.subr.bf16.mxu1 %v3561_v17  ;;  %2390 = vmatprep.mubr.bf16.mxu0 %v2853_v47  ;;  %v3622_v16 = vld [vmem:[%s4614_s1 + $0x338] sm:$0xff]   ;;  %v3651_v47 = vld [vmem:[%s4614_s1 + $0x4a8] sm:$0xff]  }
  0x47   :  { %2430 = vmatprep.mubr.bf16.mxu1 %v2855_v49  ;;  %v3623_v17 = vld [vmem:[%s4614_s1 + $0x3b8] sm:$0xff]   ;;  %v3653_v49 = vld [vmem:[%s4614_s1 + $0x4f0] sm:$0xff]  }
  0x48   :  { %3223 = vmatpush3.bf16.msra.mxu0 %v3562_v18  ;;  %v21_v18 = vld [vmem:[%s4615_s0 + $0x30] sm:$0xff] }
  0x49   :  { %3245 = vmatpush3.bf16.msra.mxu1 %v3563_v19  ;;  %3224 = vmatprep.subr.bf16.mxu0 %v3564_v20  ;;  %v22_v19 = vld [vmem:[%s4615_s0 + $0x38] sm:$0xff]  ;;  %v2856_v20 = vcombine.low %v21_v18, %v21_v18 }
  0x4a   :  { %3246 = vmatprep.subr.bf16.mxu1 %v3565_v21  ;;  %v2857_v21 = vcombine.high %v21_v18, %v21_v18  ;;  %v3684_v18 = vld [vmem:[%s4614_s1 + $0x568] sm:$0xff]  }
  0x4c   :  { %3225 = vmatpush3.bf16.msra.mxu0 %v3566_v22  ;;  %v2858_v22 = vcombine.low %v22_v19, %v22_v19 }
  0x4d   :  { %3247 = vmatpush3.bf16.msra.mxu1 %v3567_v23  ;;  %3226 = vmatprep.subr.bf16.mxu0 %v3568_v24  ;;  %v3628_v23 = vld [vmem:[%s4614_s1 + $0x440] sm:$0xff]   ;;  %v2859_v24 = vcombine.high %v22_v19, %v22_v19  ;;  %v3685_v19 = vld [vmem:[%s4614_s1 + $0x5e8] sm:$0xff]  }
  0x4e   :  { %3248 = vmatprep.subr.bf16.mxu1 %v3569_v25  ;;  %v3629_v25 = vld [vmem:[%s4614_s1 + $0x4c0] sm:$0xff]  }
  0x50   :  { %3227 = vmatpush3.bf16.msra.mxu0 %v3570_v26  ;;  %v3630_v26 = vld [vmem:[%s4614_s1 + $0x400] sm:$0xff]  }
  0x51   :  { %3249 = vmatpush3.bf16.msra.mxu1 %v3571_v27  ;;  %3228 = vmatprep.subr.bf16.mxu0 %v3572_v28  ;;  %v3631_v27 = vld [vmem:[%s4614_s1 + $0x480] sm:$0xff]   ;;  %v3632_v28 = vld [vmem:[%s4614_s1 + $0x448] sm:$0xff]  }
  0x52   :  { %3250 = vmatprep.subr.bf16.mxu1 %v3573_v29  ;;  %v3633_v29 = vld [vmem:[%s4614_s1 + $0x4c8] sm:$0xff]  }
  0x54   :  { %3229 = vmatpush3.bf16.msra.mxu0 %v3574_v30  ;;  %v3634_v30 = vld [vmem:[%s4614_s1 + $0x408] sm:$0xff]  }
  0x55   :  { %3251 = vmatpush3.bf16.msra.mxu1 %v3575_v31  ;;  %3230 = vmatprep.subr.bf16.mxu0 %v3576_v32  ;;  %v3635_v31 = vld [vmem:[%s4614_s1 + $0x488] sm:$0xff]   ;;  %v3636_v32 = vld [vmem:[%s4614_s1 + $0x450] sm:$0xff]  }
  0x56   :  { %3252 = vmatprep.subr.bf16.mxu1 %v3577_v33  ;;  %v3637_v33 = vld [vmem:[%s4614_s1 + $0x4d0] sm:$0xff]  }
  0x58   :  { %3231 = vmatpush3.bf16.msra.mxu0 %v3578_v34  ;;  %v3638_v34 = vld [vmem:[%s4614_s1 + $0x410] sm:$0xff]  }
  0x59   :  { %3253 = vmatpush3.bf16.msra.mxu1 %v3579_v35  ;;  %3232 = vmatprep.subr.bf16.mxu0 %v3580_v36  ;;  %v3639_v35 = vld [vmem:[%s4614_s1 + $0x490] sm:$0xff]   ;;  %v3640_v36 = vld [vmem:[%s4614_s1 + $0x458] sm:$0xff]  }
  0x5a   :  { %3254 = vmatprep.subr.bf16.mxu1 %v3581_v37  ;;  %v3641_v37 = vld [vmem:[%s4614_s1 + $0x4d8] sm:$0xff]  }
  0x5c   :  { %3233 = vmatpush3.bf16.msra.mxu0 %v3582_v38  ;;  %v3642_v38 = vld [vmem:[%s4614_s1 + $0x418] sm:$0xff]  }
  0x5d   :  { %3255 = vmatpush3.bf16.msra.mxu1 %v3583_v39  ;;  %3234 = vmatprep.subr.bf16.mxu0 %v3584_v40  ;;  %v3643_v39 = vld [vmem:[%s4614_s1 + $0x498] sm:$0xff]   ;;  %v3644_v40 = vld [vmem:[%s4614_s1 + $0x460] sm:$0xff]  }
  0x5e   :  { %3256 = vmatprep.subr.bf16.mxu1 %v3585_v41  ;;  %v3645_v41 = vld [vmem:[%s4614_s1 + $0x4e0] sm:$0xff]  }
  0x60   :  { %3235 = vmatpush3.bf16.msra.mxu0 %v3586_v42  ;;  %v3646_v42 = vld [vmem:[%s4614_s1 + $0x420] sm:$0xff]  }
  0x61   :  { %3257 = vmatpush3.bf16.msra.mxu1 %v3587_v43  ;;  %3264 = vmatprep.subr.bf16.mxu0 %v3592_v50  ;;  %v3647_v43 = vld [vmem:[%s4614_s1 + $0x4a0] sm:$0xff]   ;;  %v3654_v50 = vld [vmem:[%s4614_s1 + $0x430] sm:$0xff]  }
  0x62   :  { %3286 = vmatprep.subr.bf16.mxu1 %v3593_v51  ;;  %v3655_v51 = vld [vmem:[%s4614_s1 + $0x4b0] sm:$0xff]  }
  0x63   :  { %2391 = vmatmul.mubr.bf16.vlgmr.msra.gmra.mrb[8].mxu0 %v2852_v46  ;;  %v3650_v46 = vld [vmem:[%s4614_s1 + $0x428] sm:$0xff]  }
  0x64   :  { %2431 = vmatmul.mubr.bf16.vlgmr.msra.gmra.mrb[8].mxu1 %v2854_v48  ;;  %3265 = vmatpush3.bf16.msra.mxu0 %v3594_v52  ;;  %v3652_v48 = vld [vmem:[%s4614_s1 + $0x470] sm:$0xff]   ;;  %v3656_v52 = vld [vmem:[%s4614_s1 + $0x478] sm:$0xff]  }
  0x65   :  { %3287 = vmatpush3.bf16.msra.mxu1 %v3595_v53  ;;  %3266 = vmatprep.subr.bf16.mxu0 %v3596_v54  ;;  %v3657_v53 = vld [vmem:[%s4614_s1 + $0x4f8] sm:$0xff]  }
  0x66   :  { %3288 = vmatprep.subr.bf16.mxu1 %v3597_v55  ;;  %2470 = vmatprep.mubr.bf16.mxu0 %v2857_v21  ;;  %v3658_v54 = vld [vmem:[%s4614_s1 + $0x438] sm:$0xff]   ;;  %v3687_v21 = vld [vmem:[%s4614_s1 + $0x5a8] sm:$0xff]  }
  0x67   :  { %2510 = vmatprep.mubr.bf16.mxu1 %v2859_v24  ;;  %v3659_v55 = vld [vmem:[%s4614_s1 + $0x4b8] sm:$0xff]   ;;  %v3690_v24 = vld [vmem:[%s4614_s1 + $0x530] sm:$0xff]  }
  0x68   :  { %3267 = vmatpush3.bf16.msra.mxu0 %v3598_v56  ;;  %v23_v56 = vld [vmem:[%s4615_s0 + $0x40] sm:$0xff] }
  0x69   :  { %3289 = vmatpush3.bf16.msra.mxu1 %v3599_v57  ;;  %3268 = vmatprep.subr.bf16.mxu0 %v3600_v58  ;;  %v2860_v57 = vcombine.low %v23_v56, %v23_v56  ;;  %v2861_v58 = vcombine.high %v23_v56, %v23_v56  ;;  %v3720_v56 = vld [vmem:[%s4614_s1 + $0x668] sm:$0xff]  }
  0x6a   :  { %3290 = vmatprep.subr.bf16.mxu1 %v3601_v59  ;;  %v24_v59 = vld [vmem:[%s4615_s0 + $0x48] sm:$0xff] }
  0x6c   :  { %3269 = vmatpush3.bf16.msra.mxu0 %v3602_v60  ;;  %v2862_v60 = vcombine.low %v24_v59, %v24_v59 }
  0x6d   :  { %3291 = vmatpush3.bf16.msra.mxu1 %v3603_v61  ;;  %3270 = vmatprep.subr.bf16.mxu0 %v3604_v62  ;;  %v2863_v61 = vcombine.high %v24_v59, %v24_v59  ;;  %v3664_v62 = vld [vmem:[%s4614_s1 + $0x540] sm:$0xff]   ;;  %v3723_v59 = vld [vmem:[%s4614_s1 + $0x6a8] sm:$0xff]  }
  0x6e   :  { %3292 = vmatprep.subr.bf16.mxu1 %v3605_v63  ;;  %v3665_v63 = vld [vmem:[%s4614_s1 + $0x5c0] sm:$0xff]  }
  0x70   :  { %3271 = vmatpush3.bf16.msra.mxu0 %v3606_v0  ;;  %v3666_v0 = vld [vmem:[%s4614_s1 + $0x500] sm:$0xff]  }
  0x71   :  { %3293 = vmatpush3.bf16.msra.mxu1 %v3607_v1  ;;  %3272 = vmatprep.subr.bf16.mxu0 %v3608_v2  ;;  %v3667_v1 = vld [vmem:[%s4614_s1 + $0x580] sm:$0xff]   ;;  %v3668_v2 = vld [vmem:[%s4614_s1 + $0x548] sm:$0xff]  }
  0x72   :  { %3294 = vmatprep.subr.bf16.mxu1 %v3609_v3  ;;  %v3669_v3 = vld [vmem:[%s4614_s1 + $0x5c8] sm:$0xff]  }
  0x74   :  { %3273 = vmatpush3.bf16.msra.mxu0 %v3610_v4  ;;  %v3670_v4 = vld [vmem:[%s4614_s1 + $0x508] sm:$0xff]  }
  0x75   :  { %3295 = vmatpush3.bf16.msra.mxu1 %v3611_v5  ;;  %3274 = vmatprep.subr.bf16.mxu0 %v3612_v6  ;;  %v3671_v5 = vld [vmem:[%s4614_s1 + $0x588] sm:$0xff]   ;;  %v3672_v6 = vld [vmem:[%s4614_s1 + $0x550] sm:$0xff]  }
  0x76   :  { %3296 = vmatprep.subr.bf16.mxu1 %v3613_v7  ;;  %v3673_v7 = vld [vmem:[%s4614_s1 + $0x5d0] sm:$0xff]  }
  0x78   :  { %3275 = vmatpush3.bf16.msra.mxu0 %v3614_v8  ;;  %v3674_v8 = vld [vmem:[%s4614_s1 + $0x510] sm:$0xff]  }
  0x79   :  { %3297 = vmatpush3.bf16.msra.mxu1 %v3615_v9  ;;  %3276 = vmatprep.subr.bf16.mxu0 %v3616_v10  ;;  %v3675_v9 = vld [vmem:[%s4614_s1 + $0x590] sm:$0xff]   ;;  %v3676_v10 = vld [vmem:[%s4614_s1 + $0x558] sm:$0xff]  }
  0x7a   :  { %3298 = vmatprep.subr.bf16.mxu1 %v3617_v11  ;;  %v3677_v11 = vld [vmem:[%s4614_s1 + $0x5d8] sm:$0xff]  }
  0x7c   :  { %3277 = vmatpush3.bf16.msra.mxu0 %v3618_v12  ;;  %v3678_v12 = vld [vmem:[%s4614_s1 + $0x518] sm:$0xff]  }
  0x7d   :  { %3299 = vmatpush3.bf16.msra.mxu1 %v3619_v13  ;;  %3278 = vmatprep.subr.bf16.mxu0 %v3620_v14  ;;  %v3679_v13 = vld [vmem:[%s4614_s1 + $0x598] sm:$0xff]   ;;  %v3680_v14 = vld [vmem:[%s4614_s1 + $0x560] sm:$0xff]  }
  0x7e   :  { %3300 = vmatprep.subr.bf16.mxu1 %v3621_v15  ;;  %v3681_v15 = vld [vmem:[%s4614_s1 + $0x5e0] sm:$0xff]  }
  0x80   :  { %3279 = vmatpush3.bf16.msra.mxu0 %v3622_v16  ;;  %v3682_v16 = vld [vmem:[%s4614_s1 + $0x520] sm:$0xff]  }
  0x81   :  { %3301 = vmatpush3.bf16.msra.mxu1 %v3623_v17  ;;  %3308 = vmatprep.subr.bf16.mxu0 %v3628_v23  ;;  %v3683_v17 = vld [vmem:[%s4614_s1 + $0x5a0] sm:$0xff]   ;;  %v3689_v23 = vld [vmem:[%s4614_s1 + $0x5f0] sm:$0xff]  }
  0x82   :  { %3330 = vmatprep.subr.bf16.mxu1 %v3629_v25  ;;  %v3691_v25 = vld [vmem:[%s4614_s1 + $0x5b0] sm:$0xff]  }
  0x83   :  { %2471 = vmatmul.mubr.bf16.vlgmr.msra.gmra.mrb[12].mxu0 %v2856_v20  ;;  %v3686_v20 = vld [vmem:[%s4614_s1 + $0x528] sm:$0xff]  }
  0x84   :  { %2511 = vmatmul.mubr.bf16.vlgmr.msra.gmra.mrb[12].mxu1 %v2858_v22  ;;  %3309 = vmatpush3.bf16.msra.mxu0 %v3630_v26  ;;  %v3688_v22 = vld [vmem:[%s4614_s1 + $0x570] sm:$0xff]   ;;  %v3692_v26 = vld [vmem:[%s4614_s1 + $0x578] sm:$0xff]  }
  0x85   :  { %3331 = vmatpush3.bf16.msra.mxu1 %v3631_v27  ;;  %3310 = vmatprep.subr.bf16.mxu0 %v3632_v28  ;;  %v3693_v27 = vld [vmem:[%s4614_s1 + $0x5f8] sm:$0xff]  }
  0x86   :  { %3332 = vmatprep.subr.bf16.mxu1 %v3633_v29  ;;  %2550 = vmatprep.mubr.bf16.mxu0 %v2861_v58  ;;  %v3694_v28 = vld [vmem:[%s4614_s1 + $0x538] sm:$0xff]   ;;  %v3722_v58 = vld [vmem:[%s4614_s1 + $0x628] sm:$0xff]  }
  0x87   :  { %2590 = vmatprep.mubr.bf16.mxu1 %v2863_v61  ;;  %v3695_v29 = vld [vmem:[%s4614_s1 + $0x5b8] sm:$0xff]   ;;  %v3725_v61 = vld [vmem:[%s4614_s1 + $0x6f0] sm:$0xff]  }
  0x88   :  { %3311 = vmatpush3.bf16.msra.mxu0 %v3634_v30  ;;  %v25_v30 = vld [vmem:[%s4615_s0 + $0x50] sm:$0xff] }
  0x89   :  { %3333 = vmatpush3.bf16.msra.mxu1 %v3635_v31  ;;  %3312 = vmatprep.subr.bf16.mxu0 %v3636_v32  ;;  %v26_v31 = vld [vmem:[%s4615_s0 + $0x58] sm:$0xff]  ;;  %v2864_v32 = vcombine.low %v25_v30, %v25_v30 }
  0x8a   :  { %3334 = vmatprep.subr.bf16.mxu1 %v3637_v33  ;;  %v2865_v33 = vcombine.high %v25_v30, %v25_v30  ;;  %v3755_v30 = vld [vmem:[%s4614_s1 + $0x7a0] sm:$0xff]  }
  0x8c   :  { %3313 = vmatpush3.bf16.msra.mxu0 %v3638_v34  ;;  %v2866_v34 = vcombine.low %v26_v31, %v26_v31 }
  0x8d   :  { %3335 = vmatpush3.bf16.msra.mxu1 %v3639_v35  ;;  %3314 = vmatprep.subr.bf16.mxu0 %v3640_v36  ;;  %v2867_v35 = vcombine.high %v26_v31, %v26_v31  ;;  %v3700_v36 = vld [vmem:[%s4614_s1 + $0x640] sm:$0xff]  }
  0x8e   :  { %3336 = vmatprep.subr.bf16.mxu1 %v3641_v37  ;;  %v3701_v37 = vld [vmem:[%s4614_s1 + $0x6c0] sm:$0xff]  }
  0x90   :  { %3315 = vmatpush3.bf16.msra.mxu0 %v3642_v38  ;;  %v3702_v38 = vld [vmem:[%s4614_s1 + $0x600] sm:$0xff]  }
  0x91   :  { %3337 = vmatpush3.bf16.msra.mxu1 %v3643_v39  ;;  %3316 = vmatprep.subr.bf16.mxu0 %v3644_v40  ;;  %v3703_v39 = vld [vmem:[%s4614_s1 + $0x680] sm:$0xff]   ;;  %v3704_v40 = vld [vmem:[%s4614_s1 + $0x648] sm:$0xff]  }
  0x92   :  { %3338 = vmatprep.subr.bf16.mxu1 %v3645_v41  ;;  %v3705_v41 = vld [vmem:[%s4614_s1 + $0x6c8] sm:$0xff]  }
  0x94   :  { %3317 = vmatpush3.bf16.msra.mxu0 %v3646_v42  ;;  %v3706_v42 = vld [vmem:[%s4614_s1 + $0x608] sm:$0xff]  }
  0x95   :  { %3339 = vmatpush3.bf16.msra.mxu1 %v3647_v43  ;;  %3318 = vmatprep.subr.bf16.mxu0 %v3648_v44  ;;  %v3707_v43 = vld [vmem:[%s4614_s1 + $0x688] sm:$0xff]   ;;  %v3708_v44 = vld [vmem:[%s4614_s1 + $0x650] sm:$0xff]  }
  0x96   :  { %3340 = vmatprep.subr.bf16.mxu1 %v3649_v45  ;;  %v3709_v45 = vld [vmem:[%s4614_s1 + $0x6d0] sm:$0xff]  }
  0x98   :  { %3319 = vmatpush3.bf16.msra.mxu0 %v3650_v46  ;;  %v3710_v46 = vld [vmem:[%s4614_s1 + $0x610] sm:$0xff]  }
  0x99   :  { %3341 = vmatpush3.bf16.msra.mxu1 %v3651_v47  ;;  %3320 = vmatprep.subr.bf16.mxu0 %v3652_v48  ;;  %v3711_v47 = vld [vmem:[%s4614_s1 + $0x690] sm:$0xff]   ;;  %v3712_v48 = vld [vmem:[%s4614_s1 + $0x658] sm:$0xff]  }
  0x9a   :  { %3342 = vmatprep.subr.bf16.mxu1 %v3653_v49  ;;  %v3713_v49 = vld [vmem:[%s4614_s1 + $0x6d8] sm:$0xff]  }
  0x9c   :  { %3321 = vmatpush3.bf16.msra.mxu0 %v3654_v50  ;;  %v3714_v50 = vld [vmem:[%s4614_s1 + $0x618] sm:$0xff]  }
  0x9d   :  { %3343 = vmatpush3.bf16.msra.mxu1 %v3655_v51  ;;  %3322 = vmatprep.subr.bf16.mxu0 %v3656_v52  ;;  %v3715_v51 = vld [vmem:[%s4614_s1 + $0x698] sm:$0xff]   ;;  %v3716_v52 = vld [vmem:[%s4614_s1 + $0x660] sm:$0xff]  }
  0x9e   :  { %3344 = vmatprep.subr.bf16.mxu1 %v3657_v53  ;;  %v3717_v53 = vld [vmem:[%s4614_s1 + $0x6e0] sm:$0xff]  }
  0xa0   :  { %3323 = vmatpush3.bf16.msra.mxu0 %v3658_v54  ;;  %v3718_v54 = vld [vmem:[%s4614_s1 + $0x620] sm:$0xff]  }
  0xa1   :  { %3345 = vmatpush3.bf16.msra.mxu1 %v3659_v55  ;;  %3352 = vmatprep.subr.bf16.mxu0 %v3664_v62  ;;  %v3719_v55 = vld [vmem:[%s4614_s1 + $0x6a0] sm:$0xff]   ;;  %v3726_v62 = vld [vmem:[%s4614_s1 + $0x630] sm:$0xff]  }
  0xa2   :  { %3374 = vmatprep.subr.bf16.mxu1 %v3665_v63  ;;  %v3727_v63 = vld [vmem:[%s4614_s1 + $0x6b0] sm:$0xff]  }
  0xa3   :  { %2551 = vmatmul.mubr.bf16.vlgmr.msra.gmra.mrb[16].mxu0 %v2860_v57  ;;  %v3721_v57 = vld [vmem:[%s4614_s1 + $0x6e8] sm:$0xff]  }
  0xa4   :  { %2591 = vmatmul.mubr.bf16.vlgmr.msra.gmra.mrb[16].mxu1 %v2862_v60  ;;  %3353 = vmatpush3.bf16.msra.mxu0 %v3666_v0  ;;  %v3724_v60 = vld [vmem:[%s4614_s1 + $0x670] sm:$0xff]   ;;  %v3728_v0 = vld [vmem:[%s4614_s1 + $0x678] sm:$0xff]  }
  0xa5   :  { %3375 = vmatpush3.bf16.msra.mxu1 %v3667_v1  ;;  %3354 = vmatprep.subr.bf16.mxu0 %v3668_v2  ;;  %v3729_v1 = vld [vmem:[%s4614_s1 + $0x6f8] sm:$0xff]  }
  0xa6   :  { %3376 = vmatprep.subr.bf16.mxu1 %v3669_v3  ;;  %2630 = vmatprep.mubr.bf16.mxu0 %v2865_v33  ;;  %v3730_v2 = vld [vmem:[%s4614_s1 + $0x638] sm:$0xff]  }
  0xa7   :  { %2670 = vmatprep.mubr.bf16.mxu1 %v2867_v35  ;;  %v3731_v3 = vld [vmem:[%s4614_s1 + $0x6b8] sm:$0xff]  }
  0xa8   :  { %3355 = vmatpush3.bf16.msra.mxu0 %v3670_v4  ;;  %v27_v4 = vld [vmem:[%s4615_s0 + $0x60] sm:$0xff] }
  0xa9   :  { %3377 = vmatpush3.bf16.msra.mxu1 %v3671_v5  ;;  %3356 = vmatprep.subr.bf16.mxu0 %v3672_v6  ;;  %v28_v5 = vld [vmem:[%s4615_s0 + $0x68] sm:$0xff]  ;;  %v2868_v6 = vcombine.low %v27_v4, %v27_v4 }
  0xaa   :  { %3378 = vmatprep.subr.bf16.mxu1 %v3673_v7  ;;  %v2869_v7 = vcombine.high %v27_v4, %v27_v4 }
  0xac   :  { %3357 = vmatpush3.bf16.msra.mxu0 %v3674_v8  ;;  %v2870_v8 = vcombine.low %v28_v5, %v28_v5 }
  0xad   :  { %3379 = vmatpush3.bf16.msra.mxu1 %v3675_v9  ;;  %3358 = vmatprep.subr.bf16.mxu0 %v3676_v10  ;;  %v3736_v9 = vld [vmem:[%s4614_s1 + $0x740] sm:$0xff]   ;;  %v2871_v10 = vcombine.high %v28_v5, %v28_v5 }
  0xae   :  { %3380 = vmatprep.subr.bf16.mxu1 %v3677_v11  ;;  %v3737_v11 = vld [vmem:[%s4614_s1 + $0x7c0] sm:$0xff]  }
  0xb0   :  { %3359 = vmatpush3.bf16.msra.mxu0 %v3678_v12  ;;  %v3738_v12 = vld [vmem:[%s4614_s1 + $0x700] sm:$0xff]  }
  0xb1   :  { %3381 = vmatpush3.bf16.msra.mxu1 %v3679_v13  ;;  %3360 = vmatprep.subr.bf16.mxu0 %v3680_v14  ;;  %v3739_v13 = vld [vmem:[%s4614_s1 + $0x780] sm:$0xff]   ;;  %v3740_v14 = vld [vmem:[%s4614_s1 + $0x748] sm:$0xff]  }
  0xb2   :  { %3382 = vmatprep.subr.bf16.mxu1 %v3681_v15  ;;  %v3741_v15 = vld [vmem:[%s4614_s1 + $0x7c8] sm:$0xff]  }
  0xb4   :  { %3361 = vmatpush3.bf16.msra.mxu0 %v3682_v16  ;;  %v3742_v16 = vld [vmem:[%s4614_s1 + $0x708] sm:$0xff]  }
  0xb5   :  { %3383 = vmatpush3.bf16.msra.mxu1 %v3683_v17  ;;  %3362 = vmatprep.subr.bf16.mxu0 %v3684_v18  ;;  %v3743_v17 = vld [vmem:[%s4614_s1 + $0x788] sm:$0xff]   ;;  %v3744_v18 = vld [vmem:[%s4614_s1 + $0x750] sm:$0xff]  }
  0xb6   :  { %3384 = vmatprep.subr.bf16.mxu1 %v3685_v19  ;;  %v3745_v19 = vld [vmem:[%s4614_s1 + $0x7d0] sm:$0xff]  }
  0xb8   :  { %3363 = vmatpush3.bf16.msra.mxu0 %v3686_v20  ;;  %v3746_v20 = vld [vmem:[%s4614_s1 + $0x710] sm:$0xff]  }
  0xb9   :  { %3385 = vmatpush3.bf16.msra.mxu1 %v3687_v21  ;;  %3364 = vmatprep.subr.bf16.mxu0 %v3688_v22  ;;  %v3747_v21 = vld [vmem:[%s4614_s1 + $0x790] sm:$0xff]   ;;  %v3748_v22 = vld [vmem:[%s4614_s1 + $0x758] sm:$0xff]  }
  0xba   :  { %3386 = vmatprep.subr.bf16.mxu1 %v3689_v23  ;;  %v3749_v23 = vld [vmem:[%s4614_s1 + $0x7d8] sm:$0xff]  }
  0xbc   :  { %3365 = vmatpush3.bf16.msra.mxu0 %v3690_v24  ;;  %v3750_v24 = vld [vmem:[%s4614_s1 + $0x718] sm:$0xff]  }
  0xbd   :  { %3387 = vmatpush3.bf16.msra.mxu1 %v3691_v25  ;;  %3366 = vmatprep.subr.bf16.mxu0 %v3692_v26  ;;  %v3751_v25 = vld [vmem:[%s4614_s1 + $0x798] sm:$0xff]   ;;  %v3752_v26 = vld [vmem:[%s4614_s1 + $0x760] sm:$0xff]  }
  0xbe   :  { %3388 = vmatprep.subr.bf16.mxu1 %v3693_v27  ;;  %v3753_v27 = vld [vmem:[%s4614_s1 + $0x7e0] sm:$0xff]  }
  0xc0   :  { %3367 = vmatpush3.bf16.msra.mxu0 %v3694_v28  ;;  %v3754_v28 = vld [vmem:[%s4614_s1 + $0x720] sm:$0xff]  }
  0xc1   :  { %3389 = vmatpush3.bf16.msra.mxu1 %v3695_v29  ;;  %3396 = vmatprep.subr.bf16.mxu0 %v3700_v36 }
  0xc2   :  { %3418 = vmatprep.subr.bf16.mxu1 %v3701_v37  ;;  %v3756_v37 = vld [vmem:[%s4614_s1 + $0x768] sm:$0xff]  }
  0xc3   :  { %2631 = vmatmul.mubr.bf16.vlgmr.msra.gmra.mrb[20].mxu0 %v2864_v32  ;;  %v2843_v32 = vld [vmem:[%s4616_s2] ss:$0 sm:$0xff] }
  0xc4   :  { %2671 = vmatmul.mubr.bf16.vlgmr.msra.gmra.mrb[20].mxu1 %v2866_v34  ;;  %3397 = vmatpush3.bf16.msra.mxu0 %v3702_v38 }
  0xc5   :  { %3419 = vmatpush3.bf16.msra.mxu1 %v3703_v39  ;;  %3398 = vmatprep.subr.bf16.mxu0 %v3704_v40  ;;  %v3757_v39 = vld [vmem:[%s4614_s1 + $0x7e8] sm:$0xff]  }
  0xc6   :  { %3420 = vmatprep.subr.bf16.mxu1 %v3705_v41  ;;  %2710 = vmatprep.mubr.bf16.mxu0 %v2869_v7 }
  0xc7   :  { %2750 = vmatprep.mubr.bf16.mxu1 %v2871_v10 }
  0xc8   :  { %3399 = vmatpush3.bf16.msra.mxu0 %v3706_v42  ;;  %v3758_v42 = vld [vmem:[%s4614_s1 + $0x728] sm:$0xff]  }
  0xc9   :  { %3421 = vmatpush3.bf16.msra.mxu1 %v3707_v43  ;;  %3400 = vmatprep.subr.bf16.mxu0 %v3708_v44  ;;  %v3759_v44 = vld [vmem:[%s4614_s1 + $0x7a8] sm:$0xff]  }
  0xca   :  { %3422 = vmatprep.subr.bf16.mxu1 %v3709_v45 }
  0xcc   :  { %3401 = vmatpush3.bf16.msra.mxu0 %v3710_v46 }
  0xcd   :  { %3423 = vmatpush3.bf16.msra.mxu1 %v3711_v47  ;;  %3402 = vmatprep.subr.bf16.mxu0 %v3712_v48  ;;  %v3760_v47 = vld [vmem:[%s4614_s1 + $0x770] sm:$0xff]  }
  0xce   :  { %3424 = vmatprep.subr.bf16.mxu1 %v3713_v49  ;;  %v3761_v48 = vld [vmem:[%s4614_s1 + $0x7f0] sm:$0xff]  }
  0xcf   :  { %v3762_v49 = vld [vmem:[%s4614_s1 + $0x730] sm:$0xff]  }
  0xd0   :  { %3403 = vmatpush3.bf16.msra.mxu0 %v3714_v50  ;;  %v3763_v50 = vld [vmem:[%s4614_s1 + $0x7b0] sm:$0xff]  }
  0xd1   :  { %3425 = vmatpush3.bf16.msra.mxu1 %v3715_v51  ;;  %3404 = vmatprep.subr.bf16.mxu0 %v3716_v52  ;;  %v3764_v51 = vld [vmem:[%s4614_s1 + $0x778] sm:$0xff]  }
  0xd2   :  { %3426 = vmatprep.subr.bf16.mxu1 %v3717_v53  ;;  %v3765_v52 = vld [vmem:[%s4614_s1 + $0x7f8] sm:$0xff]  }
  0xd3   :  { %v3766_v53 = vld [vmem:[%s4614_s1 + $0x738] sm:$0xff]  }
  0xd4   :  { %3405 = vmatpush3.bf16.msra.mxu0 %v3718_v54  ;;  %v3767_v54 = vld [vmem:[%s4614_s1 + $0x7b8] sm:$0xff]  }
  0xd5   :  { %3427 = vmatpush3.bf16.msra.mxu1 %v3719_v55  ;;  %3406 = vmatprep.subr.bf16.mxu0 %v3720_v56  ;;  %v29_v55 = vld [vmem:[%s4615_s0 + $0x70] sm:$0xff]  ;;  %v30_v56 = vld [vmem:[%s4615_s0 + $0x78] sm:$0xff] }
  0xd6   :  { %3428 = vmatprep.subr.bf16.mxu1 %v3721_v57  ;;  %v2872_v57 = vcombine.low %v29_v55, %v29_v55 }
  0xd8   :  { %3407 = vmatpush3.bf16.msra.mxu0 %v3722_v58  ;;  %v2873_v58 = vcombine.high %v29_v55, %v29_v55 }
  0xd9   :  { %3429 = vmatpush3.bf16.msra.mxu1 %v3723_v59  ;;  %3408 = vmatprep.subr.bf16.mxu0 %v3724_v60  ;;  %v2874_v59 = vcombine.low %v30_v56, %v30_v56  ;;  %v2875_v60 = vcombine.high %v30_v56, %v30_v56 }
  0xda   :  { %3430 = vmatprep.subr.bf16.mxu1 %v3725_v61 }
  0xdc   :  { %3409 = vmatpush3.bf16.msra.mxu0 %v3726_v62 }
  0xdd   :  { %3431 = vmatpush3.bf16.msra.mxu1 %v3727_v63  ;;  %3410 = vmatprep.subr.bf16.mxu0 %v3728_v0 }
  0xde   :  { %3432 = vmatprep.subr.bf16.mxu1 %v3729_v1 }
  0xe0   :  { %3411 = vmatpush3.bf16.msra.mxu0 %v3730_v2 }
  0xe1   :  { %3433 = vmatpush3.bf16.msra.mxu1 %v3731_v3  ;;  %3440 = vmatprep.subr.bf16.mxu0 %v3736_v9 }
  0xe2   :  { %3462 = vmatprep.subr.bf16.mxu1 %v3737_v11 }
  0xe3   :  { %2711 = vmatmul.mubr.bf16.vlgmr.msra.gmra.mrb[24].mxu0 %v2868_v6 }
  0xe4   :  { %2751 = vmatmul.mubr.bf16.vlgmr.msra.gmra.mrb[24].mxu1 %v2870_v8  ;;  %3441 = vmatpush3.bf16.msra.mxu0 %v3738_v12 }
  0xe5   :  { %3463 = vmatpush3.bf16.msra.mxu1 %v3739_v13  ;;  %3442 = vmatprep.subr.bf16.mxu0 %v3740_v14 }
  0xe6   :  { %3464 = vmatprep.subr.bf16.mxu1 %v3741_v15  ;;  %2790 = vmatprep.mubr.bf16.mxu0 %v2873_v58 }
  0xe7   :  { %2830 = vmatprep.mubr.bf16.mxu1 %v2875_v60 }
  0xe8   :  { %3443 = vmatpush3.bf16.msra.mxu0 %v3742_v16 }
  0xe9   :  { %3465 = vmatpush3.bf16.msra.mxu1 %v3743_v17  ;;  %3444 = vmatprep.subr.bf16.mxu0 %v3744_v18 }
  0xea   :  { %3466 = vmatprep.subr.bf16.mxu1 %v3745_v19 }
  0xec   :  { %3445 = vmatpush3.bf16.msra.mxu0 %v3746_v20 }
  0xed   :  { %3467 = vmatpush3.bf16.msra.mxu1 %v3747_v21  ;;  %3446 = vmatprep.subr.bf16.mxu0 %v3748_v22 }
  0xee   :  { %3468 = vmatprep.subr.bf16.mxu1 %v3749_v23 }
  0xf0   :  { %3447 = vmatpush3.bf16.msra.mxu0 %v3750_v24 }
  0xf1   :  { %3469 = vmatpush3.bf16.msra.mxu1 %v3751_v25  ;;  %3448 = vmatprep.subr.bf16.mxu0 %v3752_v26 }
  0xf2   :  { %3470 = vmatprep.subr.bf16.mxu1 %v3753_v27 }
  0xf4   :  { %3449 = vmatpush3.bf16.msra.mxu0 %v3754_v28 }
  0xf5   :  { %3471 = vmatpush3.bf16.msra.mxu1 %v3755_v30  ;;  %3450 = vmatprep.subr.bf16.mxu0 %v3756_v37 }
  0xf6   :  { %v3148_v29 = vpop.f32.mrb[0].mxu0  ;;  %3472 = vmatprep.subr.bf16.mxu1 %v3757_v39 }
  0xf7   :  { %v3170_v31 = vpop.f32.mrb[0].mxu1  ;;  %v3149_v33 = vpop.f32.mrb[1].mxu0 }
  0xf8   :  { %v3171_v34 = vpop.f32.mrb[1].mxu1  ;;  %v3150_v35 = vadd.f32 %v3149_v33, %v3148_v29  ;;  %v3151_v38 = vpop.f32.mrb[2].mxu0  ;;  %3451 = vmatpush3.bf16.msra.mxu0 %v3758_v42 }
  0xf9   :  { %v3172_v36 = vadd.f32 %v3171_v34, %v3170_v31  ;;  %v3173_v40 = vpop.f32.mrb[2].mxu1  ;;  %v3152_v43 = vpop.f32.mrb[3].mxu0  ;;  %3473 = vmatpush3.bf16.msra.mxu1 %v3759_v44  ;;  %3452 = vmatprep.subr.bf16.mxu0 %v3760_v47 }
  0xfa   :  { %v2233_v41 = vadd.f32 %v3150_v35, %v2843_v32  ;;  %v3174_v45 = vpop.f32.mrb[3].mxu1  ;;  %3474 = vmatprep.subr.bf16.mxu1 %v3761_v48 }
  0xfc   :  { %v2273_v46 = vadd.f32 %v3172_v36, %v2233_v41  ;;  %3453 = vmatpush3.bf16.msra.mxu0 %v3762_v49 }
  0xfd   :  { %3475 = vmatpush3.bf16.msra.mxu1 %v3763_v50  ;;  %3454 = vmatprep.subr.bf16.mxu0 %v3764_v51 }
  0xfe   :  { %3476 = vmatprep.subr.bf16.mxu1 %v3765_v52 }
 0x100   :  { %3455 = vmatpush3.bf16.msra.mxu0 %v3766_v53 }
 0x101   :  { %3477 = vmatpush3.bf16.msra.mxu1 %v3767_v54 }
 0x103   :  { %2791 = vmatmul.mubr.bf16.vlgmr.msra.gmra.mrb[28].mxu0 %v2872_v57 }
 0x104   :  { %2831 = vmatmul.mubr.bf16.vlgmr.msra.gmra.mrb[28].mxu1 %v2874_v59 }
 0x116   :  { %v3192_v61 = vpop.f32.mrb[4].mxu0 }
 0x117   :  { %v3214_v62 = vpop.f32.mrb[4].mxu1  ;;  %v3193_v63 = vpop.f32.mrb[5].mxu0 }
 0x118   :  { %v3215_v0 = vpop.f32.mrb[5].mxu1  ;;  %v3194_v1 = vadd.f32 %v3193_v63, %v3192_v61  ;;  %v3195_v3 = vpop.f32.mrb[6].mxu0 }
 0x119   :  { %v3216_v2 = vadd.f32 %v3215_v0, %v3214_v62  ;;  %v3217_v4 = vpop.f32.mrb[6].mxu1  ;;  %v3196_v5 = vpop.f32.mrb[7].mxu0 }
 0x11a   :  { %v3218_v6 = vpop.f32.mrb[7].mxu1  ;;  %v2313_v7 = vadd.f32 %v3194_v1, %v2273_v46 }
 0x11c   :  { %v2353_v8 = vadd.f32 %v3216_v2, %v2313_v7 }
 0x136   :  { %v3236_v9 = vpop.f32.mrb[8].mxu0 }
 0x137   :  { %v3258_v10 = vpop.f32.mrb[8].mxu1  ;;  %v3237_v11 = vpop.f32.mrb[9].mxu0 }
 0x138   :  { %v3238_v12 = vadd.f32 %v3237_v11, %v3236_v9  ;;  %v3259_v13 = vpop.f32.mrb[9].mxu1  ;;  %v3239_v14 = vpop.f32.mrb[10].mxu0 }
 0x139   :  { %v3260_v15 = vadd.f32 %v3259_v13, %v3258_v10  ;;  %v3261_v16 = vpop.f32.mrb[10].mxu1  ;;  %v3240_v17 = vpop.f32.mrb[11].mxu0 }
 0x13a   :  { %v2393_v18 = vadd.f32 %v3238_v12, %v2353_v8  ;;  %v3262_v19 = vpop.f32.mrb[11].mxu1 }
 0x13c   :  { %v2433_v20 = vadd.f32 %v3260_v15, %v2393_v18 }
 0x156   :  { %v3280_v21 = vpop.f32.mrb[12].mxu0 }
 0x157   :  { %v3302_v22 = vpop.f32.mrb[12].mxu1  ;;  %v3281_v23 = vpop.f32.mrb[13].mxu0 }
 0x158   :  { %v3282_v24 = vadd.f32 %v3281_v23, %v3280_v21  ;;  %v3303_v25 = vpop.f32.mrb[13].mxu1  ;;  %v3283_v26 = vpop.f32.mrb[14].mxu0 }
 0x159   :  { %v3304_v27 = vadd.f32 %v3303_v25, %v3302_v22  ;;  %v3305_v28 = vpop.f32.mrb[14].mxu1  ;;  %v3284_v29 = vpop.f32.mrb[15].mxu0 }
 0x15a   :  { %v2473_v30 = vadd.f32 %v3282_v24, %v2433_v20  ;;  %v3306_v31 = vpop.f32.mrb[15].mxu1 }
 0x15c   :  { %v2513_v32 = vadd.f32 %v3304_v27, %v2473_v30 }
 0x176   :  { %v3324_v33 = vpop.f32.mrb[16].mxu0 }
 0x177   :  { %v3346_v34 = vpop.f32.mrb[16].mxu1  ;;  %v3325_v35 = vpop.f32.mrb[17].mxu0 }
 0x178   :  { %v3347_v36 = vpop.f32.mrb[17].mxu1  ;;  %v3326_v37 = vadd.f32 %v3325_v35, %v3324_v33  ;;  %v3327_v39 = vpop.f32.mrb[18].mxu0 }
 0x179   :  { %v3348_v38 = vadd.f32 %v3347_v36, %v3346_v34  ;;  %v3349_v40 = vpop.f32.mrb[18].mxu1  ;;  %v3328_v41 = vpop.f32.mrb[19].mxu0 }
 0x17a   :  { %v3350_v42 = vpop.f32.mrb[19].mxu1  ;;  %v2553_v43 = vadd.f32 %v3326_v37, %v2513_v32 }
 0x17c   :  { %v2593_v44 = vadd.f32 %v3348_v38, %v2553_v43 }
 0x196   :  { %v3368_v45 = vpop.f32.mrb[20].mxu0 }
 0x197   :  { %v3390_v46 = vpop.f32.mrb[20].mxu1  ;;  %v3369_v47 = vpop.f32.mrb[21].mxu0 }
 0x198   :  { %v3370_v48 = vadd.f32 %v3369_v47, %v3368_v45  ;;  %v3391_v49 = vpop.f32.mrb[21].mxu1  ;;  %v3371_v50 = vpop.f32.mrb[22].mxu0 }
 0x199   :  { %v3392_v51 = vadd.f32 %v3391_v49, %v3390_v46  ;;  %v3393_v52 = vpop.f32.mrb[22].mxu1  ;;  %v3372_v53 = vpop.f32.mrb[23].mxu0 }
 0x19a   :  { %v2633_v54 = vadd.f32 %v3370_v48, %v2593_v44  ;;  %v3394_v55 = vpop.f32.mrb[23].mxu1 }
 0x19c   :  { %v2673_v56 = vadd.f32 %v3392_v51, %v2633_v54 }
 0x1b6   :  { %v3412_v57 = vpop.f32.mrb[24].mxu0 }
 0x1b7   :  { %v3434_v58 = vpop.f32.mrb[24].mxu1  ;;  %v3413_v59 = vpop.f32.mrb[25].mxu0 }
 0x1b8   :  { %v3414_v60 = vadd.f32 %v3413_v59, %v3412_v57  ;;  %v3435_v61 = vpop.f32.mrb[25].mxu1  ;;  %v3415_v62 = vpop.f32.mrb[26].mxu0 }
 0x1b9   :  { %v3436_v63 = vadd.f32 %v3435_v61, %v3434_v58  ;;  %v3437_v0 = vpop.f32.mrb[26].mxu1  ;;  %v3416_v1 = vpop.f32.mrb[27].mxu0 }
 0x1ba   :  { %v2713_v2 = vadd.f32 %v3414_v60, %v2673_v56  ;;  %v3438_v3 = vpop.f32.mrb[27].mxu1 }
 0x1bc   :  { %v2753_v4 = vadd.f32 %v3436_v63, %v2713_v2 }
 0x1d6   :  { %v3456_v5 = vpop.f32.mrb[28].mxu0 }
 0x1d7   :  { %v3478_v6 = vpop.f32.mrb[28].mxu1  ;;  %v3457_v7 = vpop.f32.mrb[29].mxu0 }
 0x1d8   :  { %v3458_v8 = vadd.f32 %v3457_v7, %v3456_v5  ;;  %v3479_v9 = vpop.f32.mrb[29].mxu1  ;;  %v3459_v10 = vpop.f32.mrb[30].mxu0 }
 0x1d9   :  { %v3480_v11 = vadd.f32 %v3479_v9, %v3478_v6  ;;  %v3481_v12 = vpop.f32.mrb[30].mxu1  ;;  %v3460_v13 = vpop.f32.mrb[31].mxu0 }
 0x1da   :  { %v2793_v14 = vadd.f32 %v3458_v8, %v2753_v4  ;;  %v3482_v15 = vpop.f32.mrb[31].mxu1 }
 0x1dc   :  { %v2833_v16 = vadd.f32 %v3480_v11, %v2793_v14 }
 0x1de   :  { %2838 = vst [vmem:[%s4617_s3] sm:$0xff] %v2833_v16 }

</bundles_post_ra>
